<compile_context>
chip_gen: v7x
topology: tpu7x:2x2x1
jax: 0.10.0
libtpu: 0.0.40
codegen_flags: <defaults>
</compile_context>

<pallas_src>
import functools

import jax
import jax.numpy as jnp
from jax.experimental import pallas as pl
from jax.experimental.pallas import tpu as pltpu

# ---- module configuration (CommonNeRF / VolSDF defaults, shrunk for the demo) ----
STEPS = 8            # CommonNeRF.steps (number of samples per ray)
T_NEAR = 0.0         # CommonNeRF.t_near
T_FAR = 1.0          # CommonNeRF.t_far
SDF_HIDDEN = 32      # hidden width of the synthetic SDF MLP
REFL_HIDDEN = 32     # hidden width of the synthetic reflectance MLP
LATENT = 8           # sdf.intermediate_size (latent emitted by sdf.from_pts)
SCALE_INIT = 0.1     # VolSDF.scale parameter (scale_act = identity)
RAY_TILE = 256       # rays per grid step (lane-dense; multiple of 128)


def volsdf_kernel(ts_ref, dists_ref, scale_ref, ro_ref, rd_ref,
                  w0t_ref, b0_ref, w1t_ref, b1_ref,
                  wheadt_ref, bhead_ref,
                  rpt_ref, rvt_ref, rb0_ref,
                  r1t_ref, rb1_ref, r2t_ref, rb2_ref,
                  out_ref):
    f32 = jnp.float32
    bf16 = jnp.bfloat16

    r_o = ro_ref[...]                         # [3, RN]  (rays on lanes)
    r_d = rd_ref[...]                         # [3, RN]
    rn = r_o.shape[1]
    num_steps = ts_ref.shape[0]               # static

    # ||r_d|| per ray (torch.linalg.norm(r_d, dim=-1)) -> lane-dense [1, RN]
    rd_norm = jnp.sqrt(jnp.sum(r_d * r_d, axis=0, keepdims=True))

    scale = scale_ref[0]                      # VolSDF.scale (scale_act = identity)
    inv_scale = 1.0 / scale

    w0t = w0t_ref[...]; b0 = b0_ref[...]                     # f32 (hoisted matmuls)
    rpt = rpt_ref[...]; rvt = rvt_ref[...]; rb0 = rb0_ref[...]
    w1t = w1t_ref[...]; b1 = b1_ref[...]                     # w1t/wheadt/r1t/r2t are bf16
    wheadt = wheadt_ref[...]; bhead = bhead_ref[...]
    r1t = r1t_ref[...]; rb1 = rb1_ref[...]
    r2t = r2t_ref[...]; rb2 = rb2_ref[...]

    # pts = r_o + t*r_d  =>  W @ pts = (W @ r_o) + t * (W @ r_d): hoist the K=3 matmuls
    # out of the step loop; in-loop they become a single VPU FMA.
    base_h = jnp.dot(w0t, r_o, preferred_element_type=f32) + b0        # [H,  RN]
    slope_h = jnp.dot(w0t, r_d, preferred_element_type=f32)            # [H,  RN]
    # view == r_d for every step (view = r_d.unsqueeze(0).expand_as(pts)): fold its
    # layer-0 contribution (and the bias) into the static part.
    base_g = (jnp.dot(rpt, r_o, preferred_element_type=f32)
              + jnp.dot(rvt, r_d, preferred_element_type=f32) + rb0)   # [H2, RN]
    slope_g = jnp.dot(rpt, r_d, preferred_element_type=f32)            # [H2, RN]

    def step(t, carry):
        acc, running = carry
        t_val = ts_ref[t]               # scalar from SMEM
        d_val = dists_ref[t]

        # --- sdf.from_pts(pts): synthetic SDF MLP -> (sdf value, latent path) ---
        h0 = jnp.maximum(base_h + t_val * slope_h, 0.0)                        # [H, RN]
        h1 = jnp.maximum(
            jnp.dot(w1t, h0.astype(bf16), preferred_element_type=f32) + b1, 0.0)
        # Fused head: rows [0:H2) = (rl o w2l)(h1) contribution to the reflectance
        # layer-0; row [H2] = sdf value.  One matmul instead of (w2s, w2l, rl).
        head = jnp.dot(wheadt, h1.astype(bf16), preferred_element_type=f32) + bhead
        rl_part = head[0:REFL_HIDDEN, :]                                       # [H2, RN]
        sdf = head[REFL_HIDDEN:REFL_HIDDEN + 1, :]                             # [1,  RN]

        # --- density = 1/scale * laplace_cdf(-sdf, scale), one-sided exp form ---
        scaled = -sdf * inv_scale
        e = 0.5 * jnp.exp(-jnp.abs(scaled))
        cdf = jnp.where(scaled <= 0.0, e, 1.0 - e)
        density = inv_scale * cdf

        # --- alpha_from_density(density, ts, r_d, softplus=False) ---
        sigma = jnp.maximum(density, 0.0)            # F.relu(density)
        dist = d_val * rd_norm                       # dists[t] * ||r_d||     [1, RN]
        alpha = 1.0 - jnp.exp(-sigma * dist)         # [1, RN]
        weight = alpha * running                     # alpha * excl cumprod(1-alpha+1e-10)
        new_running = running * (1.0 - alpha + 1e-10)

        # --- rgb = sdf.refl(x=pts, view=r_d, latent=lat): synthetic reflectance MLP ---
        g0 = jnp.maximum(base_g + t_val * slope_g + rl_part, 0.0)              # [H2, RN]
        g1 = jnp.maximum(
            jnp.dot(r1t, g0.astype(bf16), preferred_element_type=f32) + rb1, 0.0)
        rgb = jax.nn.sigmoid(
            jnp.dot(r2t, g1.astype(bf16), preferred_element_type=f32) + rb2)   # [3, RN]
        # TODO(synk): refl act uses plain sigmoid; load_sigmoid('thin') is an external dep.

        # --- volumetric_integrate: sum_t weights[t, ..., None] * rgb[t] ---
        return acc + weight * rgb, new_running

    acc0 = jnp.zeros((3, rn), f32)
    run0 = jnp.ones((1, rn), f32)
    acc, _ = jax.lax.fori_loop(0, num_steps, step, (acc0, run0), unroll=True)

    out_ref[...] = acc                               # lane-dense [3, RN] store


def make_params(seed=42):
    """Deterministic synthetic weights for the SDF and reflectance MLPs."""
    keys = jax.random.split(jax.random.PRNGKey(seed), 16)

    def lin(k, fan_in, fan_out, gain=1.0):
        return (gain / jnp.sqrt(jnp.float32(fan_in))) * jax.random.normal(
            k, (fan_in, fan_out), jnp.float32)

    p = {}
    # SDF MLP: 3 -> 32 -> 32 -> (1 sdf value, LATENT latent)
    p["w0"] = lin(keys[0], 3, SDF_HIDDEN)
    p["b0"] = 0.01 * jax.random.normal(keys[1], (1, SDF_HIDDEN), jnp.float32)
    p["w1"] = lin(keys[2], SDF_HIDDEN, SDF_HIDDEN)
    p["b1"] = 0.01 * jax.random.normal(keys[3], (1, SDF_HIDDEN), jnp.float32)
    p["w2s"] = lin(keys[4], SDF_HIDDEN, 1)
    p["b2s"] = 0.05 * jnp.ones((1, 1), jnp.float32)
    p["w2l"] = lin(keys[5], SDF_HIDDEN, LATENT)
    p["b2l"] = jnp.zeros((1, LATENT), jnp.float32)
    # Reflectance MLP on concat([pts, view, latent]) -> 3, first layer kept split
    # (pts / view / latent blocks) so no in-kernel concat is required.
    p["rp"] = lin(keys[6], 3, REFL_HIDDEN)
    p["rv"] = lin(keys[7], 3, REFL_HIDDEN)
    p["rl"] = lin(keys[8], LATENT, REFL_HIDDEN)
    p["rb0"] = 0.01 * jax.random.normal(keys[9], (1, REFL_HIDDEN), jnp.float32)
    p["r1"] = lin(keys[10], REFL_HIDDEN, REFL_HIDDEN)
    p["rb1"] = 0.01 * jax.random.normal(keys[11], (1, REFL_HIDDEN), jnp.float32)
    p["r2"] = lin(keys[12], REFL_HIDDEN, 3)
    p["rb2"] = jnp.zeros((1, 3), jnp.float32)
    return p


def _prep_kernel_weights(params):
    """Transpose (feature-major), fuse (w2s | rl o w2l), and bf16-cast in-loop weights."""
    bf16 = jnp.bfloat16
    # rl.T @ w2l.T == (w2l @ rl).T : composes the latent head with the reflectance
    # layer-0 latent block, removing two matmuls from the step loop.
    rl_fused_w = (params["w2l"] @ params["rl"]).T            # [H2, H]
    rl_fused_b = (params["b2l"] @ params["rl"]).T            # [H2, 1]
    return [
        params["w0"].T, params["b0"].T,                                        # f32
        params["w1"].T.astype(bf16), params["b1"].T,
        jnp.concatenate([rl_fused_w, params["w2s"].T], axis=0).astype(bf16),   # [H2+1, H]
        jnp.concatenate([rl_fused_b, params["b2s"].T], axis=0),                # [H2+1, 1]
        params["rp"].T, params["rv"].T, params["rb0"].T,                       # f32
        params["r1"].T.astype(bf16), params["rb1"].T,
        params["r2"].T.astype(bf16), params["rb2"].T,
    ]


@functools.partial(jax.jit, static_argnames=("ray_tile",))
def volsdf_forward(rays, params, scale, ray_tile=RAY_TILE):
    """VolSDF.forward(rays): rays [B, H, W, 6] -> integrated rgb [B, H, W, 3]."""
    B, H, W, C = rays.shape
    assert C == 6
    N = B * H * W

    # Keep the grid length >= 2 when possible (shards rays across v7x's 2 TensorCores),
    # while keeping the lane-axis tile a multiple of 128.
    if N < 2 * ray_tile:
        ray_tile = max(128, ((N // 2) // 128) * 128)
    n_pad = -(-N // ray_tile) * ray_tile

    # compute_ts (eval mode, perturb = 0, lindisp = False) + dists (glue, tiny 1-D work)
    ts = jnp.linspace(T_NEAR, T_FAR, STEPS, dtype=jnp.float32)                 # [T]
    dists = jnp.concatenate(
        [ts[1:] - ts[:-1], jnp.full((1,), 1e10, jnp.float32)], axis=0)
    dists = jnp.maximum(dists, 1e-5)                                           # [T]

    # Ray-on-lane layout: [3, N] with the ray index on the lane axis.
    rays_flat = rays.reshape(N, 6)
    r_o = rays_flat[:, 0:3].T
    r_d = rays_flat[:, 3:6].T
    if n_pad != N:
        pad = ((0, 0), (0, n_pad - N))
        r_o = jnp.pad(r_o, pad)
        r_d = jnp.pad(r_d, pad)

    kweights = _prep_kernel_weights(params)

    smem_spec = pl.BlockSpec(memory_space=pltpu.MemorySpace.SMEM)
    ray_spec = pl.BlockSpec((3, ray_tile), lambda i: (0, i))
    weight_specs = [pl.BlockSpec(w.shape, lambda i: (0, 0)) for w in kweights]

    out = pl.pallas_call(
        volsdf_kernel,
        out_shape=jax.ShapeDtypeStruct((3, n_pad), jnp.float32),
        grid=(n_pad // ray_tile,),
        in_specs=[smem_spec, smem_spec, smem_spec, ray_spec, ray_spec] + weight_specs,
        out_specs=pl.BlockSpec((3, ray_tile), lambda i: (0, i)),
        compiler_params=pltpu.CompilerParams(dimension_semantics=("parallel",)),
    )(ts, dists, scale, r_o, r_d, *kweights)

    return out[:, :N].T.reshape(B, H, W, 3)


# TODO(synk): the external `sdf` / `refl` sub-modules (SkipConnMLP + Fourier encoders),
#   mip encoding, per-pixel/instance latents, occ_kind secondary integrators (direct/path)
#   and non-black sky backgrounds are external deps / disabled by default; only the default
#   forward path (black bg, no mip, no latents, no secondary) is implemented here.


if __name__ == "__main__":
    key = jax.random.PRNGKey(0)
    k_o, k_d = jax.random.split(key)
    B, H, W = 2, 16, 16
    r_o = jax.random.uniform(k_o, (B, H, W, 3), jnp.float32, minval=-0.5, maxval=0.5)
    r_d = jax.random.normal(k_d, (B, H, W, 3), jnp.float32)
    r_d = r_d / jnp.linalg.norm(r_d, axis=-1, keepdims=True)
    rays = jnp.concatenate([r_o, r_d], axis=-1)          # [B, H, W, 6]

    params = make_params()
    scale = jnp.array([SCALE_INIT], jnp.float32)         # VolSDF.scale parameter

    out = volsdf_forward(rays, params, scale)
    out = jax.block_until_ready(out)

    assert out.shape == (B, H, W, 3), out.shape
    assert bool(jnp.all(jnp.isfinite(out)))
    print("KERNEL_OK")
</pallas_src>

<mosaic_0001>
module attributes {stable_mosaic.version = 11 : i64} {
  func.func @volsdf_kernel(%arg0: i32, %arg1: memref<8xf32, #tpu.memory_space<smem>>, %arg2: memref<8xf32, #tpu.memory_space<smem>>, %arg3: memref<1xf32, #tpu.memory_space<smem>>, %arg4: memref<3x256xf32, #tpu.memory_space<vmem>>, %arg5: memref<3x256xf32, #tpu.memory_space<vmem>>, %arg6: memref<32x3xf32, #tpu.memory_space<vmem>>, %arg7: memref<32x1xf32, #tpu.memory_space<vmem>>, %arg8: memref<32x32xbf16, #tpu.memory_space<vmem>>, %arg9: memref<32x1xf32, #tpu.memory_space<vmem>>, %arg10: memref<33x32xbf16, #tpu.memory_space<vmem>>, %arg11: memref<33x1xf32, #tpu.memory_space<vmem>>, %arg12: memref<32x3xf32, #tpu.memory_space<vmem>>, %arg13: memref<32x3xf32, #tpu.memory_space<vmem>>, %arg14: memref<32x1xf32, #tpu.memory_space<vmem>>, %arg15: memref<32x32xbf16, #tpu.memory_space<vmem>>, %arg16: memref<32x1xf32, #tpu.memory_space<vmem>>, %arg17: memref<3x32xbf16, #tpu.memory_space<vmem>>, %arg18: memref<3x1xf32, #tpu.memory_space<vmem>>, %arg19: memref<3x256xf32, #tpu.memory_space<vmem>>) attributes {dimension_semantics = [#tpu.dimension_semantics<parallel>], iteration_bounds = array<i64: 2>, scalar_prefetch = 0 : i64, scratch_operands = 0 : i64, tpu.core_type = #tpu.core_type<tc>, window_params = [{transform_indices = @transform_0, window_bounds = array<i64: 8>}, {transform_indices = @transform_1, window_bounds = array<i64: 8>}, {transform_indices = @transform_2, window_bounds = array<i64: 1>}, {transform_indices = @transform_3, window_bounds = array<i64: 3, 256>}, {transform_indices = @transform_4, window_bounds = array<i64: 3, 256>}, {pipeline_mode = #tpu.pipeline_mode<synchronous>, transform_indices = @transform_5, window_bounds = array<i64: 32, 3>}, {pipeline_mode = #tpu.pipeline_mode<synchronous>, transform_indices = @transform_6, window_bounds = array<i64: 32, 1>}, {pipeline_mode = #tpu.pipeline_mode<synchronous>, transform_indices = @transform_7, window_bounds = array<i64: 32, 32>}, {pipeline_mode = #tpu.pipeline_mode<synchronous>, transform_indices = @transform_8, window_bounds = array<i64: 32, 1>}, {pipeline_mode = #tpu.pipeline_mode<synchronous>, transform_indices = @transform_9, window_bounds = array<i64: 33, 32>}, {pipeline_mode = #tpu.pipeline_mode<synchronous>, transform_indices = @transform_10, window_bounds = array<i64: 33, 1>}, {pipeline_mode = #tpu.pipeline_mode<synchronous>, transform_indices = @transform_11, window_bounds = array<i64: 32, 3>}, {pipeline_mode = #tpu.pipeline_mode<synchronous>, transform_indices = @transform_12, window_bounds = array<i64: 32, 3>}, {pipeline_mode = #tpu.pipeline_mode<synchronous>, transform_indices = @transform_13, window_bounds = array<i64: 32, 1>}, {pipeline_mode = #tpu.pipeline_mode<synchronous>, transform_indices = @transform_14, window_bounds = array<i64: 32, 32>}, {pipeline_mode = #tpu.pipeline_mode<synchronous>, transform_indices = @transform_15, window_bounds = array<i64: 32, 1>}, {pipeline_mode = #tpu.pipeline_mode<synchronous>, transform_indices = @transform_16, window_bounds = array<i64: 3, 32>}, {pipeline_mode = #tpu.pipeline_mode<synchronous>, transform_indices = @transform_17, window_bounds = array<i64: 3, 1>}, {transform_indices = @transform_18, window_bounds = array<i64: 3, 256>}]} {
    %c0 = arith.constant 0 : index
    %c0_0 = arith.constant 0 : index
    %0 = vector.load %arg4[%c0, %c0_0] : memref<3x256xf32, #tpu.memory_space<vmem>>, vector<3x256xf32>
    %c0_1 = arith.constant 0 : index
    %c0_2 = arith.constant 0 : index
    %1 = vector.load %arg5[%c0_1, %c0_2] : memref<3x256xf32, #tpu.memory_space<vmem>>, vector<3x256xf32>
    %2 = arith.mulf %1, %1 : vector<3x256xf32>
    %cst = arith.constant dense<0.000000e+00> : vector<256xf32>
    %3 = vector.multi_reduction <add>, %2, %cst [0] : vector<3x256xf32> to vector<256xf32>
    %4 = vector.shape_cast %3 : vector<256xf32> to vector<1x256xf32>
    %5 = math.sqrt %4 : vector<1x256xf32>
    %c0_3 = arith.constant 0 : index
    %6 = memref.load %arg3[%c0_3] : memref<1xf32, #tpu.memory_space<smem>>
    %cst_4 = arith.constant 1.000000e+00 : f32
    %7 = arith.divf %cst_4, %6 : f32
    %c0_5 = arith.constant 0 : index
    %c0_6 = arith.constant 0 : index
    %8 = vector.load %arg6[%c0_5, %c0_6] : memref<32x3xf32, #tpu.memory_space<vmem>>, vector<32x3xf32>
    %c0_7 = arith.constant 0 : index
    %c0_8 = arith.constant 0 : index
    %9 = vector.load %arg7[%c0_7, %c0_8] : memref<32x1xf32, #tpu.memory_space<vmem>>, vector<32x1xf32>
    %c0_9 = arith.constant 0 : index
    %c0_10 = arith.constant 0 : index
    %10 = vector.load %arg12[%c0_9, %c0_10] : memref<32x3xf32, #tpu.memory_space<vmem>>, vector<32x3xf32>
    %c0_11 = arith.constant 0 : index
    %c0_12 = arith.constant 0 : index
    %11 = vector.load %arg13[%c0_11, %c0_12] : memref<32x3xf32, #tpu.memory_space<vmem>>, vector<32x3xf32>
    %c0_13 = arith.constant 0 : index
    %c0_14 = arith.constant 0 : index
    %12 = vector.load %arg14[%c0_13, %c0_14] : memref<32x1xf32, #tpu.memory_space<vmem>>, vector<32x1xf32>
    %c0_15 = arith.constant 0 : index
    %c0_16 = arith.constant 0 : index
    %13 = vector.load %arg8[%c0_15, %c0_16] : memref<32x32xbf16, #tpu.memory_space<vmem>>, vector<32x32xbf16>
    %c0_17 = arith.constant 0 : index
    %c0_18 = arith.constant 0 : index
    %14 = vector.load %arg9[%c0_17, %c0_18] : memref<32x1xf32, #tpu.memory_space<vmem>>, vector<32x1xf32>
    %c0_19 = arith.constant 0 : index
    %c0_20 = arith.constant 0 : index
    %15 = vector.load %arg10[%c0_19, %c0_20] : memref<33x32xbf16, #tpu.memory_space<vmem>>, vector<33x32xbf16>
    %c0_21 = arith.constant 0 : index
    %c0_22 = arith.constant 0 : index
    %16 = vector.load %arg11[%c0_21, %c0_22] : memref<33x1xf32, #tpu.memory_space<vmem>>, vector<33x1xf32>
    %c0_23 = arith.constant 0 : index
    %c0_24 = arith.constant 0 : index
    %17 = vector.load %arg15[%c0_23, %c0_24] : memref<32x32xbf16, #tpu.memory_space<vmem>>, vector<32x32xbf16>
    %c0_25 = arith.constant 0 : index
    %c0_26 = arith.constant 0 : index
    %18 = vector.load %arg16[%c0_25, %c0_26] : memref<32x1xf32, #tpu.memory_space<vmem>>, vector<32x1xf32>
    %c0_27 = arith.constant 0 : index
    %c0_28 = arith.constant 0 : index
    %19 = vector.load %arg17[%c0_27, %c0_28] : memref<3x32xbf16, #tpu.memory_space<vmem>>, vector<3x32xbf16>
    %c0_29 = arith.constant 0 : index
    %c0_30 = arith.constant 0 : index
    %20 = vector.load %arg18[%c0_29, %c0_30] : memref<3x1xf32, #tpu.memory_space<vmem>>, vector<3x1xf32>
    %cst_31 = arith.constant dense<0.000000e+00> : vector<32x256xf32>
    %21 = tpu.matmul %8, %0, %cst_31 {dimension_numbers = #tpu.dot_dimension_numbers<[1], [0], [0], [1], [0, 0, 1, 1], [], []>} : vector<32x3xf32>, vector<3x256xf32>, vector<32x256xf32> -> vector<32x256xf32>
    %22 = vector.broadcast %9 : vector<32x1xf32> to vector<32x256xf32>
    %23 = arith.addf %21, %22 : vector<32x256xf32>
    %cst_32 = arith.constant dense<0.000000e+00> : vector<32x256xf32>
    %24 = tpu.matmul %8, %1, %cst_32 {dimension_numbers = #tpu.dot_dimension_numbers<[1], [0], [0], [1], [0, 0, 1, 1], [], []>} : vector<32x3xf32>, vector<3x256xf32>, vector<32x256xf32> -> vector<32x256xf32>
    %cst_33 = arith.constant dense<0.000000e+00> : vector<32x256xf32>
    %25 = tpu.matmul %10, %0, %cst_33 {dimension_numbers = #tpu.dot_dimension_numbers<[1], [0], [0], [1], [0, 0, 1, 1], [], []>} : vector<32x3xf32>, vector<3x256xf32>, vector<32x256xf32> -> vector<32x256xf32>
    %cst_34 = arith.constant dense<0.000000e+00> : vector<32x256xf32>
    %26 = tpu.matmul %11, %1, %cst_34 {dimension_numbers = #tpu.dot_dimension_numbers<[1], [0], [0], [1], [0, 0, 1, 1], [], []>} : vector<32x3xf32>, vector<3x256xf32>, vector<32x256xf32> -> vector<32x256xf32>
    %27 = arith.addf %25, %26 : vector<32x256xf32>
    %28 = vector.broadcast %12 : vector<32x1xf32> to vector<32x256xf32>
    %29 = arith.addf %27, %28 : vector<32x256xf32>
    %cst_35 = arith.constant dense<0.000000e+00> : vector<32x256xf32>
    %30 = tpu.matmul %10, %1, %cst_35 {dimension_numbers = #tpu.dot_dimension_numbers<[1], [0], [0], [1], [0, 0, 1, 1], [], []>} : vector<32x3xf32>, vector<3x256xf32>, vector<32x256xf32> -> vector<32x256xf32>
    %cst_36 = arith.constant 0.000000e+00 : f32
    %31 = vector.broadcast %cst_36 : f32 to vector<3x256xf32>
    %cst_37 = arith.constant 1.000000e+00 : f32
    %32 = vector.broadcast %cst_37 : f32 to vector<1x256xf32>
    %c0_i32 = arith.constant 0 : i32
    %33 = arith.index_cast %c0_i32 : i32 to index
    %34 = memref.load %arg1[%33] : memref<8xf32, #tpu.memory_space<smem>>
    %35 = arith.index_cast %c0_i32 : i32 to index
    %36 = memref.load %arg2[%35] : memref<8xf32, #tpu.memory_space<smem>>
    %37 = vector.broadcast %34 : f32 to vector<32x256xf32>
    %38 = arith.mulf %37, %24 : vector<32x256xf32>
    %39 = arith.addf %23, %38 : vector<32x256xf32>
    %cst_38 = arith.constant 0.000000e+00 : f32
    %40 = vector.broadcast %cst_38 : f32 to vector<32x256xf32>
    %41 = arith.maximumf %39, %40 : vector<32x256xf32>
    %42 = arith.truncf %41 : vector<32x256xf32> to vector<32x256xbf16>
    %cst_39 = arith.constant dense<0.000000e+00> : vector<32x256xf32>
    %43 = tpu.matmul %13, %42, %cst_39 {dimension_numbers = #tpu.dot_dimension_numbers<[1], [0], [0], [1], [0, 0, 1, 1], [], []>} : vector<32x32xbf16>, vector<32x256xbf16>, vector<32x256xf32> -> vector<32x256xf32>
    %44 = vector.broadcast %14 : vector<32x1xf32> to vector<32x256xf32>
    %45 = arith.addf %43, %44 : vector<32x256xf32>
    %cst_40 = arith.constant 0.000000e+00 : f32
    %46 = vector.broadcast %cst_40 : f32 to vector<32x256xf32>
    %47 = arith.maximumf %45, %46 : vector<32x256xf32>
    %48 = arith.truncf %47 : vector<32x256xf32> to vector<32x256xbf16>
    %cst_41 = arith.constant dense<0.000000e+00> : vector<33x256xf32>
    %49 = tpu.matmul %15, %48, %cst_41 {dimension_numbers = #tpu.dot_dimension_numbers<[1], [0], [0], [1], [0, 0, 1, 1], [], []>} : vector<33x32xbf16>, vector<32x256xbf16>, vector<33x256xf32> -> vector<33x256xf32>
    %50 = vector.broadcast %16 : vector<33x1xf32> to vector<33x256xf32>
    %51 = arith.addf %49, %50 : vector<33x256xf32>
    %52 = vector.extract_strided_slice %51 {offsets = [0, 0], sizes = [32, 256], strides = [1, 1]} : vector<33x256xf32> to vector<32x256xf32>
    %53 = vector.extract_strided_slice %51 {offsets = [32, 0], sizes = [1, 256], strides = [1, 1]} : vector<33x256xf32> to vector<1x256xf32>
    %cst_42 = arith.constant 0.000000e+00 : f32
    %54 = vector.broadcast %cst_42 : f32 to vector<1x256xf32>
    %55 = arith.subf %54, %53 : vector<1x256xf32>
    %56 = vector.broadcast %7 : f32 to vector<1x256xf32>
    %57 = arith.mulf %55, %56 : vector<1x256xf32>
    %58 = math.absf %57 : vector<1x256xf32>
    %cst_43 = arith.constant 0.000000e+00 : f32
    %59 = vector.broadcast %cst_43 : f32 to vector<1x256xf32>
    %60 = arith.subf %59, %58 : vector<1x256xf32>
    %61 = math.exp %60 : vector<1x256xf32>
    %cst_44 = arith.constant 5.000000e-01 : f32
    %62 = vector.broadcast %cst_44 : f32 to vector<1x256xf32>
    %63 = arith.mulf %62, %61 : vector<1x256xf32>
    %cst_45 = arith.constant 0.000000e+00 : f32
    %64 = vector.broadcast %cst_45 : f32 to vector<1x256xf32>
    %65 = arith.cmpf ole, %57, %64 : vector<1x256xf32>
    %cst_46 = arith.constant 1.000000e+00 : f32
    %66 = vector.broadcast %cst_46 : f32 to vector<1x256xf32>
    %67 = arith.subf %66, %63 : vector<1x256xf32>
    %68 = arith.select %65, %63, %67 : vector<1x256xi1>, vector<1x256xf32>
    %69 = vector.broadcast %7 : f32 to vector<1x256xf32>
    %70 = arith.mulf %69, %68 : vector<1x256xf32>
    %cst_47 = arith.constant 0.000000e+00 : f32
    %71 = vector.broadcast %cst_47 : f32 to vector<1x256xf32>
    %72 = arith.maximumf %70, %71 : vector<1x256xf32>
    %73 = vector.broadcast %36 : f32 to vector<1x256xf32>
    %74 = arith.mulf %73, %5 : vector<1x256xf32>
    %cst_48 = arith.constant 0.000000e+00 : f32
    %75 = vector.broadcast %cst_48 : f32 to vector<1x256xf32>
    %76 = arith.subf %75, %72 : vector<1x256xf32>
    %77 = arith.mulf %76, %74 : vector<1x256xf32>
    %78 = math.exp %77 : vector<1x256xf32>
    %cst_49 = arith.constant 1.000000e+00 : f32
    %79 = vector.broadcast %cst_49 : f32 to vector<1x256xf32>
    %80 = arith.subf %79, %78 : vector<1x256xf32>
    %81 = arith.mulf %80, %32 : vector<1x256xf32>
    %cst_50 = arith.constant 1.000000e+00 : f32
    %82 = vector.broadcast %cst_50 : f32 to vector<1x256xf32>
    %83 = arith.subf %82, %80 : vector<1x256xf32>
    %cst_51 = arith.constant 1.000000e-10 : f32
    %84 = vector.broadcast %cst_51 : f32 to vector<1x256xf32>
    %85 = arith.addf %83, %84 : vector<1x256xf32>
    %86 = arith.mulf %32, %85 : vector<1x256xf32>
    %87 = vector.broadcast %34 : f32 to vector<32x256xf32>
    %88 = arith.mulf %87, %30 : vector<32x256xf32>
    %89 = arith.addf %29, %88 : vector<32x256xf32>
    %90 = arith.addf %89, %52 : vector<32x256xf32>
    %cst_52 = arith.constant 0.000000e+00 : f32
    %91 = vector.broadcast %cst_52 : f32 to vector<32x256xf32>
    %92 = arith.maximumf %90, %91 : vector<32x256xf32>
    %93 = arith.truncf %92 : vector<32x256xf32> to vector<32x256xbf16>
    %cst_53 = arith.constant dense<0.000000e+00> : vector<32x256xf32>
    %94 = tpu.matmul %17, %93, %cst_53 {dimension_numbers = #tpu.dot_dimension_numbers<[1], [0], [0], [1], [0, 0, 1, 1], [], []>} : vector<32x32xbf16>, vector<32x256xbf16>, vector<32x256xf32> -> vector<32x256xf32>
    %95 = vector.broadcast %18 : vector<32x1xf32> to vector<32x256xf32>
    %96 = arith.addf %94, %95 : vector<32x256xf32>
    %cst_54 = arith.constant 0.000000e+00 : f32
    %97 = vector.broadcast %cst_54 : f32 to vector<32x256xf32>
    %98 = arith.maximumf %96, %97 : vector<32x256xf32>
    %99 = arith.truncf %98 : vector<32x256xf32> to vector<32x256xbf16>
    %cst_55 = arith.constant dense<0.000000e+00> : vector<3x256xf32>
    %100 = tpu.matmul %19, %99, %cst_55 {dimension_numbers = #tpu.dot_dimension_numbers<[1], [0], [0], [1], [0, 0, 1, 1], [], []>} : vector<3x32xbf16>, vector<32x256xbf16>, vector<3x256xf32> -> vector<3x256xf32>
    %101 = vector.broadcast %20 : vector<3x1xf32> to vector<3x256xf32>
    %102 = arith.addf %100, %101 : vector<3x256xf32>
    %103 = arith.negf %102 : vector<3x256xf32>
    %104 = math.exp %103 : vector<3x256xf32>
    %cst_56 = arith.constant 1.000000e+00 : f32
    %105 = vector.broadcast %cst_56 : f32 to vector<3x256xf32>
    %106 = arith.addf %105, %104 : vector<3x256xf32>
    %107 = arith.divf %105, %106 : vector<3x256xf32>
    %108 = vector.broadcast %81 : vector<1x256xf32> to vector<3x256xf32>
    %109 = arith.mulf %108, %107 : vector<3x256xf32>
    %110 = arith.addf %31, %109 : vector<3x256xf32>
    %c1_i32 = arith.constant 1 : i32
    %111 = arith.index_cast %c1_i32 : i32 to index
    %112 = memref.load %arg1[%111] : memref<8xf32, #tpu.memory_space<smem>>
    %113 = arith.index_cast %c1_i32 : i32 to index
    %114 = memref.load %arg2[%113] : memref<8xf32, #tpu.memory_space<smem>>
    %115 = vector.broadcast %112 : f32 to vector<32x256xf32>
    %116 = arith.mulf %115, %24 : vector<32x256xf32>
    %117 = arith.addf %23, %116 : vector<32x256xf32>
    %cst_57 = arith.constant 0.000000e+00 : f32
    %118 = vector.broadcast %cst_57 : f32 to vector<32x256xf32>
    %119 = arith.maximumf %117, %118 : vector<32x256xf32>
    %120 = arith.truncf %119 : vector<32x256xf32> to vector<32x256xbf16>
    %cst_58 = arith.constant dense<0.000000e+00> : vector<32x256xf32>
    %121 = tpu.matmul %13, %120, %cst_58 {dimension_numbers = #tpu.dot_dimension_numbers<[1], [0], [0], [1], [0, 0, 1, 1], [], []>} : vector<32x32xbf16>, vector<32x256xbf16>, vector<32x256xf32> -> vector<32x256xf32>
    %122 = vector.broadcast %14 : vector<32x1xf32> to vector<32x256xf32>
    %123 = arith.addf %121, %122 : vector<32x256xf32>
    %cst_59 = arith.constant 0.000000e+00 : f32
    %124 = vector.broadcast %cst_59 : f32 to vector<32x256xf32>
    %125 = arith.maximumf %123, %124 : vector<32x256xf32>
    %126 = arith.truncf %125 : vector<32x256xf32> to vector<32x256xbf16>
    %cst_60 = arith.constant dense<0.000000e+00> : vector<33x256xf32>
    %127 = tpu.matmul %15, %126, %cst_60 {dimension_numbers = #tpu.dot_dimension_numbers<[1], [0], [0], [1], [0, 0, 1, 1], [], []>} : vector<33x32xbf16>, vector<32x256xbf16>, vector<33x256xf32> -> vector<33x256xf32>
    %128 = vector.broadcast %16 : vector<33x1xf32> to vector<33x256xf32>
    %129 = arith.addf %127, %128 : vector<33x256xf32>
    %130 = vector.extract_strided_slice %129 {offsets = [0, 0], sizes = [32, 256], strides = [1, 1]} : vector<33x256xf32> to vector<32x256xf32>
    %131 = vector.extract_strided_slice %129 {offsets = [32, 0], sizes = [1, 256], strides = [1, 1]} : vector<33x256xf32> to vector<1x256xf32>
    %cst_61 = arith.constant 0.000000e+00 : f32
    %132 = vector.broadcast %cst_61 : f32 to vector<1x256xf32>
    %133 = arith.subf %132, %131 : vector<1x256xf32>
    %134 = vector.broadcast %7 : f32 to vector<1x256xf32>
    %135 = arith.mulf %133, %134 : vector<1x256xf32>
    %136 = math.absf %135 : vector<1x256xf32>
    %cst_62 = arith.constant 0.000000e+00 : f32
    %137 = vector.broadcast %cst_62 : f32 to vector<1x256xf32>
    %138 = arith.subf %137, %136 : vector<1x256xf32>
    %139 = math.exp %138 : vector<1x256xf32>
    %cst_63 = arith.constant 5.000000e-01 : f32
    %140 = vector.broadcast %cst_63 : f32 to vector<1x256xf32>
    %141 = arith.mulf %140, %139 : vector<1x256xf32>
    %cst_64 = arith.constant 0.000000e+00 : f32
    %142 = vector.broadcast %cst_64 : f32 to vector<1x256xf32>
    %143 = arith.cmpf ole, %135, %142 : vector<1x256xf32>
    %cst_65 = arith.constant 1.000000e+00 : f32
    %144 = vector.broadcast %cst_65 : f32 to vector<1x256xf32>
    %145 = arith.subf %144, %141 : vector<1x256xf32>
    %146 = arith.select %143, %141, %145 : vector<1x256xi1>, vector<1x256xf32>
    %147 = vector.broadcast %7 : f32 to vector<1x256xf32>
    %148 = arith.mulf %147, %146 : vector<1x256xf32>
    %cst_66 = arith.constant 0.000000e+00 : f32
    %149 = vector.broadcast %cst_66 : f32 to vector<1x256xf32>
    %150 = arith.maximumf %148, %149 : vector<1x256xf32>
    %151 = vector.broadcast %114 : f32 to vector<1x256xf32>
    %152 = arith.mulf %151, %5 : vector<1x256xf32>
    %cst_67 = arith.constant 0.000000e+00 : f32
    %153 = vector.broadcast %cst_67 : f32 to vector<1x256xf32>
    %154 = arith.subf %153, %150 : vector<1x256xf32>
    %155 = arith.mulf %154, %152 : vector<1x256xf32>
    %156 = math.exp %155 : vector<1x256xf32>
    %cst_68 = arith.constant 1.000000e+00 : f32
    %157 = vector.broadcast %cst_68 : f32 to vector<1x256xf32>
    %158 = arith.subf %157, %156 : vector<1x256xf32>
    %159 = arith.mulf %158, %86 : vector<1x256xf32>
    %cst_69 = arith.constant 1.000000e+00 : f32
    %160 = vector.broadcast %cst_69 : f32 to vector<1x256xf32>
    %161 = arith.subf %160, %158 : vector<1x256xf32>
    %cst_70 = arith.constant 1.000000e-10 : f32
    %162 = vector.broadcast %cst_70 : f32 to vector<1x256xf32>
    %163 = arith.addf %161, %162 : vector<1x256xf32>
    %164 = arith.mulf %86, %163 : vector<1x256xf32>
    %165 = vector.broadcast %112 : f32 to vector<32x256xf32>
    %166 = arith.mulf %165, %30 : vector<32x256xf32>
    %167 = arith.addf %29, %166 : vector<32x256xf32>
    %168 = arith.addf %167, %130 : vector<32x256xf32>
    %cst_71 = arith.constant 0.000000e+00 : f32
    %169 = vector.broadcast %cst_71 : f32 to vector<32x256xf32>
    %170 = arith.maximumf %168, %169 : vector<32x256xf32>
    %171 = arith.truncf %170 : vector<32x256xf32> to vector<32x256xbf16>
    %cst_72 = arith.constant dense<0.000000e+00> : vector<32x256xf32>
    %172 = tpu.matmul %17, %171, %cst_72 {dimension_numbers = #tpu.dot_dimension_numbers<[1], [0], [0], [1], [0, 0, 1, 1], [], []>} : vector<32x32xbf16>, vector<32x256xbf16>, vector<32x256xf32> -> vector<32x256xf32>
    %173 = vector.broadcast %18 : vector<32x1xf32> to vector<32x256xf32>
    %174 = arith.addf %172, %173 : vector<32x256xf32>
    %cst_73 = arith.constant 0.000000e+00 : f32
    %175 = vector.broadcast %cst_73 : f32 to vector<32x256xf32>
    %176 = arith.maximumf %174, %175 : vector<32x256xf32>
    %177 = arith.truncf %176 : vector<32x256xf32> to vector<32x256xbf16>
    %cst_74 = arith.constant dense<0.000000e+00> : vector<3x256xf32>
    %178 = tpu.matmul %19, %177, %cst_74 {dimension_numbers = #tpu.dot_dimension_numbers<[1], [0], [0], [1], [0, 0, 1, 1], [], []>} : vector<3x32xbf16>, vector<32x256xbf16>, vector<3x256xf32> -> vector<3x256xf32>
    %179 = vector.broadcast %20 : vector<3x1xf32> to vector<3x256xf32>
    %180 = arith.addf %178, %179 : vector<3x256xf32>
    %181 = arith.negf %180 : vector<3x256xf32>
    %182 = math.exp %181 : vector<3x256xf32>
    %cst_75 = arith.constant 1.000000e+00 : f32
    %183 = vector.broadcast %cst_75 : f32 to vector<3x256xf32>
    %184 = arith.addf %183, %182 : vector<3x256xf32>
    %185 = arith.divf %183, %184 : vector<3x256xf32>
    %186 = vector.broadcast %159 : vector<1x256xf32> to vector<3x256xf32>
    %187 = arith.mulf %186, %185 : vector<3x256xf32>
    %188 = arith.addf %110, %187 : vector<3x256xf32>
    %c2_i32 = arith.constant 2 : i32
    %189 = arith.index_cast %c2_i32 : i32 to index
    %190 = memref.load %arg1[%189] : memref<8xf32, #tpu.memory_space<smem>>
    %191 = arith.index_cast %c2_i32 : i32 to index
    %192 = memref.load %arg2[%191] : memref<8xf32, #tpu.memory_space<smem>>
    %193 = vector.broadcast %190 : f32 to vector<32x256xf32>
    %194 = arith.mulf %193, %24 : vector<32x256xf32>
    %195 = arith.addf %23, %194 : vector<32x256xf32>
    %cst_76 = arith.constant 0.000000e+00 : f32
    %196 = vector.broadcast %cst_76 : f32 to vector<32x256xf32>
    %197 = arith.maximumf %195, %196 : vector<32x256xf32>
    %198 = arith.truncf %197 : vector<32x256xf32> to vector<32x256xbf16>
    %cst_77 = arith.constant dense<0.000000e+00> : vector<32x256xf32>
    %199 = tpu.matmul %13, %198, %cst_77 {dimension_numbers = #tpu.dot_dimension_numbers<[1], [0], [0], [1], [0, 0, 1, 1], [], []>} : vector<32x32xbf16>, vector<32x256xbf16>, vector<32x256xf32> -> vector<32x256xf32>
    %200 = vector.broadcast %14 : vector<32x1xf32> to vector<32x256xf32>
    %201 = arith.addf %199, %200 : vector<32x256xf32>
    %cst_78 = arith.constant 0.000000e+00 : f32
    %202 = vector.broadcast %cst_78 : f32 to vector<32x256xf32>
    %203 = arith.maximumf %201, %202 : vector<32x256xf32>
    %204 = arith.truncf %203 : vector<32x256xf32> to vector<32x256xbf16>
    %cst_79 = arith.constant dense<0.000000e+00> : vector<33x256xf32>
    %205 = tpu.matmul %15, %204, %cst_79 {dimension_numbers = #tpu.dot_dimension_numbers<[1], [0], [0], [1], [0, 0, 1, 1], [], []>} : vector<33x32xbf16>, vector<32x256xbf16>, vector<33x256xf32> -> vector<33x256xf32>
    %206 = vector.broadcast %16 : vector<33x1xf32> to vector<33x256xf32>
    %207 = arith.addf %205, %206 : vector<33x256xf32>
    %208 = vector.extract_strided_slice %207 {offsets = [0, 0], sizes = [32, 256], strides = [1, 1]} : vector<33x256xf32> to vector<32x256xf32>
    %209 = vector.extract_strided_slice %207 {offsets = [32, 0], sizes = [1, 256], strides = [1, 1]} : vector<33x256xf32> to vector<1x256xf32>
    %cst_80 = arith.constant 0.000000e+00 : f32
    %210 = vector.broadcast %cst_80 : f32 to vector<1x256xf32>
    %211 = arith.subf %210, %209 : vector<1x256xf32>
    %212 = vector.broadcast %7 : f32 to vector<1x256xf32>
    %213 = arith.mulf %211, %212 : vector<1x256xf32>
    %214 = math.absf %213 : vector<1x256xf32>
    %cst_81 = arith.constant 0.000000e+00 : f32
    %215 = vector.broadcast %cst_81 : f32 to vector<1x256xf32>
    %216 = arith.subf %215, %214 : vector<1x256xf32>
    %217 = math.exp %216 : vector<1x256xf32>
    %cst_82 = arith.constant 5.000000e-01 : f32
    %218 = vector.broadcast %cst_82 : f32 to vector<1x256xf32>
    %219 = arith.mulf %218, %217 : vector<1x256xf32>
    %cst_83 = arith.constant 0.000000e+00 : f32
    %220 = vector.broadcast %cst_83 : f32 to vector<1x256xf32>
    %221 = arith.cmpf ole, %213, %220 : vector<1x256xf32>
    %cst_84 = arith.constant 1.000000e+00 : f32
    %222 = vector.broadcast %cst_84 : f32 to vector<1x256xf32>
    %223 = arith.subf %222, %219 : vector<1x256xf32>
    %224 = arith.select %221, %219, %223 : vector<1x256xi1>, vector<1x256xf32>
    %225 = vector.broadcast %7 : f32 to vector<1x256xf32>
    %226 = arith.mulf %225, %224 : vector<1x256xf32>
    %cst_85 = arith.constant 0.000000e+00 : f32
    %227 = vector.broadcast %cst_85 : f32 to vector<1x256xf32>
    %228 = arith.maximumf %226, %227 : vector<1x256xf32>
    %229 = vector.broadcast %192 : f32 to vector<1x256xf32>
    %230 = arith.mulf %229, %5 : vector<1x256xf32>
    %cst_86 = arith.constant 0.000000e+00 : f32
    %231 = vector.broadcast %cst_86 : f32 to vector<1x256xf32>
    %232 = arith.subf %231, %228 : vector<1x256xf32>
    %233 = arith.mulf %232, %230 : vector<1x256xf32>
    %234 = math.exp %233 : vector<1x256xf32>
    %cst_87 = arith.constant 1.000000e+00 : f32
    %235 = vector.broadcast %cst_87 : f32 to vector<1x256xf32>
    %236 = arith.subf %235, %234 : vector<1x256xf32>
    %237 = arith.mulf %236, %164 : vector<1x256xf32>
    %cst_88 = arith.constant 1.000000e+00 : f32
    %238 = vector.broadcast %cst_88 : f32 to vector<1x256xf32>
    %239 = arith.subf %238, %236 : vector<1x256xf32>
    %cst_89 = arith.constant 1.000000e-10 : f32
    %240 = vector.broadcast %cst_89 : f32 to vector<1x256xf32>
    %241 = arith.addf %239, %240 : vector<1x256xf32>
    %242 = arith.mulf %164, %241 : vector<1x256xf32>
    %243 = vector.broadcast %190 : f32 to vector<32x256xf32>
    %244 = arith.mulf %243, %30 : vector<32x256xf32>
    %245 = arith.addf %29, %244 : vector<32x256xf32>
    %246 = arith.addf %245, %208 : vector<32x256xf32>
    %cst_90 = arith.constant 0.000000e+00 : f32
    %247 = vector.broadcast %cst_90 : f32 to vector<32x256xf32>
    %248 = arith.maximumf %246, %247 : vector<32x256xf32>
    %249 = arith.truncf %248 : vector<32x256xf32> to vector<32x256xbf16>
    %cst_91 = arith.constant dense<0.000000e+00> : vector<32x256xf32>
    %250 = tpu.matmul %17, %249, %cst_91 {dimension_numbers = #tpu.dot_dimension_numbers<[1], [0], [0], [1], [0, 0, 1, 1], [], []>} : vector<32x32xbf16>, vector<32x256xbf16>, vector<32x256xf32> -> vector<32x256xf32>
    %251 = vector.broadcast %18 : vector<32x1xf32> to vector<32x256xf32>
    %252 = arith.addf %250, %251 : vector<32x256xf32>
    %cst_92 = arith.constant 0.000000e+00 : f32
    %253 = vector.broadcast %cst_92 : f32 to vector<32x256xf32>
    %254 = arith.maximumf %252, %253 : vector<32x256xf32>
    %255 = arith.truncf %254 : vector<32x256xf32> to vector<32x256xbf16>
    %cst_93 = arith.constant dense<0.000000e+00> : vector<3x256xf32>
    %256 = tpu.matmul %19, %255, %cst_93 {dimension_numbers = #tpu.dot_dimension_numbers<[1], [0], [0], [1], [0, 0, 1, 1], [], []>} : vector<3x32xbf16>, vector<32x256xbf16>, vector<3x256xf32> -> vector<3x256xf32>
    %257 = vector.broadcast %20 : vector<3x1xf32> to vector<3x256xf32>
    %258 = arith.addf %256, %257 : vector<3x256xf32>
    %259 = arith.negf %258 : vector<3x256xf32>
    %260 = math.exp %259 : vector<3x256xf32>
    %cst_94 = arith.constant 1.000000e+00 : f32
    %261 = vector.broadcast %cst_94 : f32 to vector<3x256xf32>
    %262 = arith.addf %261, %260 : vector<3x256xf32>
    %263 = arith.divf %261, %262 : vector<3x256xf32>
    %264 = vector.broadcast %237 : vector<1x256xf32> to vector<3x256xf32>
    %265 = arith.mulf %264, %263 : vector<3x256xf32>
    %266 = arith.addf %188, %265 : vector<3x256xf32>
    %c3_i32 = arith.constant 3 : i32
    %267 = arith.index_cast %c3_i32 : i32 to index
    %268 = memref.load %arg1[%267] : memref<8xf32, #tpu.memory_space<smem>>
    %269 = arith.index_cast %c3_i32 : i32 to index
    %270 = memref.load %arg2[%269] : memref<8xf32, #tpu.memory_space<smem>>
    %271 = vector.broadcast %268 : f32 to vector<32x256xf32>
    %272 = arith.mulf %271, %24 : vector<32x256xf32>
    %273 = arith.addf %23, %272 : vector<32x256xf32>
    %cst_95 = arith.constant 0.000000e+00 : f32
    %274 = vector.broadcast %cst_95 : f32 to vector<32x256xf32>
    %275 = arith.maximumf %273, %274 : vector<32x256xf32>
    %276 = arith.truncf %275 : vector<32x256xf32> to vector<32x256xbf16>
    %cst_96 = arith.constant dense<0.000000e+00> : vector<32x256xf32>
    %277 = tpu.matmul %13, %276, %cst_96 {dimension_numbers = #tpu.dot_dimension_numbers<[1], [0], [0], [1], [0, 0, 1, 1], [], []>} : vector<32x32xbf16>, vector<32x256xbf16>, vector<32x256xf32> -> vector<32x256xf32>
    %278 = vector.broadcast %14 : vector<32x1xf32> to vector<32x256xf32>
    %279 = arith.addf %277, %278 : vector<32x256xf32>
    %cst_97 = arith.constant 0.000000e+00 : f32
    %280 = vector.broadcast %cst_97 : f32 to vector<32x256xf32>
    %281 = arith.maximumf %279, %280 : vector<32x256xf32>
    %282 = arith.truncf %281 : vector<32x256xf32> to vector<32x256xbf16>
    %cst_98 = arith.constant dense<0.000000e+00> : vector<33x256xf32>
    %283 = tpu.matmul %15, %282, %cst_98 {dimension_numbers = #tpu.dot_dimension_numbers<[1], [0], [0], [1], [0, 0, 1, 1], [], []>} : vector<33x32xbf16>, vector<32x256xbf16>, vector<33x256xf32> -> vector<33x256xf32>
    %284 = vector.broadcast %16 : vector<33x1xf32> to vector<33x256xf32>
    %285 = arith.addf %283, %284 : vector<33x256xf32>
    %286 = vector.extract_strided_slice %285 {offsets = [0, 0], sizes = [32, 256], strides = [1, 1]} : vector<33x256xf32> to vector<32x256xf32>
    %287 = vector.extract_strided_slice %285 {offsets = [32, 0], sizes = [1, 256], strides = [1, 1]} : vector<33x256xf32> to vector<1x256xf32>
    %cst_99 = arith.constant 0.000000e+00 : f32
    %288 = vector.broadcast %cst_99 : f32 to vector<1x256xf32>
    %289 = arith.subf %288, %287 : vector<1x256xf32>
    %290 = vector.broadcast %7 : f32 to vector<1x256xf32>
    %291 = arith.mulf %289, %290 : vector<1x256xf32>
    %292 = math.absf %291 : vector<1x256xf32>
    %cst_100 = arith.constant 0.000000e+00 : f32
    %293 = vector.broadcast %cst_100 : f32 to vector<1x256xf32>
    %294 = arith.subf %293, %292 : vector<1x256xf32>
    %295 = math.exp %294 : vector<1x256xf32>
    %cst_101 = arith.constant 5.000000e-01 : f32
    %296 = vector.broadcast %cst_101 : f32 to vector<1x256xf32>
    %297 = arith.mulf %296, %295 : vector<1x256xf32>
    %cst_102 = arith.constant 0.000000e+00 : f32
    %298 = vector.broadcast %cst_102 : f32 to vector<1x256xf32>
    %299 = arith.cmpf ole, %291, %298 : vector<1x256xf32>
    %cst_103 = arith.constant 1.000000e+00 : f32
    %300 = vector.broadcast %cst_103 : f32 to vector<1x256xf32>
    %301 = arith.subf %300, %297 : vector<1x256xf32>
    %302 = arith.select %299, %297, %301 : vector<1x256xi1>, vector<1x256xf32>
    %303 = vector.broadcast %7 : f32 to vector<1x256xf32>
    %304 = arith.mulf %303, %302 : vector<1x256xf32>
    %cst_104 = arith.constant 0.000000e+00 : f32
    %305 = vector.broadcast %cst_104 : f32 to vector<1x256xf32>
    %306 = arith.maximumf %304, %305 : vector<1x256xf32>
    %307 = vector.broadcast %270 : f32 to vector<1x256xf32>
    %308 = arith.mulf %307, %5 : vector<1x256xf32>
    %cst_105 = arith.constant 0.000000e+00 : f32
    %309 = vector.broadcast %cst_105 : f32 to vector<1x256xf32>
    %310 = arith.subf %309, %306 : vector<1x256xf32>
    %311 = arith.mulf %310, %308 : vector<1x256xf32>
    %312 = math.exp %311 : vector<1x256xf32>
    %cst_106 = arith.constant 1.000000e+00 : f32
    %313 = vector.broadcast %cst_106 : f32 to vector<1x256xf32>
    %314 = arith.subf %313, %312 : vector<1x256xf32>
    %315 = arith.mulf %314, %242 : vector<1x256xf32>
    %cst_107 = arith.constant 1.000000e+00 : f32
    %316 = vector.broadcast %cst_107 : f32 to vector<1x256xf32>
    %317 = arith.subf %316, %314 : vector<1x256xf32>
    %cst_108 = arith.constant 1.000000e-10 : f32
    %318 = vector.broadcast %cst_108 : f32 to vector<1x256xf32>
    %319 = arith.addf %317, %318 : vector<1x256xf32>
    %320 = arith.mulf %242, %319 : vector<1x256xf32>
    %321 = vector.broadcast %268 : f32 to vector<32x256xf32>
    %322 = arith.mulf %321, %30 : vector<32x256xf32>
    %323 = arith.addf %29, %322 : vector<32x256xf32>
    %324 = arith.addf %323, %286 : vector<32x256xf32>
    %cst_109 = arith.constant 0.000000e+00 : f32
    %325 = vector.broadcast %cst_109 : f32 to vector<32x256xf32>
    %326 = arith.maximumf %324, %325 : vector<32x256xf32>
    %327 = arith.truncf %326 : vector<32x256xf32> to vector<32x256xbf16>
    %cst_110 = arith.constant dense<0.000000e+00> : vector<32x256xf32>
    %328 = tpu.matmul %17, %327, %cst_110 {dimension_numbers = #tpu.dot_dimension_numbers<[1], [0], [0], [1], [0, 0, 1, 1], [], []>} : vector<32x32xbf16>, vector<32x256xbf16>, vector<32x256xf32> -> vector<32x256xf32>
    %329 = vector.broadcast %18 : vector<32x1xf32> to vector<32x256xf32>
    %330 = arith.addf %328, %329 : vector<32x256xf32>
    %cst_111 = arith.constant 0.000000e+00 : f32
    %331 = vector.broadcast %cst_111 : f32 to vector<32x256xf32>
    %332 = arith.maximumf %330, %331 : vector<32x256xf32>
    %333 = arith.truncf %332 : vector<32x256xf32> to vector<32x256xbf16>
    %cst_112 = arith.constant dense<0.000000e+00> : vector<3x256xf32>
    %334 = tpu.matmul %19, %333, %cst_112 {dimension_numbers = #tpu.dot_dimension_numbers<[1], [0], [0], [1], [0, 0, 1, 1], [], []>} : vector<3x32xbf16>, vector<32x256xbf16>, vector<3x256xf32> -> vector<3x256xf32>
    %335 = vector.broadcast %20 : vector<3x1xf32> to vector<3x256xf32>
    %336 = arith.addf %334, %335 : vector<3x256xf32>
    %337 = arith.negf %336 : vector<3x256xf32>
    %338 = math.exp %337 : vector<3x256xf32>
    %cst_113 = arith.constant 1.000000e+00 : f32
    %339 = vector.broadcast %cst_113 : f32 to vector<3x256xf32>
    %340 = arith.addf %339, %338 : vector<3x256xf32>
    %341 = arith.divf %339, %340 : vector<3x256xf32>
    %342 = vector.broadcast %315 : vector<1x256xf32> to vector<3x256xf32>
    %343 = arith.mulf %342, %341 : vector<3x256xf32>
    %344 = arith.addf %266, %343 : vector<3x256xf32>
    %c4_i32 = arith.constant 4 : i32
    %345 = arith.index_cast %c4_i32 : i32 to index
    %346 = memref.load %arg1[%345] : memref<8xf32, #tpu.memory_space<smem>>
    %347 = arith.index_cast %c4_i32 : i32 to index
    %348 = memref.load %arg2[%347] : memref<8xf32, #tpu.memory_space<smem>>
    %349 = vector.broadcast %346 : f32 to vector<32x256xf32>
    %350 = arith.mulf %349, %24 : vector<32x256xf32>
    %351 = arith.addf %23, %350 : vector<32x256xf32>
    %cst_114 = arith.constant 0.000000e+00 : f32
    %352 = vector.broadcast %cst_114 : f32 to vector<32x256xf32>
    %353 = arith.maximumf %351, %352 : vector<32x256xf32>
    %354 = arith.truncf %353 : vector<32x256xf32> to vector<32x256xbf16>
    %cst_115 = arith.constant dense<0.000000e+00> : vector<32x256xf32>
    %355 = tpu.matmul %13, %354, %cst_115 {dimension_numbers = #tpu.dot_dimension_numbers<[1], [0], [0], [1], [0, 0, 1, 1], [], []>} : vector<32x32xbf16>, vector<32x256xbf16>, vector<32x256xf32> -> vector<32x256xf32>
    %356 = vector.broadcast %14 : vector<32x1xf32> to vector<32x256xf32>
    %357 = arith.addf %355, %356 : vector<32x256xf32>
    %cst_116 = arith.constant 0.000000e+00 : f32
    %358 = vector.broadcast %cst_116 : f32 to vector<32x256xf32>
    %359 = arith.maximumf %357, %358 : vector<32x256xf32>
    %360 = arith.truncf %359 : vector<32x256xf32> to vector<32x256xbf16>
    %cst_117 = arith.constant dense<0.000000e+00> : vector<33x256xf32>
    %361 = tpu.matmul %15, %360, %cst_117 {dimension_numbers = #tpu.dot_dimension_numbers<[1], [0], [0], [1], [0, 0, 1, 1], [], []>} : vector<33x32xbf16>, vector<32x256xbf16>, vector<33x256xf32> -> vector<33x256xf32>
    %362 = vector.broadcast %16 : vector<33x1xf32> to vector<33x256xf32>
    %363 = arith.addf %361, %362 : vector<33x256xf32>
    %364 = vector.extract_strided_slice %363 {offsets = [0, 0], sizes = [32, 256], strides = [1, 1]} : vector<33x256xf32> to vector<32x256xf32>
    %365 = vector.extract_strided_slice %363 {offsets = [32, 0], sizes = [1, 256], strides = [1, 1]} : vector<33x256xf32> to vector<1x256xf32>
    %cst_118 = arith.constant 0.000000e+00 : f32
    %366 = vector.broadcast %cst_118 : f32 to vector<1x256xf32>
    %367 = arith.subf %366, %365 : vector<1x256xf32>
    %368 = vector.broadcast %7 : f32 to vector<1x256xf32>
    %369 = arith.mulf %367, %368 : vector<1x256xf32>
    %370 = math.absf %369 : vector<1x256xf32>
    %cst_119 = arith.constant 0.000000e+00 : f32
    %371 = vector.broadcast %cst_119 : f32 to vector<1x256xf32>
    %372 = arith.subf %371, %370 : vector<1x256xf32>
    %373 = math.exp %372 : vector<1x256xf32>
    %cst_120 = arith.constant 5.000000e-01 : f32
    %374 = vector.broadcast %cst_120 : f32 to vector<1x256xf32>
    %375 = arith.mulf %374, %373 : vector<1x256xf32>
    %cst_121 = arith.constant 0.000000e+00 : f32
    %376 = vector.broadcast %cst_121 : f32 to vector<1x256xf32>
    %377 = arith.cmpf ole, %369, %376 : vector<1x256xf32>
    %cst_122 = arith.constant 1.000000e+00 : f32
    %378 = vector.broadcast %cst_122 : f32 to vector<1x256xf32>
    %379 = arith.subf %378, %375 : vector<1x256xf32>
    %380 = arith.select %377, %375, %379 : vector<1x256xi1>, vector<1x256xf32>
    %381 = vector.broadcast %7 : f32 to vector<1x256xf32>
    %382 = arith.mulf %381, %380 : vector<1x256xf32>
    %cst_123 = arith.constant 0.000000e+00 : f32
    %383 = vector.broadcast %cst_123 : f32 to vector<1x256xf32>
    %384 = arith.maximumf %382, %383 : vector<1x256xf32>
    %385 = vector.broadcast %348 : f32 to vector<1x256xf32>
    %386 = arith.mulf %385, %5 : vector<1x256xf32>
    %cst_124 = arith.constant 0.000000e+00 : f32
    %387 = vector.broadcast %cst_124 : f32 to vector<1x256xf32>
    %388 = arith.subf %387, %384 : vector<1x256xf32>
    %389 = arith.mulf %388, %386 : vector<1x256xf32>
    %390 = math.exp %389 : vector<1x256xf32>
    %cst_125 = arith.constant 1.000000e+00 : f32
    %391 = vector.broadcast %cst_125 : f32 to vector<1x256xf32>
    %392 = arith.subf %391, %390 : vector<1x256xf32>
    %393 = arith.mulf %392, %320 : vector<1x256xf32>
    %cst_126 = arith.constant 1.000000e+00 : f32
    %394 = vector.broadcast %cst_126 : f32 to vector<1x256xf32>
    %395 = arith.subf %394, %392 : vector<1x256xf32>
    %cst_127 = arith.constant 1.000000e-10 : f32
    %396 = vector.broadcast %cst_127 : f32 to vector<1x256xf32>
    %397 = arith.addf %395, %396 : vector<1x256xf32>
    %398 = arith.mulf %320, %397 : vector<1x256xf32>
    %399 = vector.broadcast %346 : f32 to vector<32x256xf32>
    %400 = arith.mulf %399, %30 : vector<32x256xf32>
    %401 = arith.addf %29, %400 : vector<32x256xf32>
    %402 = arith.addf %401, %364 : vector<32x256xf32>
    %cst_128 = arith.constant 0.000000e+00 : f32
    %403 = vector.broadcast %cst_128 : f32 to vector<32x256xf32>
    %404 = arith.maximumf %402, %403 : vector<32x256xf32>
    %405 = arith.truncf %404 : vector<32x256xf32> to vector<32x256xbf16>
    %cst_129 = arith.constant dense<0.000000e+00> : vector<32x256xf32>
    %406 = tpu.matmul %17, %405, %cst_129 {dimension_numbers = #tpu.dot_dimension_numbers<[1], [0], [0], [1], [0, 0, 1, 1], [], []>} : vector<32x32xbf16>, vector<32x256xbf16>, vector<32x256xf32> -> vector<32x256xf32>
    %407 = vector.broadcast %18 : vector<32x1xf32> to vector<32x256xf32>
    %408 = arith.addf %406, %407 : vector<32x256xf32>
    %cst_130 = arith.constant 0.000000e+00 : f32
    %409 = vector.broadcast %cst_130 : f32 to vector<32x256xf32>
    %410 = arith.maximumf %408, %409 : vector<32x256xf32>
    %411 = arith.truncf %410 : vector<32x256xf32> to vector<32x256xbf16>
    %cst_131 = arith.constant dense<0.000000e+00> : vector<3x256xf32>
    %412 = tpu.matmul %19, %411, %cst_131 {dimension_numbers = #tpu.dot_dimension_numbers<[1], [0], [0], [1], [0, 0, 1, 1], [], []>} : vector<3x32xbf16>, vector<32x256xbf16>, vector<3x256xf32> -> vector<3x256xf32>
    %413 = vector.broadcast %20 : vector<3x1xf32> to vector<3x256xf32>
    %414 = arith.addf %412, %413 : vector<3x256xf32>
    %415 = arith.negf %414 : vector<3x256xf32>
    %416 = math.exp %415 : vector<3x256xf32>
    %cst_132 = arith.constant 1.000000e+00 : f32
    %417 = vector.broadcast %cst_132 : f32 to vector<3x256xf32>
    %418 = arith.addf %417, %416 : vector<3x256xf32>
    %419 = arith.divf %417, %418 : vector<3x256xf32>
    %420 = vector.broadcast %393 : vector<1x256xf32> to vector<3x256xf32>
    %421 = arith.mulf %420, %419 : vector<3x256xf32>
    %422 = arith.addf %344, %421 : vector<3x256xf32>
    %c5_i32 = arith.constant 5 : i32
    %423 = arith.index_cast %c5_i32 : i32 to index
    %424 = memref.load %arg1[%423] : memref<8xf32, #tpu.memory_space<smem>>
    %425 = arith.index_cast %c5_i32 : i32 to index
    %426 = memref.load %arg2[%425] : memref<8xf32, #tpu.memory_space<smem>>
    %427 = vector.broadcast %424 : f32 to vector<32x256xf32>
    %428 = arith.mulf %427, %24 : vector<32x256xf32>
    %429 = arith.addf %23, %428 : vector<32x256xf32>
    %cst_133 = arith.constant 0.000000e+00 : f32
    %430 = vector.broadcast %cst_133 : f32 to vector<32x256xf32>
    %431 = arith.maximumf %429, %430 : vector<32x256xf32>
    %432 = arith.truncf %431 : vector<32x256xf32> to vector<32x256xbf16>
    %cst_134 = arith.constant dense<0.000000e+00> : vector<32x256xf32>
    %433 = tpu.matmul %13, %432, %cst_134 {dimension_numbers = #tpu.dot_dimension_numbers<[1], [0], [0], [1], [0, 0, 1, 1], [], []>} : vector<32x32xbf16>, vector<32x256xbf16>, vector<32x256xf32> -> vector<32x256xf32>
    %434 = vector.broadcast %14 : vector<32x1xf32> to vector<32x256xf32>
    %435 = arith.addf %433, %434 : vector<32x256xf32>
    %cst_135 = arith.constant 0.000000e+00 : f32
    %436 = vector.broadcast %cst_135 : f32 to vector<32x256xf32>
    %437 = arith.maximumf %435, %436 : vector<32x256xf32>
    %438 = arith.truncf %437 : vector<32x256xf32> to vector<32x256xbf16>
    %cst_136 = arith.constant dense<0.000000e+00> : vector<33x256xf32>
    %439 = tpu.matmul %15, %438, %cst_136 {dimension_numbers = #tpu.dot_dimension_numbers<[1], [0], [0], [1], [0, 0, 1, 1], [], []>} : vector<33x32xbf16>, vector<32x256xbf16>, vector<33x256xf32> -> vector<33x256xf32>
    %440 = vector.broadcast %16 : vector<33x1xf32> to vector<33x256xf32>
    %441 = arith.addf %439, %440 : vector<33x256xf32>
    %442 = vector.extract_strided_slice %441 {offsets = [0, 0], sizes = [32, 256], strides = [1, 1]} : vector<33x256xf32> to vector<32x256xf32>
    %443 = vector.extract_strided_slice %441 {offsets = [32, 0], sizes = [1, 256], strides = [1, 1]} : vector<33x256xf32> to vector<1x256xf32>
    %cst_137 = arith.constant 0.000000e+00 : f32
    %444 = vector.broadcast %cst_137 : f32 to vector<1x256xf32>
    %445 = arith.subf %444, %443 : vector<1x256xf32>
    %446 = vector.broadcast %7 : f32 to vector<1x256xf32>
    %447 = arith.mulf %445, %446 : vector<1x256xf32>
    %448 = math.absf %447 : vector<1x256xf32>
    %cst_138 = arith.constant 0.000000e+00 : f32
    %449 = vector.broadcast %cst_138 : f32 to vector<1x256xf32>
    %450 = arith.subf %449, %448 : vector<1x256xf32>
    %451 = math.exp %450 : vector<1x256xf32>
    %cst_139 = arith.constant 5.000000e-01 : f32
    %452 = vector.broadcast %cst_139 : f32 to vector<1x256xf32>
    %453 = arith.mulf %452, %451 : vector<1x256xf32>
    %cst_140 = arith.constant 0.000000e+00 : f32
    %454 = vector.broadcast %cst_140 : f32 to vector<1x256xf32>
    %455 = arith.cmpf ole, %447, %454 : vector<1x256xf32>
    %cst_141 = arith.constant 1.000000e+00 : f32
    %456 = vector.broadcast %cst_141 : f32 to vector<1x256xf32>
    %457 = arith.subf %456, %453 : vector<1x256xf32>
    %458 = arith.select %455, %453, %457 : vector<1x256xi1>, vector<1x256xf32>
    %459 = vector.broadcast %7 : f32 to vector<1x256xf32>
    %460 = arith.mulf %459, %458 : vector<1x256xf32>
    %cst_142 = arith.constant 0.000000e+00 : f32
    %461 = vector.broadcast %cst_142 : f32 to vector<1x256xf32>
    %462 = arith.maximumf %460, %461 : vector<1x256xf32>
    %463 = vector.broadcast %426 : f32 to vector<1x256xf32>
    %464 = arith.mulf %463, %5 : vector<1x256xf32>
    %cst_143 = arith.constant 0.000000e+00 : f32
    %465 = vector.broadcast %cst_143 : f32 to vector<1x256xf32>
    %466 = arith.subf %465, %462 : vector<1x256xf32>
    %467 = arith.mulf %466, %464 : vector<1x256xf32>
    %468 = math.exp %467 : vector<1x256xf32>
    %cst_144 = arith.constant 1.000000e+00 : f32
    %469 = vector.broadcast %cst_144 : f32 to vector<1x256xf32>
    %470 = arith.subf %469, %468 : vector<1x256xf32>
    %471 = arith.mulf %470, %398 : vector<1x256xf32>
    %cst_145 = arith.constant 1.000000e+00 : f32
    %472 = vector.broadcast %cst_145 : f32 to vector<1x256xf32>
    %473 = arith.subf %472, %470 : vector<1x256xf32>
    %cst_146 = arith.constant 1.000000e-10 : f32
    %474 = vector.broadcast %cst_146 : f32 to vector<1x256xf32>
    %475 = arith.addf %473, %474 : vector<1x256xf32>
    %476 = arith.mulf %398, %475 : vector<1x256xf32>
    %477 = vector.broadcast %424 : f32 to vector<32x256xf32>
    %478 = arith.mulf %477, %30 : vector<32x256xf32>
    %479 = arith.addf %29, %478 : vector<32x256xf32>
    %480 = arith.addf %479, %442 : vector<32x256xf32>
    %cst_147 = arith.constant 0.000000e+00 : f32
    %481 = vector.broadcast %cst_147 : f32 to vector<32x256xf32>
    %482 = arith.maximumf %480, %481 : vector<32x256xf32>
    %483 = arith.truncf %482 : vector<32x256xf32> to vector<32x256xbf16>
    %cst_148 = arith.constant dense<0.000000e+00> : vector<32x256xf32>
    %484 = tpu.matmul %17, %483, %cst_148 {dimension_numbers = #tpu.dot_dimension_numbers<[1], [0], [0], [1], [0, 0, 1, 1], [], []>} : vector<32x32xbf16>, vector<32x256xbf16>, vector<32x256xf32> -> vector<32x256xf32>
    %485 = vector.broadcast %18 : vector<32x1xf32> to vector<32x256xf32>
    %486 = arith.addf %484, %485 : vector<32x256xf32>
    %cst_149 = arith.constant 0.000000e+00 : f32
    %487 = vector.broadcast %cst_149 : f32 to vector<32x256xf32>
    %488 = arith.maximumf %486, %487 : vector<32x256xf32>
    %489 = arith.truncf %488 : vector<32x256xf32> to vector<32x256xbf16>
    %cst_150 = arith.constant dense<0.000000e+00> : vector<3x256xf32>
    %490 = tpu.matmul %19, %489, %cst_150 {dimension_numbers = #tpu.dot_dimension_numbers<[1], [0], [0], [1], [0, 0, 1, 1], [], []>} : vector<3x32xbf16>, vector<32x256xbf16>, vector<3x256xf32> -> vector<3x256xf32>
    %491 = vector.broadcast %20 : vector<3x1xf32> to vector<3x256xf32>
    %492 = arith.addf %490, %491 : vector<3x256xf32>
    %493 = arith.negf %492 : vector<3x256xf32>
    %494 = math.exp %493 : vector<3x256xf32>
    %cst_151 = arith.constant 1.000000e+00 : f32
    %495 = vector.broadcast %cst_151 : f32 to vector<3x256xf32>
    %496 = arith.addf %495, %494 : vector<3x256xf32>
    %497 = arith.divf %495, %496 : vector<3x256xf32>
    %498 = vector.broadcast %471 : vector<1x256xf32> to vector<3x256xf32>
    %499 = arith.mulf %498, %497 : vector<3x256xf32>
    %500 = arith.addf %422, %499 : vector<3x256xf32>
    %c6_i32 = arith.constant 6 : i32
    %501 = arith.index_cast %c6_i32 : i32 to index
    %502 = memref.load %arg1[%501] : memref<8xf32, #tpu.memory_space<smem>>
    %503 = arith.index_cast %c6_i32 : i32 to index
    %504 = memref.load %arg2[%503] : memref<8xf32, #tpu.memory_space<smem>>
    %505 = vector.broadcast %502 : f32 to vector<32x256xf32>
    %506 = arith.mulf %505, %24 : vector<32x256xf32>
    %507 = arith.addf %23, %506 : vector<32x256xf32>
    %cst_152 = arith.constant 0.000000e+00 : f32
    %508 = vector.broadcast %cst_152 : f32 to vector<32x256xf32>
    %509 = arith.maximumf %507, %508 : vector<32x256xf32>
    %510 = arith.truncf %509 : vector<32x256xf32> to vector<32x256xbf16>
    %cst_153 = arith.constant dense<0.000000e+00> : vector<32x256xf32>
    %511 = tpu.matmul %13, %510, %cst_153 {dimension_numbers = #tpu.dot_dimension_numbers<[1], [0], [0], [1], [0, 0, 1, 1], [], []>} : vector<32x32xbf16>, vector<32x256xbf16>, vector<32x256xf32> -> vector<32x256xf32>
    %512 = vector.broadcast %14 : vector<32x1xf32> to vector<32x256xf32>
    %513 = arith.addf %511, %512 : vector<32x256xf32>
    %cst_154 = arith.constant 0.000000e+00 : f32
    %514 = vector.broadcast %cst_154 : f32 to vector<32x256xf32>
    %515 = arith.maximumf %513, %514 : vector<32x256xf32>
    %516 = arith.truncf %515 : vector<32x256xf32> to vector<32x256xbf16>
    %cst_155 = arith.constant dense<0.000000e+00> : vector<33x256xf32>
    %517 = tpu.matmul %15, %516, %cst_155 {dimension_numbers = #tpu.dot_dimension_numbers<[1], [0], [0], [1], [0, 0, 1, 1], [], []>} : vector<33x32xbf16>, vector<32x256xbf16>, vector<33x256xf32> -> vector<33x256xf32>
    %518 = vector.broadcast %16 : vector<33x1xf32> to vector<33x256xf32>
    %519 = arith.addf %517, %518 : vector<33x256xf32>
    %520 = vector.extract_strided_slice %519 {offsets = [0, 0], sizes = [32, 256], strides = [1, 1]} : vector<33x256xf32> to vector<32x256xf32>
    %521 = vector.extract_strided_slice %519 {offsets = [32, 0], sizes = [1, 256], strides = [1, 1]} : vector<33x256xf32> to vector<1x256xf32>
    %cst_156 = arith.constant 0.000000e+00 : f32
    %522 = vector.broadcast %cst_156 : f32 to vector<1x256xf32>
    %523 = arith.subf %522, %521 : vector<1x256xf32>
    %524 = vector.broadcast %7 : f32 to vector<1x256xf32>
    %525 = arith.mulf %523, %524 : vector<1x256xf32>
    %526 = math.absf %525 : vector<1x256xf32>
    %cst_157 = arith.constant 0.000000e+00 : f32
    %527 = vector.broadcast %cst_157 : f32 to vector<1x256xf32>
    %528 = arith.subf %527, %526 : vector<1x256xf32>
    %529 = math.exp %528 : vector<1x256xf32>
    %cst_158 = arith.constant 5.000000e-01 : f32
    %530 = vector.broadcast %cst_158 : f32 to vector<1x256xf32>
    %531 = arith.mulf %530, %529 : vector<1x256xf32>
    %cst_159 = arith.constant 0.000000e+00 : f32
    %532 = vector.broadcast %cst_159 : f32 to vector<1x256xf32>
    %533 = arith.cmpf ole, %525, %532 : vector<1x256xf32>
    %cst_160 = arith.constant 1.000000e+00 : f32
    %534 = vector.broadcast %cst_160 : f32 to vector<1x256xf32>
    %535 = arith.subf %534, %531 : vector<1x256xf32>
    %536 = arith.select %533, %531, %535 : vector<1x256xi1>, vector<1x256xf32>
    %537 = vector.broadcast %7 : f32 to vector<1x256xf32>
    %538 = arith.mulf %537, %536 : vector<1x256xf32>
    %cst_161 = arith.constant 0.000000e+00 : f32
    %539 = vector.broadcast %cst_161 : f32 to vector<1x256xf32>
    %540 = arith.maximumf %538, %539 : vector<1x256xf32>
    %541 = vector.broadcast %504 : f32 to vector<1x256xf32>
    %542 = arith.mulf %541, %5 : vector<1x256xf32>
    %cst_162 = arith.constant 0.000000e+00 : f32
    %543 = vector.broadcast %cst_162 : f32 to vector<1x256xf32>
    %544 = arith.subf %543, %540 : vector<1x256xf32>
    %545 = arith.mulf %544, %542 : vector<1x256xf32>
    %546 = math.exp %545 : vector<1x256xf32>
    %cst_163 = arith.constant 1.000000e+00 : f32
    %547 = vector.broadcast %cst_163 : f32 to vector<1x256xf32>
    %548 = arith.subf %547, %546 : vector<1x256xf32>
    %549 = arith.mulf %548, %476 : vector<1x256xf32>
    %cst_164 = arith.constant 1.000000e+00 : f32
    %550 = vector.broadcast %cst_164 : f32 to vector<1x256xf32>
    %551 = arith.subf %550, %548 : vector<1x256xf32>
    %cst_165 = arith.constant 1.000000e-10 : f32
    %552 = vector.broadcast %cst_165 : f32 to vector<1x256xf32>
    %553 = arith.addf %551, %552 : vector<1x256xf32>
    %554 = arith.mulf %476, %553 : vector<1x256xf32>
    %555 = vector.broadcast %502 : f32 to vector<32x256xf32>
    %556 = arith.mulf %555, %30 : vector<32x256xf32>
    %557 = arith.addf %29, %556 : vector<32x256xf32>
    %558 = arith.addf %557, %520 : vector<32x256xf32>
    %cst_166 = arith.constant 0.000000e+00 : f32
    %559 = vector.broadcast %cst_166 : f32 to vector<32x256xf32>
    %560 = arith.maximumf %558, %559 : vector<32x256xf32>
    %561 = arith.truncf %560 : vector<32x256xf32> to vector<32x256xbf16>
    %cst_167 = arith.constant dense<0.000000e+00> : vector<32x256xf32>
    %562 = tpu.matmul %17, %561, %cst_167 {dimension_numbers = #tpu.dot_dimension_numbers<[1], [0], [0], [1], [0, 0, 1, 1], [], []>} : vector<32x32xbf16>, vector<32x256xbf16>, vector<32x256xf32> -> vector<32x256xf32>
    %563 = vector.broadcast %18 : vector<32x1xf32> to vector<32x256xf32>
    %564 = arith.addf %562, %563 : vector<32x256xf32>
    %cst_168 = arith.constant 0.000000e+00 : f32
    %565 = vector.broadcast %cst_168 : f32 to vector<32x256xf32>
    %566 = arith.maximumf %564, %565 : vector<32x256xf32>
    %567 = arith.truncf %566 : vector<32x256xf32> to vector<32x256xbf16>
    %cst_169 = arith.constant dense<0.000000e+00> : vector<3x256xf32>
    %568 = tpu.matmul %19, %567, %cst_169 {dimension_numbers = #tpu.dot_dimension_numbers<[1], [0], [0], [1], [0, 0, 1, 1], [], []>} : vector<3x32xbf16>, vector<32x256xbf16>, vector<3x256xf32> -> vector<3x256xf32>
    %569 = vector.broadcast %20 : vector<3x1xf32> to vector<3x256xf32>
    %570 = arith.addf %568, %569 : vector<3x256xf32>
    %571 = arith.negf %570 : vector<3x256xf32>
    %572 = math.exp %571 : vector<3x256xf32>
    %cst_170 = arith.constant 1.000000e+00 : f32
    %573 = vector.broadcast %cst_170 : f32 to vector<3x256xf32>
    %574 = arith.addf %573, %572 : vector<3x256xf32>
    %575 = arith.divf %573, %574 : vector<3x256xf32>
    %576 = vector.broadcast %549 : vector<1x256xf32> to vector<3x256xf32>
    %577 = arith.mulf %576, %575 : vector<3x256xf32>
    %578 = arith.addf %500, %577 : vector<3x256xf32>
    %c7_i32 = arith.constant 7 : i32
    %579 = arith.index_cast %c7_i32 : i32 to index
    %580 = memref.load %arg1[%579] : memref<8xf32, #tpu.memory_space<smem>>
    %581 = arith.index_cast %c7_i32 : i32 to index
    %582 = memref.load %arg2[%581] : memref<8xf32, #tpu.memory_space<smem>>
    %583 = vector.broadcast %580 : f32 to vector<32x256xf32>
    %584 = arith.mulf %583, %24 : vector<32x256xf32>
    %585 = arith.addf %23, %584 : vector<32x256xf32>
    %cst_171 = arith.constant 0.000000e+00 : f32
    %586 = vector.broadcast %cst_171 : f32 to vector<32x256xf32>
    %587 = arith.maximumf %585, %586 : vector<32x256xf32>
    %588 = arith.truncf %587 : vector<32x256xf32> to vector<32x256xbf16>
    %cst_172 = arith.constant dense<0.000000e+00> : vector<32x256xf32>
    %589 = tpu.matmul %13, %588, %cst_172 {dimension_numbers = #tpu.dot_dimension_numbers<[1], [0], [0], [1], [0, 0, 1, 1], [], []>} : vector<32x32xbf16>, vector<32x256xbf16>, vector<32x256xf32> -> vector<32x256xf32>
    %590 = vector.broadcast %14 : vector<32x1xf32> to vector<32x256xf32>
    %591 = arith.addf %589, %590 : vector<32x256xf32>
    %cst_173 = arith.constant 0.000000e+00 : f32
    %592 = vector.broadcast %cst_173 : f32 to vector<32x256xf32>
    %593 = arith.maximumf %591, %592 : vector<32x256xf32>
    %594 = arith.truncf %593 : vector<32x256xf32> to vector<32x256xbf16>
    %cst_174 = arith.constant dense<0.000000e+00> : vector<33x256xf32>
    %595 = tpu.matmul %15, %594, %cst_174 {dimension_numbers = #tpu.dot_dimension_numbers<[1], [0], [0], [1], [0, 0, 1, 1], [], []>} : vector<33x32xbf16>, vector<32x256xbf16>, vector<33x256xf32> -> vector<33x256xf32>
    %596 = vector.broadcast %16 : vector<33x1xf32> to vector<33x256xf32>
    %597 = arith.addf %595, %596 : vector<33x256xf32>
    %598 = vector.extract_strided_slice %597 {offsets = [0, 0], sizes = [32, 256], strides = [1, 1]} : vector<33x256xf32> to vector<32x256xf32>
    %599 = vector.extract_strided_slice %597 {offsets = [32, 0], sizes = [1, 256], strides = [1, 1]} : vector<33x256xf32> to vector<1x256xf32>
    %cst_175 = arith.constant 0.000000e+00 : f32
    %600 = vector.broadcast %cst_175 : f32 to vector<1x256xf32>
    %601 = arith.subf %600, %599 : vector<1x256xf32>
    %602 = vector.broadcast %7 : f32 to vector<1x256xf32>
    %603 = arith.mulf %601, %602 : vector<1x256xf32>
    %604 = math.absf %603 : vector<1x256xf32>
    %cst_176 = arith.constant 0.000000e+00 : f32
    %605 = vector.broadcast %cst_176 : f32 to vector<1x256xf32>
    %606 = arith.subf %605, %604 : vector<1x256xf32>
    %607 = math.exp %606 : vector<1x256xf32>
    %cst_177 = arith.constant 5.000000e-01 : f32
    %608 = vector.broadcast %cst_177 : f32 to vector<1x256xf32>
    %609 = arith.mulf %608, %607 : vector<1x256xf32>
    %cst_178 = arith.constant 0.000000e+00 : f32
    %610 = vector.broadcast %cst_178 : f32 to vector<1x256xf32>
    %611 = arith.cmpf ole, %603, %610 : vector<1x256xf32>
    %cst_179 = arith.constant 1.000000e+00 : f32
    %612 = vector.broadcast %cst_179 : f32 to vector<1x256xf32>
    %613 = arith.subf %612, %609 : vector<1x256xf32>
    %614 = arith.select %611, %609, %613 : vector<1x256xi1>, vector<1x256xf32>
    %615 = vector.broadcast %7 : f32 to vector<1x256xf32>
    %616 = arith.mulf %615, %614 : vector<1x256xf32>
    %cst_180 = arith.constant 0.000000e+00 : f32
    %617 = vector.broadcast %cst_180 : f32 to vector<1x256xf32>
    %618 = arith.maximumf %616, %617 : vector<1x256xf32>
    %619 = vector.broadcast %582 : f32 to vector<1x256xf32>
    %620 = arith.mulf %619, %5 : vector<1x256xf32>
    %cst_181 = arith.constant 0.000000e+00 : f32
    %621 = vector.broadcast %cst_181 : f32 to vector<1x256xf32>
    %622 = arith.subf %621, %618 : vector<1x256xf32>
    %623 = arith.mulf %622, %620 : vector<1x256xf32>
    %624 = math.exp %623 : vector<1x256xf32>
    %cst_182 = arith.constant 1.000000e+00 : f32
    %625 = vector.broadcast %cst_182 : f32 to vector<1x256xf32>
    %626 = arith.subf %625, %624 : vector<1x256xf32>
    %627 = arith.mulf %626, %554 : vector<1x256xf32>
    %cst_183 = arith.constant 1.000000e+00 : f32
    %628 = vector.broadcast %cst_183 : f32 to vector<1x256xf32>
    %629 = arith.subf %628, %626 : vector<1x256xf32>
    %cst_184 = arith.constant 1.000000e-10 : f32
    %630 = vector.broadcast %cst_184 : f32 to vector<1x256xf32>
    %631 = arith.addf %629, %630 : vector<1x256xf32>
    %632 = arith.mulf %554, %631 : vector<1x256xf32>
    %633 = vector.broadcast %580 : f32 to vector<32x256xf32>
    %634 = arith.mulf %633, %30 : vector<32x256xf32>
    %635 = arith.addf %29, %634 : vector<32x256xf32>
    %636 = arith.addf %635, %598 : vector<32x256xf32>
    %cst_185 = arith.constant 0.000000e+00 : f32
    %637 = vector.broadcast %cst_185 : f32 to vector<32x256xf32>
    %638 = arith.maximumf %636, %637 : vector<32x256xf32>
    %639 = arith.truncf %638 : vector<32x256xf32> to vector<32x256xbf16>
    %cst_186 = arith.constant dense<0.000000e+00> : vector<32x256xf32>
    %640 = tpu.matmul %17, %639, %cst_186 {dimension_numbers = #tpu.dot_dimension_numbers<[1], [0], [0], [1], [0, 0, 1, 1], [], []>} : vector<32x32xbf16>, vector<32x256xbf16>, vector<32x256xf32> -> vector<32x256xf32>
    %641 = vector.broadcast %18 : vector<32x1xf32> to vector<32x256xf32>
    %642 = arith.addf %640, %641 : vector<32x256xf32>
    %cst_187 = arith.constant 0.000000e+00 : f32
    %643 = vector.broadcast %cst_187 : f32 to vector<32x256xf32>
    %644 = arith.maximumf %642, %643 : vector<32x256xf32>
    %645 = arith.truncf %644 : vector<32x256xf32> to vector<32x256xbf16>
    %cst_188 = arith.constant dense<0.000000e+00> : vector<3x256xf32>
    %646 = tpu.matmul %19, %645, %cst_188 {dimension_numbers = #tpu.dot_dimension_numbers<[1], [0], [0], [1], [0, 0, 1, 1], [], []>} : vector<3x32xbf16>, vector<32x256xbf16>, vector<3x256xf32> -> vector<3x256xf32>
    %647 = vector.broadcast %20 : vector<3x1xf32> to vector<3x256xf32>
    %648 = arith.addf %646, %647 : vector<3x256xf32>
    %649 = arith.negf %648 : vector<3x256xf32>
    %650 = math.exp %649 : vector<3x256xf32>
    %cst_189 = arith.constant 1.000000e+00 : f32
    %651 = vector.broadcast %cst_189 : f32 to vector<3x256xf32>
    %652 = arith.addf %651, %650 : vector<3x256xf32>
    %653 = arith.divf %651, %652 : vector<3x256xf32>
    %654 = vector.broadcast %627 : vector<1x256xf32> to vector<3x256xf32>
    %655 = arith.mulf %654, %653 : vector<3x256xf32>
    %656 = arith.addf %578, %655 : vector<3x256xf32>
    %c8_i32 = arith.constant 8 : i32
    %c0_190 = arith.constant 0 : index
    %c0_191 = arith.constant 0 : index
    %657 = vector.load %arg19[%c0_190, %c0_191] : memref<3x256xf32, #tpu.memory_space<vmem>>, vector<3x256xf32>
    tpu.vector_store %arg19[%c0_190, %c0_191], %656 {strides = array<i32>} : memref<3x256xf32, #tpu.memory_space<vmem>>, vector<3x256xf32>,
    return
  }
  func.func @transform_0(%arg0: i32) -> i32 {
    %c0_i32 = arith.constant 0 : i32
    %c0_i32_0 = arith.constant 0 : i32
    return %c0_i32 : i32
  }
  func.func @transform_1(%arg0: i32) -> i32 {
    %c0_i32 = arith.constant 0 : i32
    %c0_i32_0 = arith.constant 0 : i32
    return %c0_i32 : i32
  }
  func.func @transform_2(%arg0: i32) -> i32 {
    %c0_i32 = arith.constant 0 : i32
    %c0_i32_0 = arith.constant 0 : i32
    return %c0_i32 : i32
  }
  func.func @transform_3(%arg0: i32) -> (i32, i32) {
    %c0_i32 = arith.constant 0 : i32
    %c0_i32_0 = arith.constant 0 : i32
    return %c0_i32, %arg0 : i32, i32
  }
  func.func @transform_4(%arg0: i32) -> (i32, i32) {
    %c0_i32 = arith.constant 0 : i32
    %c0_i32_0 = arith.constant 0 : i32
    return %c0_i32, %arg0 : i32, i32
  }
  func.func @transform_5(%arg0: i32) -> (i32, i32) {
    %c0_i32 = arith.constant 0 : i32
    %c0_i32_0 = arith.constant 0 : i32
    %c0_i32_1 = arith.constant 0 : i32
    return %c0_i32, %c0_i32_0 : i32, i32
  }
  func.func @transform_6(%arg0: i32) -> (i32, i32) {
    %c0_i32 = arith.constant 0 : i32
    %c0_i32_0 = arith.constant 0 : i32
    %c0_i32_1 = arith.constant 0 : i32
    return %c0_i32, %c0_i32_0 : i32, i32
  }
  func.func @transform_7(%arg0: i32) -> (i32, i32) {
    %c0_i32 = arith.constant 0 : i32
    %c0_i32_0 = arith.constant 0 : i32
    %c0_i32_1 = arith.constant 0 : i32
    return %c0_i32, %c0_i32_0 : i32, i32
  }
  func.func @transform_8(%arg0: i32) -> (i32, i32) {
    %c0_i32 = arith.constant 0 : i32
    %c0_i32_0 = arith.constant 0 : i32
    %c0_i32_1 = arith.constant 0 : i32
    return %c0_i32, %c0_i32_0 : i32, i32
  }
  func.func @transform_9(%arg0: i32) -> (i32, i32) {
    %c0_i32 = arith.constant 0 : i32
    %c0_i32_0 = arith.constant 0 : i32
    %c0_i32_1 = arith.constant 0 : i32
    return %c0_i32, %c0_i32_0 : i32, i32
  }
  func.func @transform_10(%arg0: i32) -> (i32, i32) {
    %c0_i32 = arith.constant 0 : i32
    %c0_i32_0 = arith.constant 0 : i32
    %c0_i32_1 = arith.constant 0 : i32
    return %c0_i32, %c0_i32_0 : i32, i32
  }
  func.func @transform_11(%arg0: i32) -> (i32, i32) {
    %c0_i32 = arith.constant 0 : i32
    %c0_i32_0 = arith.constant 0 : i32
    %c0_i32_1 = arith.constant 0 : i32
    return %c0_i32, %c0_i32_0 : i32, i32
  }
  func.func @transform_12(%arg0: i32) -> (i32, i32) {
    %c0_i32 = arith.constant 0 : i32
    %c0_i32_0 = arith.constant 0 : i32
    %c0_i32_1 = arith.constant 0 : i32
    return %c0_i32, %c0_i32_0 : i32, i32
  }
  func.func @transform_13(%arg0: i32) -> (i32, i32) {
    %c0_i32 = arith.constant 0 : i32
    %c0_i32_0 = arith.constant 0 : i32
    %c0_i32_1 = arith.constant 0 : i32
    return %c0_i32, %c0_i32_0 : i32, i32
  }
  func.func @transform_14(%arg0: i32) -> (i32, i32) {
    %c0_i32 = arith.constant 0 : i32
    %c0_i32_0 = arith.constant 0 : i32
    %c0_i32_1 = arith.constant 0 : i32
    return %c0_i32, %c0_i32_0 : i32, i32
  }
  func.func @transform_15(%arg0: i32) -> (i32, i32) {
    %c0_i32 = arith.constant 0 : i32
    %c0_i32_0 = arith.constant 0 : i32
    %c0_i32_1 = arith.constant 0 : i32
    return %c0_i32, %c0_i32_0 : i32, i32
  }
  func.func @transform_16(%arg0: i32) -> (i32, i32) {
    %c0_i32 = arith.constant 0 : i32
    %c0_i32_0 = arith.constant 0 : i32
    %c0_i32_1 = arith.constant 0 : i32
    return %c0_i32, %c0_i32_0 : i32, i32
  }
  func.func @transform_17(%arg0: i32) -> (i32, i32) {
    %c0_i32 = arith.constant 0 : i32
    %c0_i32_0 = arith.constant 0 : i32
    %c0_i32_1 = arith.constant 0 : i32
    return %c0_i32, %c0_i32_0 : i32, i32
  }
  func.func @transform_18(%arg0: i32) -> (i32, i32) {
    %c0_i32 = arith.constant 0 : i32
    %c0_i32_0 = arith.constant 0 : i32
    return %c0_i32, %arg0 : i32, i32
  }
}

</mosaic_0001>

<bundles_post_ra>
// kernel: volsdf_forward.1
= control target key start
LH: loop header
LB: loop body
LE: loop exit
PB: predicated region body
PF: predicated region fallthrough
CT: control target
= control target key end

     0   :  { %s6782_s0 = inlined_call_operand.vmem [shape: f32[8], index: 0, kind: input, shape index: {}]   ;;  %s6783_s1 = inlined_call_operand.vmem [shape: f32[8], index: 1, kind: input, shape index: {}]   ;;  %s6784_s2 = inlined_call_operand.<no memory space> [shape: f32[1], index: 2, kind: input, shape index: {}]   ;;  %s6785_s3 = inlined_call_operand.vmem [shape: f32[3,512], index: 3, kind: input, shape index: {}]   ;;  %s6786_s4 = inlined_call_operand.vmem [shape: f32[3,512], index: 4, kind: input, shape index: {}]   ;;  %s6787_s5 = inlined_call_operand.vmem [shape: f32[32,3], index: 5, kind: input, shape index: {}]   ;;  %s6788_s6 = inlined_call_operand.vmem [shape: f32[32,1], index: 6, kind: input, shape index: {}]   ;;  %s6789_s7 = inlined_call_operand.vmem [shape: bf16[32,32], index: 7, kind: input, shape index: {}]   ;;  %s6790_s8 = inlined_call_operand.vmem [shape: f32[32,1], index: 8, kind: input, shape index: {}]   ;;  %s6791_s9 = inlined_call_operand.vmem [shape: bf16[33,32], index: 9, kind: input, shape index: {}]   ;;  %s6792_s10 = inlined_call_operand.vmem [shape: f32[33,1], index: 10, kind: input, shape index: {}]   ;;  %s6793_s11 = inlined_call_operand.vmem [shape: f32[32,3], index: 11, kind: input, shape index: {}]   ;;  %s6794_s12 = inlined_call_operand.vmem [shape: f32[32,3], index: 12, kind: input, shape index: {}]   ;;  %s6795_s13 = inlined_call_operand.vmem [shape: f32[32,1], index: 13, kind: input, shape index: {}]   ;;  %s6796_s14 = inlined_call_operand.vmem [shape: bf16[32,32], index: 14, kind: input, shape index: {}]   ;;  %s6797_s15 = inlined_call_operand.vmem [shape: f32[32,1], index: 15, kind: input, shape index: {}]   ;;  %s6798_s16 = inlined_call_operand.vmem [shape: bf16[3,32], index: 16, kind: input, shape index: {}]   ;;  %s6799_s17 = inlined_call_operand.vmem [shape: f32[3,1], index: 17, kind: input, shape index: {}]   ;;  %s6800_s18 = inlined_call_operand.vmem [shape: f32[3,512], index: 18, kind: output, shape index: {}]  }
   0x1   :  { %6835 = sst [smem:[#allocation91_spill]] %s6782_s0 }
   0x2   :  { %6836 = sst [smem:[#allocation92_spill]] %s6783_s1 }
   0x3   :  { %6837 = sst [smem:[#allocation93_spill]] %s6784_s2 }
   0x4   :  { %s6838_s29 = sld [smem:[#allocation93_spill]] }
   0xa   :  { %23 = sst [smem:[#allocation2]] %s6838_s29 }
   0xb   :  { %24 = vsyncpa [#allocation4], 0 }
   0xc   :  { %25 = vsyncpa [#allocation6], 0  ;;  %s4915_s30 = smov 0  }
   0xd LB: > { %s4417_s0 = sadd.s32 4294967295, %s4811_s30   ;;  %p4419_p0 = scmp.ge.s32.totalorder %s4811_s30, 1  ;;  %s4811_s30 = sphi %s4915_s30, %s31_s30  }
   0xe   : > { %p450_p1 = scmp.lt.s32.totalorder %s4811_s30, 3  ;;  %s6839_s20 = sld [smem:[#allocation91_spill]] }
   0xf   : > { %p4932_p3 = scmp.eq.s32.totalorder %s4417_s0, 0  ;;  %s6842_s25 = sld [smem:[#allocation92_spill]] }
  0x10   : > { %p4926_p2 = pnand %p4419_p0, %p450_p1 }
  0x11   : > { %s6841_s2 = scalar_select %p4932_p3, 1, 0 }
  0x12   : > { %s6840_s22 = scalar_select %p4926_p2, 1, 0 }
  0x13   : > { %p4583_p4 = pneg %p4926_p2 }
  0x14   : > { %s463_s21 = sshll.u32 %s6839_s20, 4  ;;  %s464_s21 = int_to_ptr.vmem [resolvable:$true] %s463_s21 }
  0x15   : > { %s474_s26 = sshll.u32 %s6842_s25, 4  ;;  %p4943_p5 = pnand %p4932_p3, %p4583_p4  ;;  %s475_s26 = int_to_ptr.vmem [resolvable:$true] %s474_s26 }
  0x16   : > { %s4767_s28 = scalar_lea.vmem %s464_s21, 16  ;;  %p4775_p10 = scmp.lt.s32.totalorder %s464_s21, %s464_s21 }
  0x17   : > { %p4768_p6 = scmp.ne.s32.totalorder %s464_s21, %s4767_s28  ;;  %p4769_p7 = pneg %p4943_p5 }
  0x18   : > { %p4776_p11 = scmp.lt.s32.totalorder %s4767_s28, %s4767_s28 }
  0x19   : > { %p4770_p8 = pnand %p4769_p7, %p4768_p6 }
  0x1a   : > { %p4777_p12 = por %p4776_p11, %p4775_p10 }
  0x1b   : > { %p4771_p9 = pneg %p4770_p8 }
  0x1d   : > { %p4778_p13 = pnand %p4777_p12, %p4771_p9 }
  0x1f   : > { %4781 = shalt.err (!%p4778_p13)
}
  0x20   : > { %s4813_s29 = smov [#allocation3]   ;;  %s4782_s19 = scalar_lea.vmem %s475_s26, 16 }
  0x21   : > { %4586 = dma.vmem_to_smem (!%p4943_p5), %s464_s21, 16, %s4813_s29, [#allocation4]  }
  0x22   : > { %p4783_p0 = scmp.ne.s32.totalorder %s475_s26, %s4782_s19  ;;  %p4790_p3 = scmp.lt.s32.totalorder %s475_s26, %s475_s26 }
  0x23   : > { %p4791_p2 = scmp.lt.s32.totalorder %s4782_s19, %s4782_s19 }
  0x24   : > { %p4785_p1 = pnand %p4783_p0, %p4769_p7 }
  0x25   : > { %p4792_p6 = por %p4791_p2, %p4790_p3 }
  0x26   : > { %p4786_p4 = pneg %p4785_p1 }
  0x28   : > { %p4793_p8 = pnand %p4792_p6, %p4786_p4 }
  0x2a   : > { %4796 = shalt.err (!%p4793_p8)
}
  0x2b   : > { %s4814_s1 = smov [#allocation5]   ;;  %p6844_p9 = scmp.ne.s32.totalorder %s6840_s22, 0 }
  0x2c   : > { %4589 = dma.vmem_to_smem (!%p4943_p5), %s475_s26, 16, %s4814_s1, [#allocation6]  }
  0x2d   : > { %547 = sbr.rel (%p6844_p9) target bundleno = 4637 (0x121d), region = 92 }
  0x34   : > { %p6845_p10 = scmp.ne.s32.totalorder %s6841_s2, 0 }
  0x36   : > { %4802 = dma.done.wait (%p6845_p10), [#allocation4], 16  }
  0x37   : > { %4804 = vsyncadd (%p6845_p10), [#allocation4], 4294967280 }
  0x38   : > { %4806 = dma.done.wait (%p6845_p10), [#allocation6], 16  }
  0x39   : > { %4808 = vsyncadd (%p6845_p10), [#allocation6], 4294967280 }
  0x3a   : > { %557 = sfence }
  0x3b   : > { %s4426_s20 = sshll.u32 %s4417_s0, 1  ;;  %v4815_v0 = vmov 0.0   ;;  %v6804_v1 = vmov 0   ;;  %v673_v2 = vld [vmem:[%s6788_s6] sm:$0xff]  ;;  %v675_v3 = vld [vmem:[%s6788_s6 + $0x10] sm:$0xff]  ;;  %v674_v4 = vld [vmem:[%s6788_s6 + $0x8] sm:$0xff] }
  0x3c   : > { %p612_p2 = scmp.lt.s32.totalorder %s4426_s20, 3  ;;  %820 = vmatprep.mubr.f32.mxu0 %v4815_v0  ;;  %915 = vmatprep.mubr.f32.mxu1 %v4815_v0  ;;  %v676_v5 = vld [vmem:[%s6788_s6 + $0x18] sm:$0xff]  ;;  %vm636_vm0 = vcmask 1042432   ;;  %v669_v11 = vld [vmem:[%s6787_s5] sm:$0xff]  ;;  %vm739_vm1 = vcmask 23552   ;;  %v670_v15 = vld [vmem:[%s6787_s5 + $0x8] sm:$0xff] }
  0x3d   : > { %4606 = vset.pattern.permute.xlu0 %v6804_v1  ;;  %4607 = vset.pattern.permute.xlu1 %v6804_v1  ;;  %v693_v16 = vld [vmem:[%s6790_s8] sm:$0xff]  ;;  %v694_v17 = vld [vmem:[%s6790_s8 + $0x8] sm:$0xff]  ;;  %v671_v18 = vld [vmem:[%s6787_s5 + $0x10] sm:$0xff]  ;;  %s4479_s19 = sld [smem:[#allocation3 + $0x1]]  ;;  %s4491_s1 = sld [smem:[#allocation3 + $0x2]]  ;;  %vm1320_vm2 = vcmask 261120  }
  0x3e   : > { %s7037_s20 = smov (!%p612_p2, %s4426_s20), 3  ;;  %719 = vperm.xlu0 %4606, %v673_v2   ;;  %729 = vperm.xlu1 %4607, %v675_v3   ;;  %v695_v19 = vld [vmem:[%s6790_s8 + $0x10] sm:$0xff]  ;;  %v696_v20 = vld [vmem:[%s6790_s8 + $0x18] sm:$0xff]  ;;  %v685_v22 = vld [vmem:[%s6795_s13] sm:$0xff]  ;;  %s4503_s21 = sld [smem:[#allocation3 + $0x3]] }
  0x3f   : > { %s4975_s0 = sshll.u32 %s7037_s20, 2  ;;  %v672_v21 = vld [vmem:[%s6787_s5 + $0x18] sm:$0xff]  ;;  %v686_v23 = vld [vmem:[%s6795_s13 + $0x8] sm:$0xff]  ;;  %v681_v24 = vld [vmem:[%s6794_s12] sm:$0xff]  ;;  %s4515_s22 = sld [smem:[#allocation3 + $0x4]] }
  0x40   : > { %s615_s26 = scalar_lea.vmem %s6785_s3, %s4975_s0  ;;  %s621_s29 = scalar_lea.vmem %s6786_s4, %s4975_s0  ;;  %v677_v25 = vld [vmem:[%s6793_s11] sm:$0xff]  ;;  %v703_v27 = vld [vmem:[%s6792_s10 + $0x8] sm:$0xff]  ;;  %v687_v30 = vld [vmem:[%s6795_s13 + $0x10] sm:$0xff] }
  0x41   : > { %v630_v6 = vld [vmem:[%s615_s26] sm:$0x77]  ;;  %v682_v28 = vld [vmem:[%s6794_s12 + $0x8] sm:$0xff]  ;;  %v688_v31 = vld [vmem:[%s6795_s13 + $0x18] sm:$0xff]  ;;  %s4527_s20 = sld [smem:[#allocation3 + $0x5]]  ;;  %s4539_s2 = sld [smem:[#allocation3 + $0x6]] }
  0x42   : > { %v631_v7 = vld [vmem:[%s621_s29] sm:$0x77]  ;;  %v738_v9 = vcombine.high %v630_v6, %v630_v6  ;;  %724 = vperm.xlu0 %4606, %v674_v4   ;;  %734 = vperm.xlu1 %4607, %v676_v5   ;;  %v678_v29 = vld [vmem:[%s6793_s11 + $0x8] sm:$0xff]  ;;  %v683_v32 = vld [vmem:[%s6794_s12 + $0x10] sm:$0xff]  ;;  %s1259_s29 = sld [smem:[#allocation3]]  ;;  %s4551_s23 = sld [smem:[#allocation3 + $0x7]] }
  0x43   : > { %v632_v8 = vmul.f32 %v631_v7, %v631_v7  ;;  %v846_v10 = vcombine.high %v631_v7, %v631_v7  ;;  %v702_v26 = vld [vmem:[%s6792_s10] sm:$0xff]  ;;  %v679_v33 = vld [vmem:[%s6793_s11 + $0x10] sm:$0xff]  ;;  %v705_v35 = vld [vmem:[%s6792_s10 + $0x18] sm:$0xff]  ;;  %v5139_v46 = vstv %s4479_s19  ;;  %s665_s28 = sld [smem:[#allocation2]]  ;;  %s6014_s27 = sld [smem:[#allocation5]] }
  0x44   : > { %4432 = vmatprep.subr.msk.mxu0 %vm636_vm0, %v738_v9  ;;  %v704_v34 = vld [vmem:[%s6792_s10 + $0x10] sm:$0xff]  ;;  %v684_v36 = vld [vmem:[%s6794_s12 + $0x18] sm:$0xff]  ;;  %v711_v38 = vld [vmem:[%s6797_s15] sm:$0xff]  ;;  %v5141_v47 = vstv %s4491_s1  ;;  %s4480_s19 = sld [smem:[#allocation5 + $0x1]]  ;;  %s4540_s26 = sld [smem:[#allocation5 + $0x6]] }
  0x45   : > { %v634_v12 = vcombine.high %v632_v8, %v632_v8  ;;  %v4995_v13 = vsel %vm636_vm0, %v632_v8, 0.0  ;;  %4438 = vmatprep.subr.msk.mxu1 %vm636_vm0, %v846_v10  ;;  %4433 = vmatpush1.msk.msra.mxu0 %vm636_vm0, %v630_v6  ;;  %v680_v37 = vld [vmem:[%s6793_s11 + $0x18] sm:$0xff]  ;;  %v712_v39 = vld [vmem:[%s6797_s15 + $0x8] sm:$0xff]  ;;  %v713_v40 = vld [vmem:[%s6797_s15 + $0x10] sm:$0xff]  ;;  %v5143_v48 = vstv %s4503_s21  ;;  %s627_s21 = scalar_lea.vmem %s6800_s18, %s4975_s0 }
  0x46   : > { %6846 = vst [vmem:[#allocation9_spill] sm:$0xff] %v4995_v13  ;;  %4439 = vmatpush1.msk.msra.mxu1 %vm636_vm0, %v631_v7  ;;  %4434 = vmatmul.mubr.msk.f32.vlgmr.msra.gmra.mrb[0].mxu0 %vm739_vm1, %v669_v11  ;;  %v714_v41 = vld [vmem:[%s6797_s15 + $0x18] sm:$0xff]  ;;  %v706_v42 = vld [vmem:[%s6792_s10 + $0x20] sm:$0x1]  ;;  %v5147_v51 = vstv %s4515_s22  ;;  %s4504_s22 = sld [smem:[#allocation5 + $0x3]] }
  0x47   : > { %v5002_v14 = vsel %vm636_vm0, %v634_v12, 0.0  ;;  %4440 = vmatmul.mubr.msk.f32.vlgmr.msra.gmra.mrb[0].mxu1 %vm739_vm1, %v669_v11  ;;  %826 = vmatprep.mubr.f32.mxu0 %v4815_v0  ;;  %v716_v43 = vld [vmem:[%s6799_s17] sm:$0x7]  ;;  %v5149_v52 = vstv %s4527_s20  ;;  %v5151_v53 = vstv %s4539_s2 }
  0x48   : > { %6847 = vst [vmem:[#allocation10_spill] sm:$0xff] %v5002_v14  ;;  %921 = vmatprep.mubr.f32.mxu1 %v4815_v0  ;;  %4444 = vmatprep.subr.msk.mxu0 %vm636_vm0, %v846_v10  ;;  %v5137_v45 = vstv %s1259_s29  ;;  %6849 = vst [vmem:[#allocation12_spill] sm:$0xff] %v5149_v52  ;;  %v5153_v54 = vstv %s4551_s23  ;;  %s4516_s23 = sld [smem:[#allocation5 + $0x4]]  ;;  %s4552_s29 = sld [smem:[#allocation5 + $0x7]] }
  0x49   : > { %4456 = vmatprep.subr.msk.mxu1 %vm636_vm0, %v846_v10  ;;  %4445 = vmatpush1.msk.msra.mxu0 %vm636_vm0, %v631_v7  ;;  %6850 = vst [vmem:[#allocation13_spill] sm:$0xff] %v5151_v53  ;;  %6851 = vst [vmem:[#allocation14_spill] sm:$0xff] %v5153_v54 }
  0x4a   : > { %4457 = vmatpush1.msk.msra.mxu1 %vm636_vm0, %v631_v7  ;;  %4435 = vmatmul.mubr.msk.f32.gmra.mrb[2].mxu0 %vm739_vm1, %v670_v15 }
  0x4b   : > { %4441 = vmatmul.mubr.msk.f32.gmra.mrb[2].mxu1 %vm739_vm1, %v670_v15  ;;  %832 = vmatprep.mubr.f32.mxu0 %v4815_v0 }
  0x4c   : > { %927 = vmatprep.mubr.f32.mxu1 %v4815_v0  ;;  %4450 = vmatprep.subr.msk.mxu0 %vm636_vm0, %v738_v9 }
  0x4d   : > { %1292 = vperm.xlu0 %4606, %v693_v16   ;;  %1297 = vperm.xlu1 %4607, %v694_v17  }
  0x4e   : > { %4436 = vmatmul.mubr.msk.f32.gmra.mrb[4].mxu0 %vm739_vm1, %v671_v18 }
  0x4f   : > { %4442 = vmatmul.mubr.msk.f32.gmra.mrb[4].mxu1 %vm739_vm1, %v671_v18  ;;  %838 = vmatprep.mubr.f32.mxu0 %v4815_v0 }
  0x50   : > { %933 = vmatprep.mubr.f32.mxu1 %v4815_v0 }
  0x51   : > { %1302 = vperm.xlu0 %4606, %v695_v19   ;;  %1307 = vperm.xlu1 %4607, %v696_v20  }
  0x52   : > { %4437 = vmatmul.mubr.msk.f32.gmra.mrb[6].mxu0 %vm739_vm1, %v672_v21 }
  0x53   : > { %4443 = vmatmul.mubr.msk.f32.gmra.mrb[6].mxu1 %vm739_vm1, %v672_v21  ;;  %1016 = vmatprep.mubr.f32.mxu0 %v4815_v0 }
  0x54   : > { %1234 = vmatprep.mubr.f32.mxu1 %v4815_v0 }
  0x55   : > { %1144 = vperm.xlu0 %4606, %v685_v22   ;;  %1149 = vperm.xlu1 %4607, %v686_v23  }
  0x56   : > { %4446 = vmatmul.mubr.msk.f32.vlgmr.msra.gmra.mrb[8].mxu0 %vm739_vm1, %v681_v24 }
  0x57   : > { %4458 = vmatmul.mubr.msk.f32.vlgmr.msra.gmra.mrb[8].mxu1 %vm739_vm1, %v677_v25  ;;  %1022 = vmatprep.mubr.f32.mxu0 %v4815_v0 }
  0x58   : > { %4451 = vmatpush1.msk.msra.mxu0 %vm636_vm0, %v630_v6  ;;  %1240 = vmatprep.mubr.f32.mxu1 %v4815_v0 }
  0x59   : > { %1394 = vperm.xlu0 %4606, %v702_v26   ;;  %1399 = vperm.xlu1 %4607, %v703_v27  }
  0x5a   : > { %4447 = vmatmul.mubr.msk.f32.gmra.mrb[10].mxu0 %vm739_vm1, %v682_v28 }
  0x5b   : > { %4459 = vmatmul.mubr.msk.f32.gmra.mrb[10].mxu1 %vm739_vm1, %v678_v29  ;;  %1028 = vmatprep.mubr.f32.mxu0 %v4815_v0 }
  0x5c   : > { %1246 = vmatprep.mubr.f32.mxu1 %v4815_v0 }
  0x5d   : > { %1154 = vperm.xlu0 %4606, %v687_v30   ;;  %1159 = vperm.xlu1 %4607, %v688_v31  }
  0x5e   : > { %4448 = vmatmul.mubr.msk.f32.gmra.mrb[12].mxu0 %vm739_vm1, %v683_v32 }
  0x5f   : > { %4460 = vmatmul.mubr.msk.f32.gmra.mrb[12].mxu1 %vm739_vm1, %v679_v33  ;;  %1034 = vmatprep.mubr.f32.mxu0 %v4815_v0 }
  0x60   : > { %1252 = vmatprep.mubr.f32.mxu1 %v4815_v0 }
  0x61   : > { %1404 = vperm.xlu0 %4606, %v704_v34   ;;  %1409 = vperm.xlu1 %4607, %v705_v35  }
  0x62   : > { %4449 = vmatmul.mubr.msk.f32.gmra.mrb[14].mxu0 %vm739_vm1, %v684_v36 }
  0x63   : > { %4461 = vmatmul.mubr.msk.f32.gmra.mrb[14].mxu1 %vm739_vm1, %v680_v37  ;;  %1117 = vmatprep.mubr.f32.mxu0 %v4815_v0 }
  0x64   : > { %1359 = vmatprep.mubr.bf16.mxu1 %v6804_v1 }
  0x65   : > { %1580 = vperm.xlu0 %4606, %v711_v38   ;;  %1585 = vperm.xlu1 %4607, %v712_v39  }
  0x66   : > { %4452 = vmatmul.mubr.msk.f32.vlgmr.msra.gmra.mrb[8].mxu0 %vm739_vm1, %v677_v25 }
  0x67   : > { %1123 = vmatprep.mubr.f32.mxu0 %v4815_v0 }
  0x69   : > { %1590 = vperm.xlu0 %4606, %v713_v40   ;;  %1595 = vperm.xlu1 %4607, %v714_v41  }
  0x6a   : > { %4453 = vmatmul.mubr.msk.f32.gmra.mrb[10].mxu0 %vm739_vm1, %v678_v29 }
  0x6b   : > { %1129 = vmatprep.mubr.f32.mxu0 %v4815_v0 }
  0x6d   : > { %1414 = vperm.xlu0 %4606, %v706_v42   ;;  %1681 = vperm.xlu1 %4607, %v716_v43  }
  0x6e   : > { %4454 = vmatmul.mubr.msk.f32.gmra.mrb[12].mxu0 %vm739_vm1, %v679_v33 }
  0x6f   : > { %1135 = vmatprep.mubr.f32.mxu0 %v4815_v0 }
  0x72   : > { %4455 = vmatmul.mubr.msk.f32.gmra.mrb[14].mxu0 %vm739_vm1, %v680_v37 }
  0x73   : > { %1471 = vmatprep.mubr.bf16.mxu0 %v6804_v1 }
  0xbd   : > { %v720_v44 = vpop.permute.xlu0 %719  ;;  %v730_v2 = vpop.permute.xlu1 %729 }
  0xc1   : > { %v725_v3 = vpop.permute.xlu0 %724 }
 0x119   : > { %v822_v49 = vpop.f32.mrb[0].mxu0 }
 0x11a   : > { %v5145_v50 = vpop.f32.mrb[0].mxu1  ;;  %v5155_v55 = vadd.f32 %v822_v49, %v720_v44  ;;  %v824_v56 = vpop.f32.mrb[1].mxu0 }
 0x11b   : > { %6848 = vst [vmem:[#allocation11_spill] sm:$0xff] %v5145_v50  ;;  %v5157_v57 = vpop.f32.mrb[1].mxu1  ;;  %v1262_v58 = vmul.f32 %v5137_v45, %v5145_v50  ;;  %v1755_v59 = vmul.f32 %v5139_v46, %v5145_v50  ;;  %v2123_v60 = vmul.f32 %v5141_v47, %v5145_v50  ;;  %v5165_v61 = vadd.f32 %v824_v56, %v720_v44  ;;  %v735_v56 = vpop.permute.xlu1 %734 }
 0x11c   : > { %6852 = vst [vmem:[#allocation15_spill] sm:$0xff] %v5155_v55  ;;  %v1263_v62 = vmul.f32 %v5137_v45, %v5157_v57  ;;  %v1756_v63 = vmul.f32 %v5139_v46, %v5157_v57  ;;  %v2124_v0 = vmul.f32 %v5141_v47, %v5157_v57  ;;  %v5180_v7 = vmul.f32 %v5143_v48, %v5157_v57 }
 0x11d   : > { %6853 = vst [vmem:[#allocation16_spill] sm:$0xff] %v5165_v61  ;;  %v1270_v4 = vadd.f32 %v1262_v58, %v5155_v55  ;;  %v1763_v5 = vadd.f32 %v1755_v59, %v5155_v55  ;;  %v5176_v6 = vadd.f32 %v2123_v60, %v5155_v55  ;;  %v828_v8 = vpop.f32.mrb[2].mxu0  ;;  %v5191_v15 = vmul.f32 %v5143_v48, %v5145_v50 }
 0x11e   : > { %v5182_v9 = vpop.f32.mrb[2].mxu1  ;;  %v1271_v10 = vadd.f32 %v1263_v62, %v5165_v61  ;;  %v1764_v11 = vadd.f32 %v1756_v63, %v5165_v61  ;;  %v5187_v12 = vadd.f32 %v2124_v0, %v5165_v61  ;;  %v5193_v16 = vadd.f32 %v828_v8, %v725_v3  ;;  %v830_v17 = vpop.f32.mrb[3].mxu0 }
 0x11f   : > { %6854 = vst [vmem:[#allocation17_spill] sm:$0xff] %v5182_v9  ;;  %v5195_v18 = vpop.f32.mrb[3].mxu1  ;;  %v1264_v19 = vmul.f32 %v5137_v45, %v5182_v9  ;;  %v1278_v20 = vmax.f32 %v1270_v4, 0.0  ;;  %v1757_v21 = vmul.f32 %v5139_v46, %v5182_v9  ;;  %v5201_v22 = vadd.f32 %v830_v17, %v725_v3 }
 0x120   : > { %6855 = vst [vmem:[#allocation18_spill] sm:$0xff] %v5195_v18  ;;  %v1265_v23 = vmul.f32 %v5137_v45, %v5195_v18  ;;  %v1279_v24 = vmax.f32 %v1271_v10, 0.0  ;;  %v1758_v25 = vmul.f32 %v5139_v46, %v5195_v18  ;;  %v1772_v27 = vmax.f32 %v1764_v11, 0.0 }
 0x121   : > { %6856 = vst [vmem:[#allocation19_spill] sm:$0xff] %v5201_v22  ;;  %v1272_v26 = vadd.f32 %v1264_v19, %v5193_v16  ;;  %v1765_v28 = vadd.f32 %v1757_v21, %v5193_v16  ;;  %v1771_v29 = vmax.f32 %v1763_v5, 0.0  ;;  %v834_v30 = vpop.f32.mrb[4].mxu0  ;;  %v2126_v34 = vmul.f32 %v5141_v47, %v5195_v18 }
 0x122   : > { %v5209_v31 = vpop.f32.mrb[4].mxu1  ;;  %v1273_v32 = vadd.f32 %v1265_v23, %v5201_v22  ;;  %v1766_v33 = vadd.f32 %v1758_v25, %v5201_v22  ;;  %v2140_v35 = vmax.f32 %v5187_v12, 0.0  ;;  %v5216_v36 = vadd.f32 %v834_v30, %v730_v2  ;;  %v836_v37 = vpop.f32.mrb[5].mxu0 }
 0x123   : > { %6857 = vst [vmem:[#allocation20_spill] sm:$0xff] %v5209_v31  ;;  %v5218_v38 = vpop.f32.mrb[5].mxu1  ;;  %v1280_v39 = vmax.f32 %v1272_v26, 0.0  ;;  %v1266_v40 = vmul.f32 %v5137_v45, %v5209_v31  ;;  %v1773_v41 = vmax.f32 %v1765_v28, 0.0  ;;  %v5222_v42 = vadd.f32 %v836_v37, %v730_v2  ;;  %v5255_v30 = vpop.permute.xlu0 %1292 }
 0x124   : > { %v1281_v43 = vmax.f32 %v1273_v32, 0.0  ;;  %v1267_v44 = vmul.f32 %v5137_v45, %v5218_v38  ;;  %v1774_v49 = vmax.f32 %v1766_v33, 0.0  ;;  %v1760_v62 = vmul.f32 %v5139_v46, %v5218_v38  ;;  %6862 = vst [vmem:[#allocation25_spill] sm:$0xff] %v5255_v30 }
 0x125   : > { %v1286_v58 = vpack.c.bf16 %v1280_v39, %v1278_v20  ;;  %v1274_v59 = vadd.f32 %v1266_v40, %v5216_v36  ;;  %v5227_v60 = vpack.c.bf16 %v1773_v41, %v1771_v29  ;;  %v840_v63 = vpop.f32.mrb[6].mxu0  ;;  %v1759_v5 = vmul.f32 %v5139_v46, %v5209_v31 }
 0x126   : > { %v5231_v0 = vpop.f32.mrb[6].mxu1  ;;  %v1287_v3 = vpack.c.bf16 %v1281_v43, %v1279_v24  ;;  %v1275_v2 = vadd.f32 %v1267_v44, %v5222_v42  ;;  %v5234_v4 = vpack.c.bf16 %v1774_v49, %v1772_v27  ;;  %v5238_v8 = vadd.f32 %v840_v63, %v735_v56  ;;  %v842_v10 = vpop.f32.mrb[7].mxu0 }
 0x127   : > { %6858 = vst [vmem:[#allocation21_spill] sm:$0xff] %v5227_v60  ;;  %6859 = vst [vmem:[#allocation22_spill] sm:$0xff] %v5231_v0  ;;  %v5240_v11 = vpop.f32.mrb[7].mxu1  ;;  %v1268_v17 = vmul.f32 %v5137_v45, %v5231_v0  ;;  %v1282_v19 = vmax.f32 %v1274_v59, 0.0  ;;  %v1768_v20 = vadd.f32 %v1760_v62, %v5222_v42  ;;  %v5245_v21 = vadd.f32 %v842_v10, %v735_v56  ;;  %v5283_v10 = vpop.permute.xlu1 %1297 }
 0x128   : > { %6860 = vst [vmem:[#allocation23_spill] sm:$0xff] %v5234_v4  ;;  %6861 = vst [vmem:[#allocation24_spill] sm:$0xff] %v5240_v11  ;;  %1327 = vmatprep.subr.bf16.mxu1 %v1287_v3  ;;  %v1269_v23 = vmul.f32 %v5137_v45, %v5240_v11  ;;  %v1283_v24 = vmax.f32 %v1275_v2, 0.0  ;;  %v1762_v25 = vmul.f32 %v5139_v46, %v5240_v11 }
 0x129   : > { %1328 = vmatpush1.bf16.msra.mxu1 %v1286_v58  ;;  %v1276_v26 = vadd.f32 %v1268_v17, %v5238_v8  ;;  %v1776_v27 = vmax.f32 %v1768_v20, 0.0  ;;  %v1761_v28 = vmul.f32 %v5139_v46, %v5231_v0  ;;  %v1767_v29 = vadd.f32 %v1759_v5, %v5216_v36  ;;  %6863 = vst [vmem:[#allocation26_spill] sm:$0xff] %v5283_v10 }
 0x12a   : > { %v1277_v32 = vadd.f32 %v1269_v23, %v5245_v21  ;;  %v5258_v33 = vpop.f32.mrb[8].mxu1  ;;  %v1770_v37 = vadd.f32 %v1762_v25, %v5245_v21  ;;  %v2134_v39 = vadd.f32 %v2126_v34, %v5201_v22  ;;  %v2125_v40 = vmul.f32 %v5141_v47, %v5182_v9 }
 0x12b   : > { %v1284_v41 = vmax.f32 %v1276_v26, 0.0  ;;  %v5264_v43 = vpop.f32.mrb[9].mxu1  ;;  %v1769_v44 = vadd.f32 %v1761_v28, %v5238_v8  ;;  %v1775_v49 = vmax.f32 %v1767_v29, 0.0  ;;  %v5269_v56 = vmul.f32 %v5137_v45, %v5258_v33  ;;  %v5357_v1 = vpop.permute.xlu1 %1307 }
 0x12c   : > { %v1285_v58 = vmax.f32 %v1277_v32, 0.0  ;;  %v1778_v59 = vmax.f32 %v1770_v37, 0.0  ;;  %v5273_v62 = vmul.f32 %v5137_v45, %v5264_v43  ;;  %v5277_v34 = vmul.f32 %v5139_v46, %v5258_v33  ;;  %6870 = vst [vmem:[#allocation33_spill] sm:$0xff] %v5357_v1 }
 0x12d   : > { %v1288_v63 = vpack.c.bf16 %v1284_v41, %v1282_v19  ;;  %v1777_v3 = vmax.f32 %v1769_v44, 0.0  ;;  %v5281_v2 = vmul.f32 %v5139_v46, %v5264_v43  ;;  %v2142_v5 = vmax.f32 %v2134_v39, 0.0 }
 0x12e   : > { %v1289_v17 = vpack.c.bf16 %v1285_v58, %v1283_v24  ;;  %v5285_v20 = vpop.f32.mrb[10].mxu1  ;;  %v5287_v23 = vpack.c.bf16 %v1778_v59, %v1776_v27  ;;  %v2133_v25 = vadd.f32 %v2125_v40, %v5193_v16  ;;  %v2139_v26 = vmax.f32 %v5176_v6, 0.0  ;;  %v5307_v27 = vpop.permute.xlu0 %1302  ;;  %v5312_v6 = vld [vmem:[%s6789_s7] sm:$0xff]  }
 0x12f   : > { %v5291_v28 = vpop.f32.mrb[11].mxu1  ;;  %v5293_v19 = vpack.c.bf16 %v1777_v3, %v1775_v49  ;;  %v5297_v29 = vmul.f32 %v5137_v45, %v5285_v20  ;;  %v5301_v32 = vmul.f32 %v5139_v46, %v5285_v20  ;;  %v5305_v24 = vpack.c.bf16 %v2142_v5, %v2140_v35  ;;  %6867 = vst [vmem:[#allocation30_spill] sm:$0xff] %v5307_v27 }
 0x130   : > { %6864 = vst [vmem:[#allocation27_spill] sm:$0xff] %v5287_v23  ;;  %1329 = vmatprep.subr.bf16.mxu1 %v1289_v17  ;;  %6868 = vst [vmem:[#allocation31_spill] sm:$0xff] %v5312_v6  ;;  %v5316_v37 = vmul.f32 %v5137_v45, %v5291_v28  ;;  %v5320_v39 = vmul.f32 %v5139_v46, %v5291_v28  ;;  %v2141_v40 = vmax.f32 %v2133_v25, 0.0 }
 0x131   : > { %6865 = vst [vmem:[#allocation28_spill] sm:$0xff] %v5293_v19  ;;  %6866 = vst [vmem:[#allocation29_spill] sm:$0xff] %v5305_v24  ;;  %v2128_v12 = vmul.f32 %v5141_v47, %v5218_v38  ;;  %1330 = vmatpush1.bf16.msra.mxu1 %v1288_v63  ;;  %v2130_v35 = vmul.f32 %v5141_v47, %v5240_v11  ;;  %v2127_v41 = vmul.f32 %v5141_v47, %v5209_v31  ;;  %v6871_v19 = vmov 0  }
 0x132   : > { %v2129_v44 = vmul.f32 %v5141_v47, %v5231_v0  ;;  %v2322_v49 = vmul.f32 %v5141_v47, %v5258_v33  ;;  %v5332_v58 = vpop.f32.mrb[12].mxu1  ;;  %v5334_v59 = vpack.c.bf16 %v2141_v40, %v2139_v26  ;;  %v5339_v63 = vmul.f32 %v5141_v47, %v5264_v43  ;;  %v1145_v60 = vpop.permute.xlu0 %1144 }
 0x133   : > { %v2136_v3 = vadd.f32 %v2128_v12, %v5222_v42  ;;  %v5343_v5 = vmul.f32 %v5141_v47, %v5285_v20  ;;  %v5345_v17 = vpop.f32.mrb[13].mxu1  ;;  %v5349_v25 = vmul.f32 %v5137_v45, %v5332_v58  ;;  %v5353_v26 = vmul.f32 %v5139_v46, %v5332_v58 }
 0x134   : > { %6869 = vst [vmem:[#allocation32_spill] sm:$0xff] %v5334_v59  ;;  %v2138_v40 = vadd.f32 %v2130_v35, %v5245_v21  ;;  %v2135_v12 = vadd.f32 %v2127_v41, %v5216_v36  ;;  %4464 = vmatmul.mubr.msk.bf16.vlgmr.msra.gmra.mrb[16].mxu1 %vm1320_vm2, %v5312_v6  ;;  %v5363_v59 = vmul.f32 %v5137_v45, %v5345_v17 }
 0x135   : > { %v5367_v24 = vmul.f32 %v5139_v46, %v5345_v17  ;;  %v2144_v14 = vmax.f32 %v2136_v3, 0.0  ;;  %v2137_v13 = vadd.f32 %v2129_v44, %v5238_v8  ;;  %1369 = vmatprep.mubr.bf16.mxu1 %v6871_v19  ;;  %v5373_v23 = vmul.f32 %v5141_v47, %v5291_v28 }
 0x136   : > { %v2146_v35 = vmax.f32 %v2138_v40, 0.0  ;;  %v2143_v41 = vmax.f32 %v2135_v12, 0.0  ;;  %v5377_v6 = vmul.f32 %v5141_v47, %v5332_v58  ;;  %v5379_v4 = vpop.f32.mrb[14].mxu1  ;;  %v5383_v3 = vmul.f32 %v5141_v47, %v5345_v17 }
 0x137   : > { %v2145_v1 = vmax.f32 %v2137_v13, 0.0  ;;  %v2494_v44 = vmul.f32 %v5143_v48, %v5195_v18  ;;  %v2500_v40 = vadd.f32 %v5180_v7, %v5165_v61  ;;  %v5389_v12 = vpop.f32.mrb[15].mxu1  ;;  %v5393_v27 = vmul.f32 %v5137_v45, %v5379_v4  ;;  %v5408_v7 = vld [vmem:[%s6789_s7 + $0x8] sm:$0xff]   ;;  %v1150_v61 = vpop.permute.xlu1 %1149 }
 0x138   : > { %v5397_v10 = vmul.f32 %v5139_v46, %v5379_v4  ;;  %v5399_v13 = vpack.c.bf16 %v2146_v35, %v2144_v14  ;;  %v5403_v30 = vmul.f32 %v5141_v47, %v5379_v4  ;;  %v5412_v54 = vmul.f32 %v5137_v45, %v5389_v12 }
 0x139   : > { %v5416_v53 = vmul.f32 %v5139_v46, %v5389_v12  ;;  %v5418_v52 = vpack.c.bf16 %v2145_v1, %v2143_v41  ;;  %v5422_v14 = vmul.f32 %v5141_v47, %v5389_v12  ;;  %v2502_v35 = vadd.f32 %v2494_v44, %v5201_v22  ;;  %v1119_v18 = vpop.f32.mrb[8].mxu0  ;;  %v5440_v22 = vpop.permute.xlu0 %1394 }
 0x13a   : > { %6872 = vst [vmem:[#allocation34_spill] sm:$0xff] %v5399_v13  ;;  %v2508_v13 = vmax.f32 %v2500_v40, 0.0  ;;  %v2493_v50 = vmul.f32 %v5143_v48, %v5182_v9  ;;  %v2499_v45 = vadd.f32 %v5191_v15, %v5155_v55  ;;  %v2496_v46 = vmul.f32 %v5143_v48, %v5218_v38  ;;  %v1121_v40 = vpop.f32.mrb[9].mxu0 }
 0x13b   : > { %6873 = vst [vmem:[#allocation35_spill] sm:$0xff] %v5418_v52  ;;  %v2498_v1 = vmul.f32 %v5143_v48, %v5240_v11  ;;  %v2495_v47 = vmul.f32 %v5143_v48, %v5209_v31  ;;  %v2497_v41 = vmul.f32 %v5143_v48, %v5231_v0  ;;  %v5437_v44 = vadd.f32 %v1145_v60, %v1119_v18 }
 0x13c   : > { %v2510_v52 = vmax.f32 %v2502_v35, 0.0  ;;  %v2501_v15 = vadd.f32 %v2493_v50, %v5193_v16  ;;  %v2507_v55 = vmax.f32 %v2499_v45, 0.0  ;;  %v5442_v9 = vadd.f32 %v1145_v60, %v1121_v40  ;;  %4465 = vmatmul.mubr.msk.bf16.gmra.mrb[20].mxu1 %vm1320_vm2, %v5408_v7 }
 0x13d   : > { %v2504_v11 = vadd.f32 %v2496_v46, %v5222_v42  ;;  %v2506_v31 = vadd.f32 %v2498_v1, %v5245_v21  ;;  %v2503_v0 = vadd.f32 %v2495_v47, %v5216_v36  ;;  %v5451_v18 = vadd.f32 %v5269_v56, %v5437_v44  ;;  %1646 = vmatprep.mubr.bf16.mxu1 %v6871_v19  ;;  %v1125_v45 = vpop.f32.mrb[10].mxu0 }
 0x13e   : > { %v5456_v50 = vadd.f32 %v5277_v34, %v5437_v44  ;;  %v5459_v60 = vadd.f32 %v2322_v49, %v5437_v44  ;;  %v5461_v35 = vpack.c.bf16 %v2510_v52, %v2508_v13  ;;  %v5465_v46 = vadd.f32 %v5273_v62, %v5442_v9  ;;  %v1127_v49 = vpop.f32.mrb[11].mxu0 }
 0x13f   : > { %v5469_v56 = vadd.f32 %v5281_v2, %v5442_v9  ;;  %v5473_v1 = vadd.f32 %v5339_v63, %v5442_v9  ;;  %v2509_v34 = vmax.f32 %v2501_v15, 0.0  ;;  %v5475_v47 = vadd.f32 %v1150_v61, %v1125_v45 }
 0x140   : > { %6874 = vst [vmem:[#allocation36_spill] sm:$0xff] %v5456_v50  ;;  %6875 = vst [vmem:[#allocation37_spill] sm:$0xff] %v5459_v60  ;;  %v2512_v40 = vmax.f32 %v2504_v11, 0.0  ;;  %v2514_v52 = vmax.f32 %v2506_v31, 0.0  ;;  %v2505_v13 = vadd.f32 %v2497_v41, %v5238_v8  ;;  %v5480_v62 = vadd.f32 %v1150_v61, %v1127_v49 }
 0x141   : > { %6876 = vst [vmem:[#allocation38_spill] sm:$0xff] %v5461_v35  ;;  %6877 = vst [vmem:[#allocation39_spill] sm:$0xff] %v5469_v56  ;;  %v5478_v35 = vpop.permute.xlu1 %1399  ;;  %v5482_v60 = vpack.c.bf16 %v2509_v34, %v2507_v55  ;;  %v2511_v2 = vmax.f32 %v2503_v0, 0.0  ;;  %v2690_v56 = vmul.f32 %v5143_v48, %v5258_v33  ;;  %v5488_v63 = vadd.f32 %v5297_v29, %v5475_v47  ;;  %v1155_v55 = vpop.permute.xlu0 %1154 }
 0x142   : > { %6878 = vst [vmem:[#allocation40_spill] sm:$0xff] %v5473_v1  ;;  %v5492_v11 = vadd.f32 %v5301_v32, %v5475_v47  ;;  %v5496_v31 = vadd.f32 %v5343_v5, %v5475_v47  ;;  %v5498_v61 = vpack.c.bf16 %v2514_v52, %v2512_v40  ;;  %v1131_v41 = vpop.f32.mrb[12].mxu0  ;;  %v5502_v0 = vadd.f32 %v5316_v37, %v5480_v62 }
 0x143   : > { %6879 = vst [vmem:[#allocation41_spill] sm:$0xff] %v5482_v60  ;;  %v5506_v29 = vadd.f32 %v5320_v39, %v5480_v62  ;;  %v5510_v32 = vadd.f32 %v5373_v23, %v5480_v62  ;;  %v2513_v15 = vmax.f32 %v2505_v13, 0.0  ;;  %v5512_v45 = vadd.f32 %v1155_v55, %v1131_v41  ;;  %v1133_v5 = vpop.f32.mrb[13].mxu0 }
 0x144   : > { %6880 = vst [vmem:[#allocation42_spill] sm:$0xff] %v5492_v11  ;;  %6881 = vst [vmem:[#allocation43_spill] sm:$0xff] %v5496_v31  ;;  %v5515_v34 = vadd.f32 %v2690_v56, %v5437_v44  ;;  %v2691_v49 = vmul.f32 %v5143_v48, %v5264_v43  ;;  %v2692_v37 = vmul.f32 %v5143_v48, %v5285_v20 }
 0x145   : > { %6882 = vst [vmem:[#allocation44_spill] sm:$0xff] %v5498_v61  ;;  %6883 = vst [vmem:[#allocation45_spill] sm:$0xff] %v5506_v29  ;;  %v5521_v40 = vadd.f32 %v1155_v55, %v1133_v5  ;;  %v5523_v39 = vpack.c.bf16 %v2513_v15, %v2511_v2  ;;  %v2693_v23 = vmul.f32 %v5143_v48, %v5291_v28  ;;  %v1160_v41 = vpop.permute.xlu1 %1159  ;;  %v1137_v15 = vpop.f32.mrb[14].mxu0 }
 0x146   : > { %6884 = vst [vmem:[#allocation46_spill] sm:$0xff] %v5510_v32  ;;  %6885 = vst [vmem:[#allocation47_spill] sm:$0xff] %v5515_v34  ;;  %v2694_v52 = vmul.f32 %v5143_v48, %v5332_v58  ;;  %v5531_v56 = vadd.f32 %v5349_v25, %v5512_v45  ;;  %v5535_v13 = vadd.f32 %v5353_v26, %v5512_v45  ;;  %v6912_v32 = vld [vmem:[#allocation22_spill] sm:$0xff] }
 0x147   : > { %6886 = vst [vmem:[#allocation48_spill] sm:$0xff] %v5523_v39  ;;  %v5539_v55 = vadd.f32 %v5377_v6, %v5512_v45  ;;  %v5542_v2 = vadd.f32 %v2691_v49, %v5442_v9  ;;  %v5546_v5 = vadd.f32 %v5363_v59, %v5521_v40  ;;  %v5550_v25 = vadd.f32 %v5367_v24, %v5521_v40  ;;  %v1139_v49 = vpop.f32.mrb[15].mxu0 }
 0x148   : > { %6887 = vst [vmem:[#allocation49_spill] sm:$0xff] %v5535_v13  ;;  %v5554_v26 = vadd.f32 %v5383_v3, %v5521_v40  ;;  %v5557_v6 = vadd.f32 %v2692_v37, %v5475_v47  ;;  %v5559_v34 = vadd.f32 %v1160_v41, %v1137_v15  ;;  %v5565_v59 = vadd.f32 %v2694_v52, %v5512_v45 }
 0x149   : > { %6888 = vst [vmem:[#allocation50_spill] sm:$0xff] %v5539_v55  ;;  %6889 = vst [vmem:[#allocation51_spill] sm:$0xff] %v5542_v2  ;;  %v5562_v2 = vadd.f32 %v2693_v23, %v5480_v62  ;;  %v2695_v24 = vmul.f32 %v5143_v48, %v5345_v17  ;;  %v5569_v39 = vadd.f32 %v1160_v41, %v1139_v49  ;;  %v6911_v55 = vld [vmem:[#allocation15_spill] sm:$0xff] }
 0x14a   : > { %6890 = vst [vmem:[#allocation52_spill] sm:$0xff] %v5550_v25  ;;  %6891 = vst [vmem:[#allocation53_spill] sm:$0xff] %v5554_v26  ;;  %v2696_v3 = vmul.f32 %v5143_v48, %v5379_v4  ;;  %v2697_v37 = vmul.f32 %v5143_v48, %v5389_v12  ;;  %v2860_v15 = vmul.f32 %v5147_v51, %v5157_v57 }
 0x14b   : > { %6892 = vst [vmem:[#allocation54_spill] sm:$0xff] %v5557_v6  ;;  %6893 = vst [vmem:[#allocation55_spill] sm:$0xff] %v5562_v2  ;;  %v5579_v23 = vadd.f32 %v5393_v27, %v5559_v34  ;;  %v5583_v52 = vadd.f32 %v5397_v10, %v5559_v34  ;;  %v5587_v41 = vadd.f32 %v5403_v30, %v5559_v34  ;;  %v6905_v2 = vld [vmem:[#allocation16_spill] sm:$0xff]  ;;  %v6906_v6 = vld [vmem:[#allocation11_spill] sm:$0xff] }
 0x14c   : > { %6894 = vst [vmem:[#allocation56_spill] sm:$0xff] %v5565_v59  ;;  %v5590_v49 = vadd.f32 %v2695_v24, %v5521_v40  ;;  %v5594_v48 = vadd.f32 %v5412_v54, %v5569_v39  ;;  %v5598_v59 = vadd.f32 %v5416_v53, %v5569_v39  ;;  %v5602_v27 = vadd.f32 %v5422_v14, %v5569_v39  ;;  %v6904_v24 = vld [vmem:[#allocation18_spill] sm:$0xff]  ;;  %v6907_v53 = vld [vmem:[#allocation17_spill] sm:$0xff] }
 0x14d   : > { %6895 = vst [vmem:[#allocation57_spill] sm:$0xff] %v5579_v23  ;;  %6896 = vst [vmem:[#allocation58_spill] sm:$0xff] %v5583_v52  ;;  %v5605_v10 = vadd.f32 %v2696_v3, %v5559_v34  ;;  %v5608_v30 = vadd.f32 %v2697_v37, %v5569_v39  ;;  %v2868_v54 = vadd.f32 %v2860_v15, %v6905_v2 }
 0x14e   : > { %6897 = vst [vmem:[#allocation59_spill] sm:$0xff] %v5587_v41  ;;  %6898 = vst [vmem:[#allocation60_spill] sm:$0xff] %v5590_v49  ;;  %v2862_v49 = vmul.f32 %v5147_v51, %v6904_v24  ;;  %v2859_v61 = vmul.f32 %v5147_v51, %v6906_v6  ;;  %v2861_v60 = vmul.f32 %v5147_v51, %v6907_v53 }
 0x14f   : > { %6899 = vst [vmem:[#allocation61_spill] sm:$0xff] %v5594_v48  ;;  %6900 = vst [vmem:[#allocation62_spill] sm:$0xff] %v5598_v59  ;;  %v2864_v14 = vmul.f32 %v5147_v51, %v5218_v38  ;;  %v2876_v26 = vmax.f32 %v2868_v54, 0.0  ;;  %v2865_v31 = vmul.f32 %v5147_v51, %v6912_v32 }
 0x150   : > { %6901 = vst [vmem:[#allocation63_spill] sm:$0xff] %v5602_v27  ;;  %6902 = vst [vmem:[#allocation64_spill] sm:$0xff] %v5605_v10  ;;  %v6908_v27 = vld [vmem:[#allocation24_spill] sm:$0xff]  ;;  %v2867_v15 = vadd.f32 %v2859_v61, %v6911_v55  ;;  %v2869_v1 = vadd.f32 %v2861_v60, %v5193_v16 }
 0x151   : > { %6903 = vst [vmem:[#allocation65_spill] sm:$0xff] %v5608_v30  ;;  %v2866_v3 = vmul.f32 %v5147_v51, %v6908_v27  ;;  %v6909_v10 = vld [vmem:[#allocation20_spill] sm:$0xff]  ;;  %v6910_v30 = vld [vmem:[#allocation19_spill] sm:$0xff]  ;;  %v2872_v59 = vadd.f32 %v2864_v14, %v5222_v42  ;;  %v2873_v11 = vadd.f32 %v2865_v31, %v5238_v8  ;;  %v3060_v31 = vmul.f32 %v5147_v51, %v5285_v20 }
 0x152   : > { %v2863_v37 = vmul.f32 %v5147_v51, %v6909_v10  ;;  %v2870_v41 = vadd.f32 %v2862_v49, %v6910_v30  ;;  %v2875_v29 = vmax.f32 %v2867_v15, 0.0  ;;  %v3058_v49 = vmul.f32 %v5147_v51, %v5258_v33 }
 0x153   : > { %v2874_v52 = vadd.f32 %v2866_v3, %v5245_v21  ;;  %v2877_v54 = vmax.f32 %v2869_v1, 0.0  ;;  %v2880_v61 = vmax.f32 %v2872_v59, 0.0  ;;  %v2881_v60 = vmax.f32 %v2873_v11, 0.0 }
 0x154   : > { %v2871_v25 = vadd.f32 %v2863_v37, %v5216_v36  ;;  %v2878_v13 = vmax.f32 %v2870_v41, 0.0  ;;  %v5637_v14 = vadd.f32 %v3058_v49, %v5437_v44  ;;  %v3059_v3 = vmul.f32 %v5147_v51, %v5264_v43  ;;  %v6923_v49 = vld [vmem:[#allocation12_spill] sm:$0xff] }
 0x155   : > { %v2882_v50 = vmax.f32 %v2874_v52, 0.0  ;;  %v5641_v41 = vpack.c.bf16 %v2877_v54, %v2875_v29  ;;  %v3061_v1 = vmul.f32 %v5147_v51, %v5291_v28  ;;  %v3063_v29 = vmul.f32 %v5147_v51, %v5345_v17 }
 0x156   : > { %v2879_v48 = vmax.f32 %v2871_v25, 0.0  ;;  %v5634_v23 = vpack.c.bf16 %v2878_v13, %v2876_v26  ;;  %6914 = vst [vmem:[#allocation16_spill] sm:$0xff] %v5637_v14  ;;  %v5652_v11 = vadd.f32 %v3059_v3, %v5442_v9  ;;  %v3062_v13 = vmul.f32 %v5147_v51, %v5332_v58 }
 0x157   : > { %6915 = vst [vmem:[#allocation11_spill] sm:$0xff] %v5641_v41  ;;  %v5643_v37 = vpack.c.bf16 %v2882_v50, %v2880_v61  ;;  %v5659_v50 = vadd.f32 %v3060_v31, %v5475_v47  ;;  %v5662_v26 = vadd.f32 %v3061_v1, %v5480_v62  ;;  %v3064_v59 = vmul.f32 %v5147_v51, %v5379_v4 }
 0x158   : > { %6913 = vst [vmem:[#allocation18_spill] sm:$0xff] %v5634_v23  ;;  %v5649_v25 = vpack.c.bf16 %v2881_v60, %v2879_v48  ;;  %6918 = vst [vmem:[#allocation20_spill] sm:$0xff] %v5652_v11  ;;  %v3065_v52 = vmul.f32 %v5147_v51, %v5389_v12  ;;  %v5669_v48 = vadd.f32 %v3062_v13, %v5512_v45 }
 0x159   : > { %6916 = vst [vmem:[#allocation17_spill] sm:$0xff] %v5643_v37  ;;  %6919 = vst [vmem:[#allocation19_spill] sm:$0xff] %v5659_v50  ;;  %v5672_v15 = vadd.f32 %v3063_v29, %v5521_v40  ;;  %v3228_v54 = vmul.f32 %v6923_v49, %v5157_v57  ;;  %v3230_v61 = vmul.f32 %v6923_v49, %v6904_v24 }
 0x15a   : > { %6917 = vst [vmem:[#allocation24_spill] sm:$0xff] %v5649_v25  ;;  %6920 = vst [vmem:[#allocation15_spill] sm:$0xff] %v5662_v26  ;;  %v5679_v60 = vadd.f32 %v3064_v59, %v5559_v34  ;;  %v5682_v3 = vadd.f32 %v3065_v52, %v5569_v39  ;;  %v3227_v51 = vmul.f32 %v6923_v49, %v6906_v6 }
 0x15b   : > { %6921 = vst [vmem:[#allocation22_spill] sm:$0xff] %v5669_v48  ;;  %6922 = vst [vmem:[#allocation66_spill] sm:$0xff] %v5672_v15  ;;  %v3229_v31 = vmul.f32 %v6923_v49, %v6907_v53  ;;  %v3236_v1 = vadd.f32 %v3228_v54, %v6905_v2  ;;  %v3238_v13 = vadd.f32 %v3230_v61, %v6910_v30 }
 0x15c   : > { %6924 = vst [vmem:[#allocation12_spill] sm:$0xff] %v5679_v60  ;;  %6925 = vst [vmem:[#allocation67_spill] sm:$0xff] %v5682_v3  ;;  %v3232_v29 = vmul.f32 %v6923_v49, %v5218_v38  ;;  %v3234_v59 = vmul.f32 %v6923_v49, %v6908_v27  ;;  %v3235_v60 = vadd.f32 %v3227_v51, %v6911_v55 }
 0x15d   : > { %v3237_v52 = vadd.f32 %v3229_v31, %v5193_v16  ;;  %v3231_v3 = vmul.f32 %v6923_v49, %v6909_v10  ;;  %v3233_v15 = vmul.f32 %v6923_v49, %v6912_v32  ;;  %v3244_v48 = vmax.f32 %v3236_v1, 0.0 }
 0x15e   : > { %v3246_v54 = vmax.f32 %v3238_v13, 0.0  ;;  %v3240_v61 = vadd.f32 %v3232_v29, %v5222_v42  ;;  %v3242_v26 = vadd.f32 %v3234_v59, %v5245_v21  ;;  %v3243_v50 = vmax.f32 %v3235_v60, 0.0 }
 0x15f   : > { %v3245_v11 = vmax.f32 %v3237_v52, 0.0  ;;  %v3239_v14 = vadd.f32 %v3231_v3, %v5216_v36  ;;  %v3241_v51 = vadd.f32 %v3233_v15, %v5238_v8  ;;  %v3426_v41 = vmul.f32 %v6923_v49, %v5258_v33 }
 0x160   : > { %v5704_v25 = vpack.c.bf16 %v3246_v54, %v3244_v48  ;;  %v3248_v31 = vmax.f32 %v3240_v61, 0.0  ;;  %v3250_v37 = vmax.f32 %v3242_v26, 0.0  ;;  %v3427_v29 = vmul.f32 %v6923_v49, %v5264_v43 }
 0x161   : > { %v5708_v23 = vpack.c.bf16 %v3245_v11, %v3243_v50  ;;  %v3247_v1 = vmax.f32 %v3239_v14, 0.0  ;;  %v3249_v13 = vmax.f32 %v3241_v51, 0.0  ;;  %v5715_v3 = vadd.f32 %v3426_v41, %v5437_v44  ;;  %v6936_v51 = vld [vmem:[#allocation13_spill] sm:$0xff] }
 0x162   : > { %6926 = vst [vmem:[#allocation68_spill] sm:$0xff] %v5704_v25  ;;  %v5712_v60 = vpack.c.bf16 %v3250_v37, %v3248_v31  ;;  %v3428_v48 = vmul.f32 %v6923_v49, %v5285_v20  ;;  %v3429_v26 = vmul.f32 %v6923_v49, %v5291_v28  ;;  %v5724_v11 = vadd.f32 %v3427_v29, %v5442_v9 }
 0x163   : > { %6927 = vst [vmem:[#allocation69_spill] sm:$0xff] %v5708_v23  ;;  %6929 = vst [vmem:[#allocation71_spill] sm:$0xff] %v5715_v3  ;;  %v5721_v15 = vpack.c.bf16 %v3249_v13, %v3247_v1  ;;  %v3430_v14 = vmul.f32 %v6923_v49, %v5332_v58  ;;  %v3431_v37 = vmul.f32 %v6923_v49, %v5345_v17 }
 0x164   : > { %6928 = vst [vmem:[#allocation70_spill] sm:$0xff] %v5712_v60  ;;  %6931 = vst [vmem:[#allocation73_spill] sm:$0xff] %v5724_v11  ;;  %v5731_v41 = vadd.f32 %v3428_v48, %v5475_v47  ;;  %v5734_v50 = vadd.f32 %v3429_v26, %v5480_v62  ;;  %v3432_v59 = vmul.f32 %v6923_v49, %v5379_v4 }
 0x165   : > { %6930 = vst [vmem:[#allocation72_spill] sm:$0xff] %v5721_v15  ;;  %v3433_v52 = vmul.f32 %v6923_v49, %v5389_v12  ;;  %v5741_v54 = vadd.f32 %v3430_v14, %v5512_v45  ;;  %v5744_v61 = vadd.f32 %v3431_v37, %v5521_v40  ;;  %v3596_v31 = vmul.f32 %v6936_v51, %v5157_v57 }
 0x166   : > { %6932 = vst [vmem:[#allocation74_spill] sm:$0xff] %v5731_v41  ;;  %6933 = vst [vmem:[#allocation75_spill] sm:$0xff] %v5734_v50  ;;  %v3598_v1 = vmul.f32 %v6936_v51, %v6904_v24  ;;  %v5751_v13 = vadd.f32 %v3432_v59, %v5559_v34  ;;  %v3595_v49 = vmul.f32 %v6936_v51, %v6906_v6 }
 0x167   : > { %6934 = vst [vmem:[#allocation76_spill] sm:$0xff] %v5741_v54  ;;  %6935 = vst [vmem:[#allocation77_spill] sm:$0xff] %v5744_v61  ;;  %v5754_v29 = vadd.f32 %v3433_v52, %v5569_v39  ;;  %v3597_v48 = vmul.f32 %v6936_v51, %v6907_v53  ;;  %v3604_v26 = vadd.f32 %v3596_v31, %v6905_v2 }
 0x168   : > { %6937 = vst [vmem:[#allocation13_spill] sm:$0xff] %v5751_v13  ;;  %v3606_v14 = vadd.f32 %v3598_v1, %v6910_v30  ;;  %v3600_v37 = vmul.f32 %v6936_v51, %v5218_v38  ;;  %v3602_v59 = vmul.f32 %v6936_v51, %v6908_v27  ;;  %v3603_v13 = vadd.f32 %v3595_v49, %v6911_v55 }
 0x169   : > { %6938 = vst [vmem:[#allocation78_spill] sm:$0xff] %v5754_v29  ;;  %v3605_v52 = vadd.f32 %v3597_v48, %v5193_v16  ;;  %v3599_v29 = vmul.f32 %v6936_v51, %v6909_v10  ;;  %v3601_v61 = vmul.f32 %v6936_v51, %v6912_v32  ;;  %v3612_v54 = vmax.f32 %v3604_v26, 0.0 }
 0x16a   : > { %v3614_v31 = vmax.f32 %v3606_v14, 0.0  ;;  %v3608_v1 = vadd.f32 %v3600_v37, %v5222_v42  ;;  %v3610_v50 = vadd.f32 %v3602_v59, %v5245_v21  ;;  %v3611_v41 = vmax.f32 %v3603_v13, 0.0 }
 0x16b   : > { %v3613_v11 = vmax.f32 %v3605_v52, 0.0  ;;  %v3607_v3 = vadd.f32 %v3599_v29, %v5216_v36  ;;  %v3609_v49 = vadd.f32 %v3601_v61, %v5238_v8  ;;  %v3794_v23 = vmul.f32 %v6936_v51, %v5258_v33 }
 0x16c   : > { %v5776_v15 = vpack.c.bf16 %v3614_v31, %v3612_v54  ;;  %v3616_v48 = vmax.f32 %v3608_v1, 0.0  ;;  %v3618_v60 = vmax.f32 %v3610_v50, 0.0  ;;  %v3795_v37 = vmul.f32 %v6936_v51, %v5264_v43 }
 0x16d   : > { %v5780_v25 = vpack.c.bf16 %v3613_v11, %v3611_v41  ;;  %v3615_v26 = vmax.f32 %v3607_v3, 0.0  ;;  %v3617_v14 = vmax.f32 %v3609_v49, 0.0  ;;  %v5787_v29 = vadd.f32 %v3794_v23, %v5437_v44  ;;  %v6939_v49 = vld [vmem:[#allocation14_spill] sm:$0xff] }
 0x16e   : > { %v5784_v13 = vpack.c.bf16 %v3618_v60, %v3616_v48  ;;  %v3796_v54 = vmul.f32 %v6936_v51, %v5285_v20  ;;  %v3797_v50 = vmul.f32 %v6936_v51, %v5291_v28  ;;  %v5796_v11 = vadd.f32 %v3795_v37, %v5442_v9 }
 0x16f   : > { %v5793_v61 = vpack.c.bf16 %v3617_v14, %v3615_v26  ;;  %v3798_v3 = vmul.f32 %v6936_v51, %v5332_v58  ;;  %v3799_v60 = vmul.f32 %v6936_v51, %v5345_v17  ;;  %v3800_v59 = vmul.f32 %v6936_v51, %v5379_v4 }
 0x170   : > { %v5803_v23 = vadd.f32 %v3796_v54, %v5475_v47  ;;  %v5806_v41 = vadd.f32 %v3797_v50, %v5480_v62  ;;  %v3801_v52 = vmul.f32 %v6936_v51, %v5389_v12  ;;  %v3964_v48 = vmul.f32 %v6939_v49, %v5157_v57 }
 0x171   : > { %v5813_v31 = vadd.f32 %v3798_v3, %v5512_v45  ;;  %v5816_v1 = vadd.f32 %v3799_v60, %v5521_v40  ;;  %v3966_v26 = vmul.f32 %v6939_v49, %v6904_v24  ;;  %v5823_v14 = vadd.f32 %v3800_v59, %v5559_v34 }
 0x172   : > { %v5826_v37 = vadd.f32 %v3801_v52, %v5569_v39  ;;  %v3963_v51 = vmul.f32 %v6939_v49, %v6906_v6  ;;  %v3965_v54 = vmul.f32 %v6939_v49, %v6907_v53  ;;  %v3972_v50 = vadd.f32 %v3964_v48, %v6905_v2 }
 0x173   : > { %v3974_v3 = vadd.f32 %v3966_v26, %v6910_v30  ;;  %v3968_v57 = vmul.f32 %v6939_v49, %v5218_v38  ;;  %v3970_v24 = vmul.f32 %v6939_v49, %v6908_v27  ;;  %v3967_v6 = vmul.f32 %v6939_v49, %v6909_v10 }
 0x174   : > { %6940 = vst [vmem:[#allocation14_spill] sm:$0xff] %v5826_v37  ;;  %v3971_v60 = vadd.f32 %v3963_v51, %v6911_v55  ;;  %v3973_v59 = vadd.f32 %v3965_v54, %v5193_v16  ;;  %v3969_v53 = vmul.f32 %v6939_v49, %v6912_v32  ;;  %v3980_v52 = vmax.f32 %v3972_v50, 0.0 }
 0x175   : > { %v3982_v2 = vmax.f32 %v3974_v3, 0.0  ;;  %v3976_v30 = vadd.f32 %v3968_v57, %v5222_v42  ;;  %v3978_v48 = vadd.f32 %v3970_v24, %v5245_v21  ;;  %v3975_v27 = vadd.f32 %v3967_v6, %v5216_v36 }
 0x176   : > { %v3979_v38 = vmax.f32 %v3971_v60, 0.0  ;;  %v3981_v26 = vmax.f32 %v3973_v59, 0.0  ;;  %v3977_v55 = vadd.f32 %v3969_v53, %v5238_v8  ;;  %v4156_v10 = vmul.f32 %v6939_v49, %v5258_v33  ;;  %v6953_v53 = vld [vmem:[#allocation25_spill] sm:$0xff] }
 0x177   : > { %v5848_v51 = vpack.c.bf16 %v3982_v2, %v3980_v52  ;;  %v3984_v16 = vmax.f32 %v3976_v30, 0.0  ;;  %v3986_v54 = vmax.f32 %v3978_v48, 0.0  ;;  %v3983_v50 = vmax.f32 %v3975_v27, 0.0 }
 0x178   : > { %v5852_v32 = vpack.c.bf16 %v3981_v26, %v3979_v38  ;;  %v3985_v3 = vmax.f32 %v3977_v55, 0.0  ;;  %v4157_v42 = vmul.f32 %v6939_v49, %v5264_v43  ;;  %v5859_v36 = vadd.f32 %v4156_v10, %v5437_v44 }
 0x179   : > { %6941 = vst [vmem:[#allocation79_spill] sm:$0xff] %v5848_v51  ;;  %v5856_v21 = vpack.c.bf16 %v3986_v54, %v3984_v16  ;;  %v4158_v8 = vmul.f32 %v6939_v49, %v5285_v20  ;;  %v4159_v57 = vmul.f32 %v6939_v49, %v5291_v28  ;;  %v4160_v60 = vmul.f32 %v6939_v49, %v5332_v58  ;;  %v6955_v54 = vld [vmem:[#allocation30_spill] sm:$0xff] }
 0x17a   : > { %6942 = vst [vmem:[#allocation80_spill] sm:$0xff] %v5852_v32  ;;  %6944 = vst [vmem:[#allocation82_spill] sm:$0xff] %v5859_v36  ;;  %v5865_v24 = vpack.c.bf16 %v3985_v3, %v3983_v50  ;;  %v5868_v33 = vadd.f32 %v4157_v42, %v5442_v9  ;;  %v4161_v43 = vmul.f32 %v6939_v49, %v5345_v17 }
 0x17b   : > { %6943 = vst [vmem:[#allocation81_spill] sm:$0xff] %v5856_v21  ;;  %v5875_v44 = vadd.f32 %v4158_v8, %v5475_v47  ;;  %v5878_v59 = vadd.f32 %v4159_v57, %v5480_v62  ;;  %v4162_v20 = vmul.f32 %v6939_v49, %v5379_v4  ;;  %v4163_v28 = vmul.f32 %v6939_v49, %v5389_v12  ;;  %v6956_v8 = vld [vmem:[#allocation33_spill] sm:$0xff] }
 0x17c   : > { %6945 = vst [vmem:[#allocation83_spill] sm:$0xff] %v5865_v24  ;;  %6946 = vst [vmem:[#allocation84_spill] sm:$0xff] %v5868_v33  ;;  %v5885_v9 = vadd.f32 %v4160_v60, %v5512_v45  ;;  %v5888_v58 = vadd.f32 %v4161_v43, %v5521_v40  ;;  %v666_v62 = vstv %s665_s28  ;;  %v6954_v40 = vld [vmem:[#allocation26_spill] sm:$0xff]  ;;  %s4528_s28 = sld [smem:[#allocation5 + $0x5]] }
 0x17d   : > { %6947 = vst [vmem:[#allocation85_spill] sm:$0xff] %v5875_v44  ;;  %6948 = vst [vmem:[#allocation86_spill] sm:$0xff] %v5878_v59  ;;  %v5891_v17 = vadd.f32 %v4162_v20, %v5559_v34  ;;  %v5894_v47 = vadd.f32 %v4163_v28, %v5569_v39  ;;  %4617 = vrcp.f32 %v666_v62 }
 0x17e   : > { %6949 = vst [vmem:[#allocation87_spill] sm:$0xff] %v5885_v9  ;;  %6950 = vst [vmem:[#allocation88_spill] sm:$0xff] %v5888_v58 }
 0x17f   : > { %6951 = vst [vmem:[#allocation89_spill] sm:$0xff] %v5891_v17  ;;  %6952 = vst [vmem:[#allocation90_spill] sm:$0xff] %v5894_v47 }
 0x187   : > { %v4618_v6 = vpop.eup %4617 }
 0x188   : > { %4573 = vpush %v4618_v6 }
 0x1b9   : > { %s4574_s2 = spop %4573 }
 0x207   : > { %v1361_v4 = vpop.f32.mrb[16].mxu1 }
 0x208   : > { %v1362_v12 = vadd.f32 %v1361_v4, %v6953_v53  ;;  %v1363_v49 = vpop.f32.mrb[17].mxu1 }
 0x209   : > { %v1364_v45 = vadd.f32 %v1363_v49, %v6953_v53  ;;  %v1365_v52 = vpop.f32.mrb[18].mxu1  ;;  %v5907_v49 = vld [vmem:[%s6791_s9] sm:$0xff]  }
 0x20a   : > { %v1366_v2 = vadd.f32 %v1365_v52, %v6954_v40  ;;  %v1367_v30 = vpop.f32.mrb[19].mxu1  ;;  %v1380_v48 = vmax.f32 %v1362_v12, 0.0  ;;  %v6958_v52 = vld [vmem:[#allocation21_spill] sm:$0xff] }
 0x20b   : > { %v1368_v34 = vadd.f32 %v1367_v30, %v6954_v40  ;;  %v1381_v38 = vmax.f32 %v1364_v45, 0.0  ;;  %v6957_v45 = vld [vmem:[#allocation23_spill] sm:$0xff]  ;;  %v5918_v30 = vld [vmem:[%s6791_s9 + $0x8] sm:$0xff]  }
 0x20c   : > { %v1382_v39 = vmax.f32 %v1366_v2, 0.0  ;;  %v6959_v2 = vld [vmem:[#allocation27_spill] sm:$0xff] }
 0x20d   : > { %v1383_v26 = vmax.f32 %v1368_v34, 0.0  ;;  %v6960_v34 = vld [vmem:[#allocation28_spill] sm:$0xff] }
 0x20e   : > { %v1388_v27 = vpack.c.bf16 %v1382_v39, %v1380_v48  ;;  %v5927_v48 = vld [vmem:[%s6791_s9 + $0x10] ss:$0 sps:$4 sm:$0x11]  }
 0x20f   : > { %v1389_v55 = vpack.c.bf16 %v1383_v26, %v1381_v38  ;;  %v1371_v16 = vpop.f32.mrb[20].mxu1  ;;  %v6961_v39 = vld [vmem:[#allocation31_spill] sm:$0xff]  ;;  %v5938_v38 = vpop.permute.xlu0 %1404  ;;  %v6962_v26 = vld [vmem:[#allocation9_spill] sm:$0xff] }
 0x210   : > { %v1372_v10 = vadd.f32 %v1371_v16, %v6955_v54  ;;  %v1373_v50 = vpop.f32.mrb[21].mxu1  ;;  %v6963_v16 = vld [vmem:[#allocation10_spill] sm:$0xff] }
 0x211   : > { %v1374_v3 = vadd.f32 %v1373_v50, %v6955_v54  ;;  %v1375_v42 = vpop.f32.mrb[22].mxu1  ;;  %1439 = vmatprep.subr.bf16.mxu0 %v1389_v55 }
 0x212   : > { %v1376_v57 = vadd.f32 %v1375_v42, %v6956_v8  ;;  %v1377_v60 = vpop.f32.mrb[23].mxu1  ;;  %1440 = vmatpush1.bf16.msra.mxu0 %v1388_v27  ;;  %v1384_v20 = vmax.f32 %v1372_v10, 0.0  ;;  %v638_v27 = vrot.slane %v6962_v26, 4  ;;  %v645_v10 = vrot.slane %v6963_v16, 4 }
 0x213   : > { %v1378_v43 = vadd.f32 %v1377_v60, %v6956_v8  ;;  %v1385_v62 = vmax.f32 %v1374_v3, 0.0 }
 0x214   : > { %v1386_v28 = vmax.f32 %v1376_v57, 0.0 }
 0x215   : > { %v1387_v6 = vmax.f32 %v1378_v43, 0.0 }
 0x216   : > { %v1390_v4 = vpack.c.bf16 %v1386_v28, %v1384_v20  ;;  %v639_v20 = vadd.f32 %v638_v27, %v6962_v26  ;;  %v5947_v28 = vpop.permute.xlu0 %1580  ;;  %v5954_v26 = vpop.permute.xlu1 %1409 }
 0x217   : > { %v1391_v12 = vpack.c.bf16 %v1387_v6, %v1385_v62 }
 0x219   : > { %1441 = vmatprep.subr.bf16.mxu0 %v1391_v12 }
 0x21a   : > { %1442 = vmatpush1.bf16.msra.mxu0 %v1390_v4  ;;  %v646_v4 = vadd.f32 %v645_v10, %v6963_v16 }
 0x21b   : > { %1783 = vmatprep.subr.bf16.mxu0 %v6957_v45 }
 0x21d   : > { %4469 = vmatmul.mubr.msk.bf16.vlgmr.msra.gmra.mrb[16].mxu0 %vm1320_vm2, %v5907_v49 }
 0x21e   : > { %1784 = vmatpush1.bf16.msra.mxu0 %v6958_v52  ;;  %1481 = vmatprep.mubr.bf16.mxu0 %v6871_v19 }
 0x21f   : > { %1785 = vmatprep.subr.bf16.mxu0 %v6959_v2 }
 0x222   : > { %1786 = vmatpush1.bf16.msra.mxu0 %v6960_v34 }
 0x225   : > { %4470 = vmatmul.mubr.msk.bf16.gmra.mrb[20].mxu0 %vm1320_vm2, %v5918_v30 }
 0x226   : > { %1491 = vmatprep.mubr.bf16.mxu0 %v6871_v19 }
 0x22d   : > { %4471 = vmatmul.mubr.msk.bf16.gmra.mrb[24].mxu0 %vm1320_vm2, %v5927_v48 }
 0x22e   : > { %1815 = vmatprep.mubr.bf16.mxu0 %v6871_v19 }
 0x235   : > { %4481 = vmatmul.mubr.msk.bf16.vlgmr.msra.gmra.mrb[28].mxu0 %vm1320_vm2, %v6961_v39 }
 0x236   : > { %1825 = vmatprep.mubr.bf16.mxu0 %v6871_v19 }
 0x23d   : > { %4482 = vmatmul.mubr.msk.bf16.gmra.mrb[32].mxu0 %vm1320_vm2, %v5408_v7 }
 0x23e   : > { %2022 = vmatprep.mubr.bf16.mxu0 %v6871_v19 }
 0x2f0   : > { %v1473_v55 = vpop.f32.mrb[16].mxu0 }
 0x2f1   : > { %v1474_v50 = vadd.f32 %v1473_v55, %v5440_v22  ;;  %v1475_v3 = vpop.f32.mrb[17].mxu0 }
 0x2f2   : > { %v1476_v42 = vadd.f32 %v1475_v3, %v5440_v22  ;;  %v1477_v57 = vpop.f32.mrb[18].mxu0 }
 0x2f3   : > { %v1558_v60 = vadd.f32 %v5451_v18, %v1474_v50  ;;  %v1478_v43 = vadd.f32 %v1477_v57, %v5478_v35  ;;  %v1479_v7 = vpop.f32.mrb[19].mxu0  ;;  %v640_v18 = vrot.slane %v639_v20, 2  ;;  %v647_v50 = vrot.slane %v646_v4, 2 }
 0x2f4   : > { %v1559_v62 = vadd.f32 %v5465_v46, %v1476_v42  ;;  %v1480_v6 = vadd.f32 %v1479_v7, %v5478_v35  ;;  %v5957_v42 = vpop.permute.xlu0 %1590 }
 0x2f5   : > { %v1560_v12 = vadd.f32 %v5488_v63, %v1478_v43  ;;  %v1566_v52 = vmax.f32 %v1558_v60, 0.0  ;;  %v641_v43 = vadd.f32 %v640_v18, %v639_v20 }
 0x2f6   : > { %v1561_v45 = vadd.f32 %v5502_v0, %v1480_v6  ;;  %v1567_v34 = vmax.f32 %v1559_v62, 0.0  ;;  %v648_v6 = vadd.f32 %v647_v50, %v646_v4  ;;  %v5970_v50 = vstv %s4574_s2  ;;  %s4492_s2 = sld [smem:[#allocation5 + $0x2]] }
 0x2f7   : > { %v1568_v2 = vmax.f32 %v1560_v12, 0.0  ;;  %v6964_v12 = vld [vmem:[#allocation57_spill] sm:$0xff] }
 0x2f8   : > { %v1569_v39 = vmax.f32 %v1561_v45, 0.0  ;;  %v1483_v55 = vpop.f32.mrb[20].mxu0  ;;  %v649_v18 = vrot.slane %v648_v6, 1 }
 0x2f9   : > { %v1574_v27 = vpack.c.bf16 %v1568_v2, %v1566_v52  ;;  %v1484_v46 = vadd.f32 %v1483_v55, %v5938_v38  ;;  %v1485_v3 = vpop.f32.mrb[21].mxu0  ;;  %v6965_v52 = vld [vmem:[#allocation61_spill] sm:$0xff] }
 0x2fa   : > { %v1486_v16 = vadd.f32 %v1485_v3, %v5938_v38  ;;  %v1487_v63 = vpop.f32.mrb[22].mxu0  ;;  %v1575_v10 = vpack.c.bf16 %v1569_v39, %v1567_v34  ;;  %v642_v34 = vrot.slane %v641_v43, 1 }
 0x2fb   : > { %v1562_v0 = vadd.f32 %v5531_v56, %v1484_v46  ;;  %v1488_v57 = vadd.f32 %v1487_v63, %v5954_v26  ;;  %v1489_v60 = vpop.f32.mrb[23].mxu0  ;;  %v5966_v56 = vpop.permute.xlu0 %1414 }
 0x2fc   : > { %v1563_v7 = vadd.f32 %v5546_v5, %v1486_v16  ;;  %v1490_v62 = vadd.f32 %v1489_v60, %v5954_v26  ;;  %1614 = vmatprep.subr.bf16.mxu1 %v1575_v10  ;;  %v5972_v60 = vadd.f32 %v642_v34, %v641_v43 }
 0x2fd   : > { %v1564_v45 = vadd.f32 %v6964_v12, %v1488_v57  ;;  %1615 = vmatpush1.bf16.msra.mxu1 %v1574_v27  ;;  %v1570_v55 = vmax.f32 %v1562_v0, 0.0  ;;  %v5979_v12 = vadd.f32 %v649_v18, %v648_v6 }
 0x2fe   : > { %v1565_v2 = vadd.f32 %v6965_v52, %v1490_v62  ;;  %v1571_v39 = vmax.f32 %v1563_v7, 0.0  ;;  %v5977_v7 = vld [vmem:[%s6796_s14] sm:$0xff]   ;;  %4619 = vrsqrt.f32 %v5972_v60  ;;  %vm653_vm3 = vcmp.eq.f32.partialorder %v5972_v60, inf }
 0x2ff   : > { %v1572_v3 = vmax.f32 %v1564_v45, 0.0  ;;  %4621 = vrsqrt.f32 %v5979_v12  ;;  %vm660_vm4 = vcmp.eq.f32.partialorder %v5979_v12, inf  ;;  %vm655_vm5 = vcmp.eq.f32.partialorder %v5972_v60, 0.0 }
 0x300   : > { %v1573_v46 = vmax.f32 %v1565_v2, 0.0  ;;  %v1493_v20 = vpop.f32.mrb[24].mxu0  ;;  %vm662_vm6 = vcmp.eq.f32.partialorder %v5979_v12, 0.0 }
 0x301   : > { %v1576_v5 = vpack.c.bf16 %v1572_v3, %v1570_v55  ;;  %v1494_v16 = vadd.f32 %v1493_v20, %v5966_v56  ;;  %v1495_v63 = vpop.f32.mrb[25].mxu0 }
 0x302   : > { %v1496_v4 = vadd.f32 %v1495_v63, %v5966_v56  ;;  %v1577_v27 = vpack.c.bf16 %v1573_v46, %v1571_v39  ;;  %v1497_v10 = vpop.f32.mrb[26].mxu0 }
 0x303   : > { %v1500_v0 = vsub.f32 0.0, %v1494_v16  ;;  %v1498_v57 = vpop.f32.mrb[27].mxu0 }
 0x304   : > { %v1501_v62 = vsub.f32 0.0, %v1496_v4  ;;  %1616 = vmatprep.subr.bf16.mxu1 %v1577_v27  ;;  %v6001_v4 = vld [vmem:[%s6796_s14 + $0x8] sm:$0xff]  }
 0x305   : > { %1617 = vmatpush1.bf16.msra.mxu1 %v1576_v5  ;;  %v5982_v45 = vmul.f32 %v5970_v50, %v1500_v0 }
 0x306   : > { %v5985_v52 = vmul.f32 %v5970_v50, %v1501_v62 }
 0x307   : > { %v1505_v2 = vand.u32 2147483647, %v5982_v45  ;;  %vm1515_vm7 = vcmp.le.f32.partialorder %v5982_v45, 0.0 }
 0x308   : > { %4474 = vmatmul.mubr.msk.bf16.vlgmr.msra.gmra.mrb[24].mxu1 %vm1320_vm2, %v5977_v7  ;;  %v1817_v43 = vpop.f32.mrb[28].mxu0  ;;  %v1506_v55 = vand.u32 2147483647, %v5985_v52  ;;  %vm1516_vm8 = vcmp.le.f32.partialorder %v5985_v52, 0.0 }
 0x309   : > { %v1818_v6 = vadd.f32 %v1817_v43, %v6953_v53  ;;  %v1819_v3 = vpop.f32.mrb[29].mxu0  ;;  %1656 = vmatprep.mubr.bf16.mxu1 %v6871_v19  ;;  %v1507_v34 = vsub.f32 0.0, %v1505_v2 }
 0x30a   : > { %v1820_v39 = vadd.f32 %v1819_v3, %v6953_v53  ;;  %v1821_v46 = vpop.f32.mrb[30].mxu0  ;;  %v1508_v20 = vsub.f32 0.0, %v1506_v55 }
 0x30b   : > { %v1822_v18 = vadd.f32 %v1821_v46, %v6954_v40  ;;  %v1823_v5 = vpop.f32.mrb[31].mxu0  ;;  %v1509_v16 = vmul.f32 1.442695, %v1507_v34  ;;  %v1836_v10 = vmax.f32 %v1818_v6, 0.0  ;;  %v4620_v46 = vpop.eup %4619 }
 0x30c   : > { %v1824_v63 = vadd.f32 %v1823_v5, %v6954_v40  ;;  %v1511_v27 = vmul.f32 1.442695, %v1508_v20  ;;  %v1837_v57 = vmax.f32 %v1820_v39, 0.0  ;;  %v4622_v39 = vpop.eup %4621 }
 0x30d   : > { %v1838_v0 = vmax.f32 %v1822_v18, 0.0  ;;  %4623 = vpow2.f32 %v1509_v16 }
 0x30e   : > { %v1839_v62 = vmax.f32 %v1824_v63, 0.0  ;;  %4625 = vpow2.f32 %v1511_v27  ;;  %v652_v63 = vmul.f32 %v4620_v46, %v5972_v60 }
 0x30f   : > { %v6003_v2 = vpack.c.bf16 %v1838_v0, %v1836_v10  ;;  %v659_v0 = vmul.f32 %v4622_v39, %v5979_v12  ;;  %v663_v39 = vand.u32 2147483648, %v5979_v12 }
 0x310   : > { %v6005_v43 = vpack.c.bf16 %v1839_v62, %v1837_v57  ;;  %4475 = vmatmul.mubr.msk.bf16.gmra.mrb[28].mxu1 %vm1320_vm2, %v6001_v4  ;;  %v1827_v55 = vpop.f32.mrb[32].mxu0 }
 0x311   : > { %v1828_v3 = vadd.f32 %v1827_v55, %v6955_v54  ;;  %v1829_v34 = vpop.f32.mrb[33].mxu0  ;;  %1719 = vmatprep.mubr.bf16.mxu1 %v6871_v19 }
 0x312   : > { %v1830_v6 = vadd.f32 %v1829_v34, %v6955_v54  ;;  %v1831_v20 = vpop.f32.mrb[34].mxu0 }
 0x313   : > { %v1832_v18 = vadd.f32 %v1831_v20, %v6956_v8  ;;  %v1833_v5 = vpop.f32.mrb[35].mxu0  ;;  %v1840_v27 = vmax.f32 %v1828_v3, 0.0  ;;  %v654_v3 = vsel %vm653_vm3, %v5972_v60, %v652_v63 }
 0x314   : > { %v1834_v16 = vadd.f32 %v1833_v5, %v6956_v8  ;;  %v1841_v57 = vmax.f32 %v1830_v6, 0.0  ;;  %v656_v5 = vand.u32 2147483648, %v5972_v60 }
 0x315   : > { %v1842_v10 = vmax.f32 %v1832_v18, 0.0  ;;  %v661_v18 = vsel %vm660_vm4, %v5979_v12, %v659_v0 }
 0x316   : > { %v1843_v62 = vmax.f32 %v1834_v16, 0.0  ;;  %v6036_v60 = vsel %vm662_vm6, %v663_v39, %v661_v18 }
 0x317   : > { %v4624_v55 = vpop.eup %4623  ;;  %v6020_v34 = vpack.c.bf16 %v1842_v10, %v1840_v27  ;;  %v6031_v10 = vsel %vm655_vm5, %v656_v5, %v654_v3 }
 0x318   : > { %v4626_v20 = vpop.eup %4625  ;;  %v6023_v47 = vpack.c.bf16 %v1843_v62, %v1841_v57  ;;  %v1513_v46 = vmul.f32 0.5, %v4624_v55  ;;  %v1525_v62 = vstv %s6014_s27 }
 0x319   : > { %v1514_v6 = vmul.f32 0.5, %v4626_v20  ;;  %v1526_v12 = vmul.f32 %v1525_v62, %v6031_v10  ;;  %v1527_v45 = vmul.f32 %v1525_v62, %v6036_v60 }
 0x31a   : > { %v1517_v16 = vsub.f32 1.0, %v1513_v46 }
 0x31b   : > { %v1518_v27 = vsub.f32 1.0, %v1514_v6 }
 0x31c   : > { %v1519_v57 = vsel %vm1515_vm7, %v1513_v46, %v1517_v16 }
 0x31d   : > { %v1521_v63 = vmul.f32 %v1519_v57, %v5970_v50  ;;  %v1520_v55 = vsel %vm1516_vm8, %v1514_v6, %v1518_v27  ;;  %v6042_v57 = vpop.permute.xlu1 %1585 }
 0x31e   : > { %v1522_v20 = vmul.f32 %v1520_v55, %v5970_v50 }
 0x31f   : > { %v1523_v0 = vmax.f32 %v1521_v63, 0.0 }
 0x320   : > { %v1524_v17 = vmax.f32 %v1522_v20, 0.0 }
 0x321   : > { %v1528_v58 = vsub.f32 0.0, %v1523_v0 }
 0x322   : > { %v1529_v5 = vsub.f32 0.0, %v1524_v17 }
 0x323   : > { %v1530_v3 = vmul.f32 %v1528_v58, %v1526_v12 }
 0x324   : > { %v1531_v46 = vmul.f32 %v1529_v5, %v1527_v45 }
 0x3db   : > { %v1648_v16 = vpop.f32.mrb[24].mxu1 }
 0x3dc   : > { %v1649_v52 = vadd.f32 %v1648_v16, %v5947_v28  ;;  %v1650_v9 = vpop.f32.mrb[25].mxu1  ;;  %v6048_v16 = vpop.permute.xlu1 %1595 }
 0x3dd   : > { %v1651_v39 = vadd.f32 %v1650_v9, %v5947_v28  ;;  %v1652_v6 = vpop.f32.mrb[26].mxu1 }
 0x3de   : > { %v1653_v18 = vadd.f32 %v1652_v6, %v6042_v57  ;;  %v1654_v27 = vpop.f32.mrb[27].mxu1  ;;  %v1667_v55 = vmax.f32 %v1649_v52, 0.0 }
 0x3df   : > { %v1655_v63 = vadd.f32 %v1654_v27, %v6042_v57  ;;  %v1668_v20 = vmax.f32 %v1651_v39, 0.0 }
 0x3e0   : > { %v1669_v62 = vmax.f32 %v1653_v18, 0.0 }
 0x3e1   : > { %v1670_v17 = vmax.f32 %v1655_v63, 0.0 }
 0x3e2   : > { %v1675_v58 = vpack.c.bf16 %v1669_v62, %v1667_v55 }
 0x3e3   : > { %v1676_v0 = vpack.c.bf16 %v1670_v17, %v1668_v20  ;;  %v1658_v12 = vpop.f32.mrb[28].mxu1  ;;  %v6056_v20 = vld [vmem:[%s6798_s16] sm:$0x3] }
 0x3e4   : > { %v1659_v45 = vadd.f32 %v1658_v12, %v5957_v42  ;;  %v1660_v5 = vpop.f32.mrb[29].mxu1  ;;  %v1532_v12 = vmul.f32 1.442695, %v1530_v3 }
 0x3e5   : > { %v1661_v9 = vadd.f32 %v1660_v5, %v5957_v42  ;;  %v1662_v59 = vpop.f32.mrb[30].mxu1  ;;  %1687 = vmatprep.subr.bf16.mxu1 %v1676_v0 }
 0x3e6   : > { %v1663_v6 = vadd.f32 %v1662_v59, %v6048_v16  ;;  %v1664_v44 = vpop.f32.mrb[31].mxu1  ;;  %1688 = vmatpush1.bf16.msra.mxu1 %v1675_v58  ;;  %v1671_v39 = vmax.f32 %v1659_v45, 0.0  ;;  %v1534_v45 = vmul.f32 1.442695, %v1531_v46 }
 0x3e7   : > { %v1665_v52 = vadd.f32 %v1664_v44, %v6048_v16  ;;  %v1672_v27 = vmax.f32 %v1661_v9, 0.0  ;;  %v6074_v44 = vpop.permute.xlu1 %1681 }
 0x3e8   : > { %v1673_v18 = vmax.f32 %v1663_v6, 0.0 }
 0x3e9   : > { %v1674_v63 = vmax.f32 %v1665_v52, 0.0 }
 0x3ea   : > { %v1677_v55 = vpack.c.bf16 %v1673_v18, %v1671_v39  ;;  %v6966_v18 = vld [vmem:[#allocation36_spill] sm:$0xff] }
 0x3eb   : > { %v1678_v62 = vpack.c.bf16 %v1674_v63, %v1672_v27 }
 0x3ed   : > { %1689 = vmatprep.subr.bf16.mxu1 %v1678_v62  ;;  %v6967_v62 = vld [vmem:[#allocation39_spill] sm:$0xff] }
 0x3ee   : > { %1690 = vmatpush1.bf16.msra.mxu1 %v1677_v55 }
 0x3ef   : > { %1848 = vmatprep.subr.bf16.mxu1 %v6005_v43 }
 0x3f1   : > { %4476 = vmatmul.mubr.msk.bf16.vlgmr.msra.gmra.mrb[32].mxu1 %vm1320_vm2, %v6056_v20 }
 0x3f2   : > { %1849 = vmatpush1.bf16.msra.mxu1 %v6003_v2  ;;  %1880 = vmatprep.mubr.bf16.mxu1 %v6871_v19 }
 0x3f3   : > { %1850 = vmatprep.subr.bf16.mxu1 %v6023_v47 }
 0x3f6   : > { %1851 = vmatpush1.bf16.msra.mxu1 %v6020_v34 }
 0x3f9   : > { %4483 = vmatmul.mubr.msk.bf16.vlgmr.msra.gmra.mrb[36].mxu1 %vm1320_vm2, %v5907_v49 }
 0x3fa   : > { %1890 = vmatprep.mubr.bf16.mxu1 %v6871_v19 }
 0x401   : > { %4484 = vmatmul.mubr.msk.bf16.gmra.mrb[40].mxu1 %vm1320_vm2, %v5918_v30 }
 0x402   : > { %1900 = vmatprep.mubr.bf16.mxu1 %v6871_v19 }
 0x409   : > { %4485 = vmatmul.mubr.msk.bf16.gmra.mrb[44].mxu1 %vm1320_vm2, %v5927_v48 }
 0x40a   : > { %2087 = vmatprep.mubr.bf16.mxu1 %v6871_v19 }
 0x4c4   : > { %v1721_v59 = vpop.f32.mrb[32].mxu1 }
 0x4c5   : > { %v1722_v47 = vadd.f32 %v1721_v59, %v6074_v44  ;;  %v1723_v2 = vpop.f32.mrb[33].mxu1 }
 0x4c6   : > { %v1724_v43 = vadd.f32 %v1723_v2, %v6074_v44  ;;  %v1725_v34 = vpop.f32.mrb[34].mxu1  ;;  %v6969_v2 = vld [vmem:[#allocation45_spill] sm:$0xff] }
 0x4c7   : > { %v4477_v17 = vmul.f32 -1.442695, %v1722_v47  ;;  %v1726_v58 = vpop.f32.mrb[35].mxu1  ;;  %v6968_v47 = vld [vmem:[#allocation42_spill] sm:$0xff] }
 0x4c8   : > { %v4478_v0 = vmul.f32 -1.442695, %v1724_v43 }
 0x4c9   : > { %4627 = vpow2.f32 %v4477_v17  ;;  %v1740_v17 = vlaneseq }
 0x4ca   : > { %4629 = vpow2.f32 %v4478_v0 }
 0x4cb   : > { %4631 = vpow2.f32 %v1532_v12 }
 0x4cc   : > { %v1882_v5 = vpop.f32.mrb[36].mxu1  ;;  %4633 = vpow2.f32 %v1534_v45 }
 0x4cd   : > { %v1883_v9 = vadd.f32 %v1882_v5, %v5440_v22  ;;  %v1884_v6 = vpop.f32.mrb[37].mxu1 }
 0x4ce   : > { %v1885_v52 = vadd.f32 %v1884_v6, %v5440_v22  ;;  %v1886_v39 = vpop.f32.mrb[38].mxu1 }
 0x4cf   : > { %v1970_v27 = vadd.f32 %v6966_v18, %v1883_v9  ;;  %v1887_v63 = vadd.f32 %v1886_v39, %v5478_v35  ;;  %v1888_v55 = vpop.f32.mrb[39].mxu1 }
 0x4d0   : > { %v1971_v59 = vadd.f32 %v6967_v62, %v1885_v52  ;;  %v1889_v3 = vadd.f32 %v1888_v55, %v5478_v35 }
 0x4d1   : > { %v1972_v46 = vadd.f32 %v6968_v47, %v1887_v63  ;;  %v1978_v58 = vmax.f32 %v1970_v27, 0.0  ;;  %v6970_v47 = vld [vmem:[#allocation49_spill] sm:$0xff] }
 0x4d2   : > { %v1973_v43 = vadd.f32 %v6969_v2, %v1889_v3  ;;  %v1979_v45 = vmax.f32 %v1971_v59, 0.0  ;;  %v1741_v3 = vshrl.u32 %v1740_v17, 7 }
 0x4d3   : > { %v4628_v34 = vpop.eup %4627  ;;  %v1980_v0 = vmax.f32 %v1972_v46, 0.0 }
 0x4d4   : > { %v4630_v12 = vpop.eup %4629  ;;  %v1734_v5 = vadd.f32 1.0, %v4628_v34  ;;  %v1981_v6 = vmax.f32 %v1973_v43, 0.0  ;;  %v1892_v9 = vpop.f32.mrb[40].mxu1  ;;  %v6971_v43 = vld [vmem:[#allocation52_spill] sm:$0xff] }
 0x4d5   : > { %v1735_v18 = vadd.f32 1.0, %v4630_v12  ;;  %v1986_v39 = vpack.c.bf16 %v1980_v0, %v1978_v58  ;;  %v1893_v33 = vadd.f32 %v1892_v9, %v5938_v38  ;;  %v1894_v52 = vpop.f32.mrb[41].mxu1  ;;  %v6090_v59 = vpop.eup %4631  ;;  %v6972_v12 = vld [vmem:[#allocation58_spill] sm:$0xff] }
 0x4d6   : > { %4635 = vrcp.f32 %v1734_v5  ;;  %v1895_v55 = vadd.f32 %v1894_v52, %v5938_v38  ;;  %v1896_v63 = vpop.f32.mrb[42].mxu1  ;;  %v1987_v62 = vpack.c.bf16 %v1981_v6, %v1979_v45  ;;  %v6094_v0 = vpop.eup %4633  ;;  %v6973_v45 = vld [vmem:[#allocation62_spill] sm:$0xff]  ;;  %v1536_v6 = vsub.f32 1.0, %v6090_v59 }
 0x4d7   : > { %4637 = vrcp.f32 %v1735_v18  ;;  %v1974_v27 = vadd.f32 %v6970_v47, %v1893_v33  ;;  %v1897_v46 = vadd.f32 %v1896_v63, %v5954_v26  ;;  %v1898_v2 = vpop.f32.mrb[43].mxu1  ;;  %v6099_v33 = vsub.s32 0, %v1741_v3 }
 0x4d8   : > { %v1975_v34 = vadd.f32 %v6971_v43, %v1895_v55  ;;  %v1899_v58 = vadd.f32 %v1898_v2, %v5954_v26  ;;  %1990 = vmatprep.subr.bf16.mxu0 %v1987_v62  ;;  %v6834_v52 = vsub.f32 1.0, %v6094_v0 }
 0x4d9   : > { %v1976_v5 = vadd.f32 %v6972_v12, %v1897_v46  ;;  %1991 = vmatpush1.bf16.msra.mxu0 %v1986_v39  ;;  %v1982_v9 = vmax.f32 %v1974_v27, 0.0  ;;  %v1743_v3 = vrot.slane %v1536_v6, %v6099_v33 }
 0x4da   : > { %v1977_v17 = vadd.f32 %v6973_v45, %v1899_v58  ;;  %v1983_v63 = vmax.f32 %v1975_v34, 0.0  ;;  %v1747_v34 = vrot.slane %v6834_v52, %v6099_v33 }
 0x4db   : > { %v1984_v18 = vmax.f32 %v1976_v5, 0.0 }
 0x4dc   : > { %v1985_v55 = vmax.f32 %v1977_v17, 0.0  ;;  %v1902_v47 = vpop.f32.mrb[44].mxu1 }
 0x4dd   : > { %v1988_v2 = vpack.c.bf16 %v1984_v18, %v1982_v9  ;;  %v1903_v62 = vadd.f32 %v1902_v47, %v5966_v56  ;;  %v1904_v43 = vpop.f32.mrb[45].mxu1  ;;  %v6974_v47 = vld [vmem:[#allocation29_spill] sm:$0xff] }
 0x4de   : > { %v1905_v46 = vadd.f32 %v1904_v43, %v5966_v56  ;;  %v1989_v39 = vpack.c.bf16 %v1985_v55, %v1983_v63  ;;  %v1906_v12 = vpop.f32.mrb[46].mxu1 }
 0x4df   : > { %v1909_v58 = vsub.f32 0.0, %v1903_v62  ;;  %v1907_v27 = vpop.f32.mrb[47].mxu1 }
 0x4e0   : > { %v4636_v5 = vpop.eup %4635  ;;  %v1910_v45 = vsub.f32 0.0, %v1905_v46  ;;  %1992 = vmatprep.subr.bf16.mxu0 %v1989_v39  ;;  %v6975_v46 = vld [vmem:[#allocation32_spill] sm:$0xff]  ;;  %v6977_v27 = vld [vmem:[#allocation35_spill] sm:$0xff] }
 0x4e1   : > { %v4638_v17 = vpop.eup %4637  ;;  %v6110_v9 = vmul.f32 %v4636_v5, %v1743_v3  ;;  %v1911_v18 = vmul.f32 %v1909_v58, %v5970_v50  ;;  %1993 = vmatpush1.bf16.msra.mxu0 %v1988_v2  ;;  %v6976_v3 = vld [vmem:[#allocation34_spill] sm:$0xff] }
 0x4e2   : > { %v6113_v63 = vmul.f32 %v4638_v17, %v1747_v34  ;;  %v1912_v55 = vmul.f32 %v1910_v45, %v5970_v50  ;;  %2151 = vmatprep.subr.bf16.mxu0 %v6974_v47  ;;  %v6129_v17 = vld [vmem:[%s6789_s7] sm:$0xff]  }
 0x4e3   : > { %v1913_v62 = vand.u32 2147483647, %v1911_v18  ;;  %vm1923_vm9 = vcmp.le.f32.partialorder %v1911_v18, 0.0 }
 0x4e4   : > { %v1914_v43 = vand.u32 2147483647, %v1912_v55  ;;  %4486 = vmatmul.mubr.msk.bf16.vlgmr.msra.gmra.mrb[36].mxu0 %vm1320_vm2, %v5977_v7  ;;  %vm1924_vm10 = vcmp.le.f32.partialorder %v1912_v55, 0.0 }
 0x4e5   : > { %v1915_v12 = vsub.f32 0.0, %v1913_v62  ;;  %2152 = vmatpush1.bf16.msra.mxu0 %v6975_v46  ;;  %2032 = vmatprep.mubr.bf16.mxu0 %v6871_v19  ;;  %v1933_v46 = vstv %s4480_s19 }
 0x4e6   : > { %v1916_v39 = vsub.f32 0.0, %v1914_v43  ;;  %2153 = vmatprep.subr.bf16.mxu0 %v6976_v3  ;;  %v1935_v52 = vmul.f32 %v1933_v46, %v6036_v60 }
 0x4e7   : > { %v1917_v2 = vmul.f32 1.442695, %v1915_v12 }
 0x4e8   : > { %v1919_v58 = vmul.f32 1.442695, %v1916_v39 }
 0x4e9   : > { %4639 = vpow2.f32 %v1917_v2  ;;  %2154 = vmatpush1.bf16.msra.mxu0 %v6977_v27  ;;  %v1934_v27 = vmul.f32 %v1933_v46, %v6031_v10  ;;  %v6978_v46 = vsub.f32 1.0, %v6094_v0 }
 0x4ea   : > { %4641 = vpow2.f32 %v1919_v58 }
 0x4ec   : > { %4487 = vmatmul.mubr.msk.bf16.gmra.mrb[40].mxu0 %vm1320_vm2, %v6001_v4 }
 0x4ed   : > { %2183 = vmatprep.mubr.bf16.mxu0 %v6871_v19 }
 0x4f3   : > { %v4640_v5 = vpop.eup %4639 }
 0x4f4   : > { %v4642_v34 = vpop.eup %4641  ;;  %v1921_v45 = vmul.f32 0.5, %v4640_v5  ;;  %4493 = vmatmul.mubr.msk.bf16.vlgmr.msra.gmra.mrb[44].mxu0 %vm1320_vm2, %v6129_v17 }
 0x4f5   : > { %v1922_v47 = vmul.f32 0.5, %v4642_v34  ;;  %2193 = vmatprep.mubr.bf16.mxu0 %v6871_v19  ;;  %v6141_v34 = vld [vmem:[%s6789_s7 + $0x8] sm:$0xff]  }
 0x4f6   : > { %v1925_v62 = vsub.f32 1.0, %v1921_v45 }
 0x4f7   : > { %v1926_v43 = vsub.f32 1.0, %v1922_v47 }
 0x4f8   : > { %v1927_v12 = vsel %vm1923_vm9, %v1921_v45, %v1925_v62 }
 0x4f9   : > { %v1929_v39 = vmul.f32 %v1927_v12, %v5970_v50  ;;  %v1928_v3 = vsel %vm1924_vm10, %v1922_v47, %v1926_v43  ;;  %v1538_v12 = vsub.f32 1.0, %v1536_v6 }
 0x4fa   : > { %v1930_v2 = vmul.f32 %v1928_v3, %v5970_v50 }
 0x4fb   : > { %v1931_v58 = vmax.f32 %v1929_v39, 0.0  ;;  %v1539_v39 = vsub.f32 1.0, %v6978_v46  ;;  %v1540_v36 = vadd.f32 1e-10, %v1538_v12 }
 0x4fc   : > { %v1932_v5 = vmax.f32 %v1930_v2, 0.0  ;;  %4494 = vmatmul.mubr.msk.bf16.gmra.mrb[48].mxu0 %vm1320_vm2, %v6141_v34 }
 0x4fd   : > { %v1936_v18 = vsub.f32 0.0, %v1931_v58  ;;  %2390 = vmatprep.mubr.bf16.mxu0 %v6871_v19  ;;  %v1541_v58 = vadd.f32 1e-10, %v1539_v39 }
 0x4fe   : > { %v1937_v55 = vsub.f32 0.0, %v1932_v5 }
 0x4ff   : > { %v1938_v45 = vmul.f32 %v1936_v18, %v1934_v27 }
 0x500   : > { %v1939_v47 = vmul.f32 %v1937_v55, %v1935_v52 }
 0x501   : > { %v1940_v62 = vmul.f32 1.442695, %v1938_v45 }
 0x502   : > { %v1942_v43 = vmul.f32 1.442695, %v1939_v47 }
 0x503   : > { %4643 = vpow2.f32 %v1940_v62 }
 0x504   : > { %4645 = vpow2.f32 %v1942_v43 }
 0x50d   : > { %v4644_v3 = vpop.eup %4643 }
 0x50e   : > { %v4646_v2 = vpop.eup %4645  ;;  %v1944_v24 = vsub.f32 1.0, %v4644_v3 }
 0x50f   : > { %v1945_v21 = vsub.f32 1.0, %v4646_v2 }
 0x510   : > { %v6150_v32 = vmul.f32 %v1944_v24, %v1540_v36  ;;  %v1948_v27 = vsub.f32 1.0, %v1944_v24 }
 0x511   : > { %v6152_v52 = vmul.f32 %v1945_v21, %v1541_v58  ;;  %v1949_v5 = vsub.f32 1.0, %v1945_v21 }
 0x512   : > { %v1950_v18 = vadd.f32 1e-10, %v1948_v27 }
 0x513   : > { %v1951_v55 = vadd.f32 1e-10, %v1949_v5 }
 0x514   : > { %v6154_v45 = vmul.f32 %v1950_v18, %v1540_v36 }
 0x515   : > { %v6156_v59 = vmul.f32 %v1951_v55, %v1541_v58 }
 0x5b7   : > { %v2024_v0 = vpop.f32.mrb[36].mxu0 }
 0x5b8   : > { %v2025_v6 = vadd.f32 %v2024_v0, %v5947_v28  ;;  %v2026_v47 = vpop.f32.mrb[37].mxu0 }
 0x5b9   : > { %v2027_v62 = vadd.f32 %v2026_v47, %v5947_v28  ;;  %v2028_v43 = vpop.f32.mrb[38].mxu0 }
 0x5ba   : > { %v2029_v12 = vadd.f32 %v2028_v43, %v6042_v57  ;;  %v2030_v46 = vpop.f32.mrb[39].mxu0  ;;  %v2043_v39 = vmax.f32 %v2025_v6, 0.0 }
 0x5bb   : > { %v2031_v24 = vadd.f32 %v2030_v46, %v6042_v57  ;;  %v2044_v3 = vmax.f32 %v2027_v62, 0.0 }
 0x5bc   : > { %v2045_v21 = vmax.f32 %v2029_v12, 0.0 }
 0x5bd   : > { %v2046_v2 = vmax.f32 %v2031_v24, 0.0 }
 0x5be   : > { %v2051_v36 = vpack.c.bf16 %v2045_v21, %v2043_v39 }
 0x5bf   : > { %v2052_v27 = vpack.c.bf16 %v2046_v2, %v2044_v3  ;;  %v2034_v58 = vpop.f32.mrb[40].mxu0 }
 0x5c0   : > { %v2035_v5 = vadd.f32 %v2034_v58, %v5957_v42  ;;  %v2036_v18 = vpop.f32.mrb[41].mxu0 }
 0x5c1   : > { %v2037_v55 = vadd.f32 %v2036_v18, %v5957_v42  ;;  %v2038_v0 = vpop.f32.mrb[42].mxu0  ;;  %2055 = vmatprep.subr.bf16.mxu1 %v2052_v27 }
 0x5c2   : > { %v2039_v47 = vadd.f32 %v2038_v0, %v6048_v16  ;;  %v2040_v43 = vpop.f32.mrb[43].mxu0  ;;  %2056 = vmatpush1.bf16.msra.mxu1 %v2051_v36  ;;  %v2047_v6 = vmax.f32 %v2035_v5, 0.0 }
 0x5c3   : > { %v2041_v46 = vadd.f32 %v2040_v43, %v6048_v16  ;;  %v2048_v62 = vmax.f32 %v2037_v55, 0.0 }
 0x5c4   : > { %v2049_v12 = vmax.f32 %v2039_v47, 0.0 }
 0x5c5   : > { %v2050_v24 = vmax.f32 %v2041_v46, 0.0 }
 0x5c6   : > { %v2053_v39 = vpack.c.bf16 %v2049_v12, %v2047_v6 }
 0x5c7   : > { %v2054_v21 = vpack.c.bf16 %v2050_v24, %v2048_v62  ;;  %v2185_v3 = vpop.f32.mrb[44].mxu0 }
 0x5c8   : > { %v2186_v2 = vadd.f32 %v2185_v3, %v6953_v53  ;;  %v2187_v58 = vpop.f32.mrb[45].mxu0 }
 0x5c9   : > { %v2188_v18 = vadd.f32 %v2187_v58, %v6953_v53  ;;  %2057 = vmatprep.subr.bf16.mxu1 %v2054_v21  ;;  %v2189_v27 = vpop.f32.mrb[46].mxu0 }
 0x5ca   : > { %v2190_v0 = vadd.f32 %v2189_v27, %v6954_v40  ;;  %2058 = vmatpush1.bf16.msra.mxu1 %v2053_v39  ;;  %v2191_v36 = vpop.f32.mrb[47].mxu0  ;;  %v2204_v5 = vmax.f32 %v2186_v2, 0.0 }
 0x5cb   : > { %v2192_v43 = vadd.f32 %v2191_v36, %v6954_v40  ;;  %v2205_v55 = vmax.f32 %v2188_v18, 0.0 }
 0x5cc   : > { %v2206_v47 = vmax.f32 %v2190_v0, 0.0 }
 0x5cd   : > { %v2207_v46 = vmax.f32 %v2192_v43, 0.0  ;;  %4488 = vmatmul.mubr.msk.bf16.vlgmr.msra.gmra.mrb[48].mxu1 %vm1320_vm2, %v6056_v20 }
 0x5ce   : > { %v2212_v6 = vpack.c.bf16 %v2206_v47, %v2204_v5  ;;  %2248 = vmatprep.mubr.bf16.mxu1 %v6871_v19 }
 0x5cf   : > { %v2213_v12 = vpack.c.bf16 %v2207_v46, %v2205_v55  ;;  %v2195_v62 = vpop.f32.mrb[48].mxu0 }
 0x5d0   : > { %v2196_v24 = vadd.f32 %v2195_v62, %v6955_v54  ;;  %v2197_v21 = vpop.f32.mrb[49].mxu0 }
 0x5d1   : > { %v2198_v39 = vadd.f32 %v2197_v21, %v6955_v54  ;;  %v2199_v3 = vpop.f32.mrb[50].mxu0  ;;  %2216 = vmatprep.subr.bf16.mxu1 %v2213_v12 }
 0x5d2   : > { %v2200_v2 = vadd.f32 %v2199_v3, %v6956_v8  ;;  %v2201_v58 = vpop.f32.mrb[51].mxu0  ;;  %2217 = vmatpush1.bf16.msra.mxu1 %v2212_v6  ;;  %v2208_v27 = vmax.f32 %v2196_v24, 0.0 }
 0x5d3   : > { %v2202_v18 = vadd.f32 %v2201_v58, %v6956_v8  ;;  %v2209_v36 = vmax.f32 %v2198_v39, 0.0 }
 0x5d4   : > { %v2210_v0 = vmax.f32 %v2200_v2, 0.0 }
 0x5d5   : > { %v2211_v43 = vmax.f32 %v2202_v18, 0.0 }
 0x5d6   : > { %v2214_v5 = vpack.c.bf16 %v2210_v0, %v2208_v27 }
 0x5d7   : > { %v2215_v47 = vpack.c.bf16 %v2211_v43, %v2209_v36  ;;  %v6979_v36 = vld [vmem:[#allocation37_spill] sm:$0xff] }
 0x5d9   : > { %2218 = vmatprep.subr.bf16.mxu1 %v2215_v47 }
 0x5da   : > { %2219 = vmatpush1.bf16.msra.mxu1 %v2214_v5 }
 0x5dd   : > { %4495 = vmatmul.mubr.msk.bf16.vlgmr.msra.gmra.mrb[52].mxu1 %vm1320_vm2, %v5907_v49 }
 0x5de   : > { %2258 = vmatprep.mubr.bf16.mxu1 %v6871_v19 }
 0x5e5   : > { %4496 = vmatmul.mubr.msk.bf16.gmra.mrb[56].mxu1 %vm1320_vm2, %v5918_v30 }
 0x5e6   : > { %2268 = vmatprep.mubr.bf16.mxu1 %v6871_v19 }
 0x5ed   : > { %4497 = vmatmul.mubr.msk.bf16.gmra.mrb[60].mxu1 %vm1320_vm2, %v5927_v48 }
 0x5ee   : > { %2455 = vmatprep.mubr.bf16.mxu1 %v6871_v19 }
 0x6a0   : > { %v2089_v55 = vpop.f32.mrb[48].mxu1 }
 0x6a1   : > { %v2090_v46 = vadd.f32 %v2089_v55, %v6074_v44  ;;  %v2091_v6 = vpop.f32.mrb[49].mxu1  ;;  %v6980_v55 = vld [vmem:[#allocation40_spill] sm:$0xff] }
 0x6a2   : > { %v2092_v12 = vadd.f32 %v2091_v6, %v6074_v44  ;;  %v2093_v62 = vpop.f32.mrb[50].mxu1 }
 0x6a3   : > { %v4489_v49 = vmul.f32 -1.442695, %v2090_v46  ;;  %v2094_v24 = vpop.f32.mrb[51].mxu1 }
 0x6a4   : > { %v4490_v21 = vmul.f32 -1.442695, %v2092_v12  ;;  %v6981_v12 = vld [vmem:[#allocation43_spill] sm:$0xff] }
 0x6a5   : > { %4647 = vpow2.f32 %v4489_v49  ;;  %v6982_v49 = vld [vmem:[#allocation46_spill] sm:$0xff] }
 0x6a6   : > { %4649 = vpow2.f32 %v4490_v21 }
 0x6af   : > { %v4648_v30 = vpop.eup %4647 }
 0x6b0   : > { %v4650_v39 = vpop.eup %4649  ;;  %v2102_v3 = vadd.f32 1.0, %v4648_v30  ;;  %v2250_v2 = vpop.f32.mrb[52].mxu1 }
 0x6b1   : > { %v2103_v58 = vadd.f32 1.0, %v4650_v39  ;;  %v2251_v48 = vadd.f32 %v2250_v2, %v5440_v22  ;;  %v2252_v18 = vpop.f32.mrb[53].mxu1 }
 0x6b2   : > { %4651 = vrcp.f32 %v2102_v3  ;;  %v2253_v27 = vadd.f32 %v2252_v18, %v5440_v22  ;;  %v2254_v0 = vpop.f32.mrb[54].mxu1 }
 0x6b3   : > { %4653 = vrcp.f32 %v2103_v58  ;;  %v2338_v43 = vadd.f32 %v6979_v36, %v2251_v48  ;;  %v2255_v5 = vadd.f32 %v2254_v0, %v5478_v35  ;;  %v2256_v47 = vpop.f32.mrb[55].mxu1 }
 0x6b4   : > { %v2339_v46 = vadd.f32 %v6980_v55, %v2253_v27  ;;  %v2257_v6 = vadd.f32 %v2256_v47, %v5478_v35  ;;  %v2111_v27 = vrot.slane %v6150_v32, %v6099_v33  ;;  %v6983_v47 = vld [vmem:[#allocation50_spill] sm:$0xff] }
 0x6b5   : > { %v2340_v62 = vadd.f32 %v6981_v12, %v2255_v5  ;;  %v2346_v21 = vmax.f32 %v2338_v43, 0.0  ;;  %v6984_v12 = vld [vmem:[#allocation53_spill] sm:$0xff] }
 0x6b6   : > { %v2341_v24 = vadd.f32 %v6982_v49, %v2257_v6  ;;  %v2347_v39 = vmax.f32 %v2339_v46, 0.0  ;;  %v2115_v46 = vrot.slane %v6152_v52, %v6099_v33 }
 0x6b7   : > { %v2348_v30 = vmax.f32 %v2340_v62, 0.0 }
 0x6b8   : > { %v2349_v3 = vmax.f32 %v2341_v24, 0.0  ;;  %v2260_v2 = vpop.f32.mrb[56].mxu1 }
 0x6b9   : > { %v2354_v18 = vpack.c.bf16 %v2348_v30, %v2346_v21  ;;  %v2261_v58 = vadd.f32 %v2260_v2, %v5938_v38  ;;  %v2262_v48 = vpop.f32.mrb[57].mxu1  ;;  %v6985_v30 = vld [vmem:[#allocation59_spill] sm:$0xff] }
 0x6ba   : > { %v2263_v0 = vadd.f32 %v2262_v48, %v5938_v38  ;;  %v2264_v36 = vpop.f32.mrb[58].mxu1  ;;  %v2355_v51 = vpack.c.bf16 %v2349_v3, %v2347_v39  ;;  %v6986_v3 = vld [vmem:[#allocation63_spill] sm:$0xff] }
 0x6bb   : > { %v2342_v5 = vadd.f32 %v6983_v47, %v2261_v58  ;;  %v2265_v55 = vadd.f32 %v2264_v36, %v5954_v26  ;;  %v2266_v43 = vpop.f32.mrb[59].mxu1 }
 0x6bc   : > { %v4652_v6 = vpop.eup %4651  ;;  %v2343_v62 = vadd.f32 %v6984_v12, %v2263_v0  ;;  %v2267_v49 = vadd.f32 %v2266_v43, %v5954_v26  ;;  %2358 = vmatprep.subr.bf16.mxu0 %v2355_v51 }
 0x6bd   : > { %v4654_v24 = vpop.eup %4653  ;;  %v2116_v21 = vmul.f32 %v4652_v6, %v2111_v27  ;;  %v2344_v39 = vadd.f32 %v6985_v30, %v2265_v55  ;;  %2359 = vmatpush1.bf16.msra.mxu0 %v2354_v18  ;;  %v2350_v48 = vmax.f32 %v2342_v5, 0.0 }
 0x6be   : > { %v2117_v32 = vmul.f32 %v4654_v24, %v2115_v46  ;;  %v2345_v2 = vadd.f32 %v6986_v3, %v2267_v49  ;;  %v2351_v0 = vmax.f32 %v2343_v62, 0.0  ;;  %v6987_v62 = vld [vmem:[#allocation38_spill] sm:$0xff]  ;;  %v6989_v3 = vld [vmem:[#allocation44_spill] sm:$0xff] }
 0x6bf   : > { %v6209_v58 = vadd.f32 %v2116_v21, %v6110_v9  ;;  %v2352_v36 = vmax.f32 %v2344_v39, 0.0  ;;  %v6988_v39 = vld [vmem:[#allocation41_spill] sm:$0xff] }
 0x6c0   : > { %v6212_v52 = vadd.f32 %v2117_v32, %v6113_v63  ;;  %v2353_v47 = vmax.f32 %v2345_v2, 0.0  ;;  %v2270_v43 = vpop.f32.mrb[60].mxu1 }
 0x6c1   : > { %v2356_v51 = vpack.c.bf16 %v2352_v36, %v2350_v48  ;;  %v2271_v27 = vadd.f32 %v2270_v43, %v5966_v56  ;;  %v2272_v6 = vpop.f32.mrb[61].mxu1  ;;  %v6990_v36 = vld [vmem:[#allocation48_spill] sm:$0xff] }
 0x6c2   : > { %v2273_v18 = vadd.f32 %v2272_v6, %v5966_v56  ;;  %v2357_v55 = vpack.c.bf16 %v2353_v47, %v2351_v0  ;;  %v2274_v46 = vpop.f32.mrb[62].mxu1 }
 0x6c3   : > { %v2277_v12 = vsub.f32 0.0, %v2271_v27  ;;  %v2275_v49 = vpop.f32.mrb[63].mxu1 }
 0x6c4   : > { %v2278_v9 = vsub.f32 0.0, %v2273_v18  ;;  %2360 = vmatprep.subr.bf16.mxu0 %v2357_v55  ;;  %v2301_v18 = vstv %s4492_s2 }
 0x6c5   : > { %v2279_v5 = vmul.f32 %v2277_v12, %v5970_v50  ;;  %2361 = vmatpush1.bf16.msra.mxu0 %v2356_v51  ;;  %v2302_v49 = vmul.f32 %v2301_v18, %v6031_v10 }
 0x6c6   : > { %v2280_v63 = vmul.f32 %v2278_v9, %v5970_v50  ;;  %2519 = vmatprep.subr.bf16.mxu0 %v6987_v62  ;;  %v2303_v62 = vmul.f32 %v2301_v18, %v6036_v60 }
 0x6c7   : > { %v2281_v24 = vand.u32 2147483647, %v2279_v5  ;;  %vm2291_vm11 = vcmp.le.f32.partialorder %v2279_v5, 0.0 }
 0x6c8   : > { %v2282_v21 = vand.u32 2147483647, %v2280_v63  ;;  %4498 = vmatmul.mubr.msk.bf16.vlgmr.msra.gmra.mrb[52].mxu0 %vm1320_vm2, %v5977_v7  ;;  %vm2292_vm12 = vcmp.le.f32.partialorder %v2280_v63, 0.0 }
 0x6c9   : > { %v2283_v30 = vsub.f32 0.0, %v2281_v24  ;;  %2520 = vmatpush1.bf16.msra.mxu0 %v6988_v39  ;;  %2400 = vmatprep.mubr.bf16.mxu0 %v6871_v19 }
 0x6ca   : > { %v2284_v32 = vsub.f32 0.0, %v2282_v21  ;;  %2521 = vmatprep.subr.bf16.mxu0 %v6989_v3 }
 0x6cb   : > { %v2285_v2 = vmul.f32 1.442695, %v2283_v30 }
 0x6cc   : > { %v2287_v48 = vmul.f32 1.442695, %v2284_v32 }
 0x6cd   : > { %4655 = vpow2.f32 %v2285_v2  ;;  %2522 = vmatpush1.bf16.msra.mxu0 %v6990_v36 }
 0x6ce   : > { %4657 = vpow2.f32 %v2287_v48 }
 0x6d0   : > { %4499 = vmatmul.mubr.msk.bf16.gmra.mrb[56].mxu0 %vm1320_vm2, %v6001_v4 }
 0x6d1   : > { %2551 = vmatprep.mubr.bf16.mxu0 %v6871_v19 }
 0x6d7   : > { %v4656_v7 = vpop.eup %4655 }
 0x6d8   : > { %v4658_v0 = vpop.eup %4657  ;;  %v2289_v47 = vmul.f32 0.5, %v4656_v7  ;;  %4505 = vmatmul.mubr.msk.bf16.vlgmr.msra.gmra.mrb[60].mxu0 %vm1320_vm2, %v6129_v17 }
 0x6d9   : > { %v2290_v43 = vmul.f32 0.5, %v4658_v0  ;;  %2561 = vmatprep.mubr.bf16.mxu0 %v6871_v19 }
 0x6da   : > { %v2293_v51 = vsub.f32 1.0, %v2289_v47 }
 0x6db   : > { %v2294_v27 = vsub.f32 1.0, %v2290_v43 }
 0x6dc   : > { %v2295_v6 = vsel %vm2291_vm11, %v2289_v47, %v2293_v51 }
 0x6dd   : > { %v2297_v4 = vmul.f32 %v2295_v6, %v5970_v50  ;;  %v2296_v55 = vsel %vm2292_vm12, %v2290_v43, %v2294_v27 }
 0x6de   : > { %v2298_v46 = vmul.f32 %v2296_v55, %v5970_v50 }
 0x6df   : > { %v2299_v12 = vmax.f32 %v2297_v4, 0.0 }
 0x6e0   : > { %v2300_v9 = vmax.f32 %v2298_v46, 0.0  ;;  %4506 = vmatmul.mubr.msk.bf16.gmra.mrb[64].mxu0 %vm1320_vm2, %v6141_v34 }
 0x6e1   : > { %v2304_v24 = vsub.f32 0.0, %v2299_v12  ;;  %2758 = vmatprep.mubr.bf16.mxu0 %v6871_v19 }
 0x6e2   : > { %v2305_v5 = vsub.f32 0.0, %v2300_v9 }
 0x6e3   : > { %v2306_v21 = vmul.f32 %v2304_v24, %v2302_v49 }
 0x6e4   : > { %v2307_v63 = vmul.f32 %v2305_v5, %v2303_v62 }
 0x6e5   : > { %v2308_v30 = vmul.f32 1.442695, %v2306_v21 }
 0x6e6   : > { %v2310_v39 = vmul.f32 1.442695, %v2307_v63 }
 0x6e7   : > { %4659 = vpow2.f32 %v2308_v30 }
 0x6e8   : > { %4661 = vpow2.f32 %v2310_v39 }
 0x6f1   : > { %v4660_v32 = vpop.eup %4659 }
 0x6f2   : > { %v4662_v3 = vpop.eup %4661  ;;  %v2312_v2 = vsub.f32 1.0, %v4660_v32 }
 0x6f3   : > { %v2313_v48 = vsub.f32 1.0, %v4662_v3 }
 0x6f4   : > { %v6239_v36 = vmul.f32 %v2312_v2, %v6154_v45  ;;  %v2316_v7 = vsub.f32 1.0, %v2312_v2 }
 0x6f5   : > { %v6242_v0 = vmul.f32 %v2313_v48, %v6156_v59  ;;  %v2317_v47 = vsub.f32 1.0, %v2313_v48 }
 0x6f6   : > { %v2318_v43 = vadd.f32 1e-10, %v2316_v7 }
 0x6f7   : > { %v2319_v51 = vadd.f32 1e-10, %v2317_v47 }
 0x6f8   : > { %v6245_v27 = vmul.f32 %v2318_v43, %v6154_v45 }
 0x6f9   : > { %v6248_v6 = vmul.f32 %v2319_v51, %v6156_v59 }
 0x79b   : > { %v2392_v18 = vpop.f32.mrb[52].mxu0 }
 0x79c   : > { %v2393_v4 = vadd.f32 %v2392_v18, %v5947_v28  ;;  %v2394_v55 = vpop.f32.mrb[53].mxu0 }
 0x79d   : > { %v2395_v46 = vadd.f32 %v2394_v55, %v5947_v28  ;;  %v2396_v12 = vpop.f32.mrb[54].mxu0 }
 0x79e   : > { %v2397_v49 = vadd.f32 %v2396_v12, %v6042_v57  ;;  %v2398_v9 = vpop.f32.mrb[55].mxu0  ;;  %v2411_v24 = vmax.f32 %v2393_v4, 0.0 }
 0x79f   : > { %v2399_v62 = vadd.f32 %v2398_v9, %v6042_v57  ;;  %v2412_v21 = vmax.f32 %v2395_v46, 0.0 }
 0x7a0   : > { %v2413_v5 = vmax.f32 %v2397_v49, 0.0 }
 0x7a1   : > { %v2414_v45 = vmax.f32 %v2399_v62, 0.0 }
 0x7a2   : > { %v2419_v63 = vpack.c.bf16 %v2413_v5, %v2411_v24 }
 0x7a3   : > { %v2420_v30 = vpack.c.bf16 %v2414_v45, %v2412_v21  ;;  %v2402_v59 = vpop.f32.mrb[56].mxu0 }
 0x7a4   : > { %v2403_v39 = vadd.f32 %v2402_v59, %v5957_v42  ;;  %v2404_v32 = vpop.f32.mrb[57].mxu0 }
 0x7a5   : > { %v2405_v3 = vadd.f32 %v2404_v32, %v5957_v42  ;;  %v2406_v2 = vpop.f32.mrb[58].mxu0  ;;  %2423 = vmatprep.subr.bf16.mxu1 %v2420_v30 }
 0x7a6   : > { %v2407_v48 = vadd.f32 %v2406_v2, %v6048_v16  ;;  %v2408_v7 = vpop.f32.mrb[59].mxu0  ;;  %2424 = vmatpush1.bf16.msra.mxu1 %v2419_v63  ;;  %v2415_v43 = vmax.f32 %v2403_v39, 0.0 }
 0x7a7   : > { %v2409_v47 = vadd.f32 %v2408_v7, %v6048_v16  ;;  %v2416_v18 = vmax.f32 %v2405_v3, 0.0 }
 0x7a8   : > { %v2417_v51 = vmax.f32 %v2407_v48, 0.0 }
 0x7a9   : > { %v2418_v4 = vmax.f32 %v2409_v47, 0.0 }
 0x7aa   : > { %v2421_v55 = vpack.c.bf16 %v2417_v51, %v2415_v43 }
 0x7ab   : > { %v2422_v46 = vpack.c.bf16 %v2418_v4, %v2416_v18  ;;  %v2553_v12 = vpop.f32.mrb[60].mxu0 }
 0x7ac   : > { %v2554_v49 = vadd.f32 %v2553_v12, %v6953_v53  ;;  %v2555_v9 = vpop.f32.mrb[61].mxu0 }
 0x7ad   : > { %v2556_v62 = vadd.f32 %v2555_v9, %v6953_v53  ;;  %2425 = vmatprep.subr.bf16.mxu1 %v2422_v46  ;;  %v2557_v24 = vpop.f32.mrb[62].mxu0 }
 0x7ae   : > { %v2558_v5 = vadd.f32 %v2557_v24, %v6954_v40  ;;  %2426 = vmatpush1.bf16.msra.mxu1 %v2421_v55  ;;  %v2559_v21 = vpop.f32.mrb[63].mxu0  ;;  %v2572_v63 = vmax.f32 %v2554_v49, 0.0  ;;  %v6280_v24 = vld [vmem:[%s6791_s9 + $0x8] sm:$0xff]  }
 0x7af   : > { %v2560_v45 = vadd.f32 %v2559_v21, %v6954_v40  ;;  %v2573_v59 = vmax.f32 %v2556_v62, 0.0  ;;  %v6272_v62 = vld [vmem:[%s6791_s9] sm:$0xff]  }
 0x7b0   : > { %v2574_v30 = vmax.f32 %v2558_v5, 0.0  ;;  %v6288_v5 = vld [vmem:[%s6791_s9 + $0x10] ss:$0 sps:$4 sm:$0x11]  }
 0x7b1   : > { %v2575_v39 = vmax.f32 %v2560_v45, 0.0  ;;  %4500 = vmatmul.mubr.msk.bf16.vlgmr.msra.gmra.mrb[64].mxu1 %vm1320_vm2, %v6056_v20 }
 0x7b2   : > { %v2580_v32 = vpack.c.bf16 %v2574_v30, %v2572_v63  ;;  %2616 = vmatprep.mubr.bf16.mxu1 %v6871_v19 }
 0x7b3   : > { %v2581_v3 = vpack.c.bf16 %v2575_v39, %v2573_v59  ;;  %v2563_v2 = vpop.f32.mrb[64].mxu0 }
 0x7b4   : > { %v2564_v48 = vadd.f32 %v2563_v2, %v6955_v54  ;;  %v2565_v7 = vpop.f32.mrb[65].mxu0 }
 0x7b5   : > { %v2566_v47 = vadd.f32 %v2565_v7, %v6955_v54  ;;  %v2567_v43 = vpop.f32.mrb[66].mxu0  ;;  %2584 = vmatprep.subr.bf16.mxu1 %v2581_v3 }
 0x7b6   : > { %v2568_v51 = vadd.f32 %v2567_v43, %v6956_v8  ;;  %v2569_v18 = vpop.f32.mrb[67].mxu0  ;;  %2585 = vmatpush1.bf16.msra.mxu1 %v2580_v32  ;;  %v2576_v55 = vmax.f32 %v2564_v48, 0.0 }
 0x7b7   : > { %v2570_v4 = vadd.f32 %v2569_v18, %v6956_v8  ;;  %v2577_v46 = vmax.f32 %v2566_v47, 0.0 }
 0x7b8   : > { %v2578_v20 = vmax.f32 %v2568_v51, 0.0 }
 0x7b9   : > { %v2579_v12 = vmax.f32 %v2570_v4, 0.0 }
 0x7ba   : > { %v2582_v49 = vpack.c.bf16 %v2578_v20, %v2576_v55  ;;  %v6991_v20 = vld [vmem:[#allocation47_spill] sm:$0xff] }
 0x7bb   : > { %v2583_v9 = vpack.c.bf16 %v2579_v12, %v2577_v46 }
 0x7bd   : > { %2586 = vmatprep.subr.bf16.mxu1 %v2583_v9  ;;  %v6992_v9 = vld [vmem:[#allocation51_spill] sm:$0xff] }
 0x7be   : > { %2587 = vmatpush1.bf16.msra.mxu1 %v2582_v49 }
 0x7c1   : > { %4507 = vmatmul.mubr.msk.bf16.vlgmr.msra.gmra.mrb[68].mxu1 %vm1320_vm2, %v6272_v62 }
 0x7c2   : > { %2626 = vmatprep.mubr.bf16.mxu1 %v6871_v19 }
 0x7c9   : > { %4508 = vmatmul.mubr.msk.bf16.gmra.mrb[72].mxu1 %vm1320_vm2, %v6280_v24 }
 0x7ca   : > { %2636 = vmatprep.mubr.bf16.mxu1 %v6871_v19 }
 0x7d1   : > { %4509 = vmatmul.mubr.msk.bf16.gmra.mrb[76].mxu1 %vm1320_vm2, %v6288_v5 }
 0x7d2   : > { %2823 = vmatprep.mubr.bf16.mxu1 %v6871_v19 }
 0x884   : > { %v2457_v21 = vpop.f32.mrb[64].mxu1 }
 0x885   : > { %v2458_v45 = vadd.f32 %v2457_v21, %v6074_v44  ;;  %v2459_v63 = vpop.f32.mrb[65].mxu1 }
 0x886   : > { %v2460_v30 = vadd.f32 %v2459_v63, %v6074_v44  ;;  %v2461_v59 = vpop.f32.mrb[66].mxu1  ;;  %v6993_v63 = vld [vmem:[#allocation54_spill] sm:$0xff] }
 0x887   : > { %v4501_v39 = vmul.f32 -1.442695, %v2458_v45  ;;  %v2462_v32 = vpop.f32.mrb[67].mxu1  ;;  %v6994_v59 = vld [vmem:[#allocation55_spill] sm:$0xff] }
 0x888   : > { %v4502_v3 = vmul.f32 -1.442695, %v2460_v30 }
 0x889   : > { %4663 = vpow2.f32 %v4501_v39 }
 0x88a   : > { %4665 = vpow2.f32 %v4502_v3 }
 0x893   : > { %v4664_v2 = vpop.eup %4663 }
 0x894   : > { %v4666_v48 = vpop.eup %4665  ;;  %v2470_v7 = vadd.f32 1.0, %v4664_v2  ;;  %v2618_v47 = vpop.f32.mrb[68].mxu1 }
 0x895   : > { %v2471_v43 = vadd.f32 1.0, %v4666_v48  ;;  %v2619_v51 = vadd.f32 %v2618_v47, %v5440_v22  ;;  %v2620_v18 = vpop.f32.mrb[69].mxu1 }
 0x896   : > { %4667 = vrcp.f32 %v2470_v7  ;;  %v2621_v4 = vadd.f32 %v2620_v18, %v5440_v22  ;;  %v2622_v55 = vpop.f32.mrb[70].mxu1 }
 0x897   : > { %4669 = vrcp.f32 %v2471_v43  ;;  %v2706_v46 = vadd.f32 %v6991_v20, %v2619_v51  ;;  %v2623_v12 = vadd.f32 %v2622_v55, %v5478_v35  ;;  %v2624_v49 = vpop.f32.mrb[71].mxu1 }
 0x898   : > { %v2707_v21 = vadd.f32 %v6992_v9, %v2621_v4  ;;  %v2625_v45 = vadd.f32 %v2624_v49, %v5478_v35  ;;  %v2479_v4 = vrot.slane %v6239_v36, %v6099_v33  ;;  %v6995_v49 = vld [vmem:[#allocation56_spill] sm:$0xff] }
 0x899   : > { %v2708_v30 = vadd.f32 %v6993_v63, %v2623_v12  ;;  %v2714_v32 = vmax.f32 %v2706_v46, 0.0  ;;  %v6996_v63 = vld [vmem:[#allocation60_spill] sm:$0xff] }
 0x89a   : > { %v2709_v39 = vadd.f32 %v6994_v59, %v2625_v45  ;;  %v2715_v2 = vmax.f32 %v2707_v21, 0.0  ;;  %v2483_v21 = vrot.slane %v6242_v0, %v6099_v33 }
 0x89b   : > { %v2716_v3 = vmax.f32 %v2708_v30, 0.0 }
 0x89c   : > { %v2717_v48 = vmax.f32 %v2709_v39, 0.0  ;;  %v2628_v7 = vpop.f32.mrb[72].mxu1 }
 0x89d   : > { %v2722_v47 = vpack.c.bf16 %v2716_v3, %v2714_v32  ;;  %v2629_v43 = vadd.f32 %v2628_v7, %v5938_v38  ;;  %v2630_v51 = vpop.f32.mrb[73].mxu1  ;;  %v6997_v3 = vld [vmem:[#allocation64_spill] sm:$0xff] }
 0x89e   : > { %v2631_v18 = vadd.f32 %v2630_v51, %v5938_v38  ;;  %v2632_v55 = vpop.f32.mrb[74].mxu1  ;;  %v2723_v20 = vpack.c.bf16 %v2717_v48, %v2715_v2  ;;  %v6998_v48 = vld [vmem:[#allocation65_spill] sm:$0xff] }
 0x89f   : > { %v2710_v12 = vadd.f32 %v6995_v49, %v2629_v43  ;;  %v2633_v9 = vadd.f32 %v2632_v55, %v5954_v26  ;;  %v2634_v46 = vpop.f32.mrb[75].mxu1 }
 0x8a0   : > { %v4668_v45 = vpop.eup %4667  ;;  %v2711_v30 = vadd.f32 %v6996_v63, %v2631_v18  ;;  %v2635_v59 = vadd.f32 %v2634_v46, %v5954_v26  ;;  %2726 = vmatprep.subr.bf16.mxu0 %v2723_v20 }
 0x8a1   : > { %v4670_v39 = vpop.eup %4669  ;;  %v2484_v32 = vmul.f32 %v4668_v45, %v2479_v4  ;;  %v2712_v2 = vadd.f32 %v6997_v3, %v2633_v9  ;;  %2727 = vmatpush1.bf16.msra.mxu0 %v2722_v47  ;;  %v2718_v51 = vmax.f32 %v2710_v12, 0.0  ;;  %v6329_v3 = vld [vmem:[%s6796_s14] sm:$0xff]  }
 0x8a2   : > { %v2485_v36 = vmul.f32 %v4670_v39, %v2483_v21  ;;  %v2713_v7 = vadd.f32 %v6998_v48, %v2635_v59  ;;  %v2719_v18 = vmax.f32 %v2711_v30, 0.0  ;;  %v6999_v30 = vld [vmem:[#allocation18_spill] sm:$0xff] }
 0x8a3   : > { %v6316_v43 = vadd.f32 %v2484_v32, %v6209_v58  ;;  %v2720_v55 = vmax.f32 %v2712_v2, 0.0 }
 0x8a4   : > { %v6319_v0 = vadd.f32 %v2485_v36, %v6212_v52  ;;  %v2721_v49 = vmax.f32 %v2713_v7, 0.0  ;;  %v2638_v46 = vpop.f32.mrb[76].mxu1  ;;  %v7000_v36 = vld [vmem:[#allocation11_spill] sm:$0xff]  ;;  %v7001_v7 = vld [vmem:[#allocation17_spill] sm:$0xff] }
 0x8a5   : > { %v2724_v20 = vpack.c.bf16 %v2720_v55, %v2718_v51  ;;  %v2639_v4 = vadd.f32 %v2638_v46, %v5966_v56  ;;  %v2640_v45 = vpop.f32.mrb[77].mxu1 }
 0x8a6   : > { %v2641_v47 = vadd.f32 %v2640_v45, %v5966_v56  ;;  %v2725_v9 = vpack.c.bf16 %v2721_v49, %v2719_v18  ;;  %v2642_v21 = vpop.f32.mrb[78].mxu1  ;;  %v7002_v18 = vld [vmem:[#allocation24_spill] sm:$0xff]  ;;  %v6340_v49 = vld [vmem:[%s6796_s14 + $0x8] sm:$0xff]  }
 0x8a7   : > { %v2645_v63 = vsub.f32 0.0, %v2639_v4  ;;  %v2643_v59 = vpop.f32.mrb[79].mxu1 }
 0x8a8   : > { %v2646_v58 = vsub.f32 0.0, %v2641_v47  ;;  %2728 = vmatprep.subr.bf16.mxu0 %v2725_v9 }
 0x8a9   : > { %v2647_v12 = vmul.f32 %v2645_v63, %v5970_v50  ;;  %2729 = vmatpush1.bf16.msra.mxu0 %v2724_v20  ;;  %v2669_v63 = vstv %s4504_s22 }
 0x8aa   : > { %v2648_v52 = vmul.f32 %v2646_v58, %v5970_v50  ;;  %2887 = vmatprep.subr.bf16.mxu0 %v6999_v30 }
 0x8ab   : > { %v2649_v39 = vand.u32 2147483647, %v2647_v12  ;;  %vm2659_vm13 = vcmp.le.f32.partialorder %v2647_v12, 0.0 }
 0x8ac   : > { %v2650_v32 = vand.u32 2147483647, %v2648_v52  ;;  %4510 = vmatmul.mubr.msk.bf16.vlgmr.msra.gmra.mrb[68].mxu0 %vm1320_vm2, %v6329_v3  ;;  %vm2660_vm14 = vcmp.le.f32.partialorder %v2648_v52, 0.0 }
 0x8ad   : > { %v2651_v2 = vsub.f32 0.0, %v2649_v39  ;;  %2888 = vmatpush1.bf16.msra.mxu0 %v7000_v36  ;;  %2768 = vmatprep.mubr.bf16.mxu0 %v6871_v19 }
 0x8ae   : > { %v2652_v48 = vsub.f32 0.0, %v2650_v32  ;;  %2889 = vmatprep.subr.bf16.mxu0 %v7001_v7  ;;  %v2670_v32 = vmul.f32 %v2669_v63, %v6031_v10 }
 0x8af   : > { %v2653_v51 = vmul.f32 1.442695, %v2651_v2 }
 0x8b0   : > { %v2655_v55 = vmul.f32 1.442695, %v2652_v48 }
 0x8b1   : > { %4671 = vpow2.f32 %v2653_v51  ;;  %2890 = vmatpush1.bf16.msra.mxu0 %v7002_v18 }
 0x8b2   : > { %4673 = vpow2.f32 %v2655_v55 }
 0x8b4   : > { %4511 = vmatmul.mubr.msk.bf16.gmra.mrb[72].mxu0 %vm1320_vm2, %v6340_v49 }
 0x8b5   : > { %2919 = vmatprep.mubr.bf16.mxu0 %v6871_v19 }
 0x8bb   : > { %v4672_v46 = vpop.eup %4671 }
 0x8bc   : > { %v4674_v20 = vpop.eup %4673  ;;  %v2657_v4 = vmul.f32 0.5, %v4672_v46  ;;  %4517 = vmatmul.mubr.msk.bf16.vlgmr.msra.gmra.mrb[76].mxu0 %vm1320_vm2, %v6129_v17  ;;  %v2671_v17 = vmul.f32 %v2669_v63, %v6036_v60 }
 0x8bd   : > { %v2658_v45 = vmul.f32 0.5, %v4674_v20  ;;  %2929 = vmatprep.mubr.bf16.mxu0 %v6871_v19 }
 0x8be   : > { %v2661_v47 = vsub.f32 1.0, %v2657_v4 }
 0x8bf   : > { %v2662_v9 = vsub.f32 1.0, %v2658_v45 }
 0x8c0   : > { %v2663_v21 = vsel %vm2659_vm13, %v2657_v4, %v2661_v47 }
 0x8c1   : > { %v2665_v59 = vmul.f32 %v2663_v21, %v5970_v50  ;;  %v2664_v58 = vsel %vm2660_vm14, %v2658_v45, %v2662_v9 }
 0x8c2   : > { %v2666_v30 = vmul.f32 %v2664_v58, %v5970_v50 }
 0x8c3   : > { %v2667_v39 = vmax.f32 %v2665_v59, 0.0 }
 0x8c4   : > { %v2668_v2 = vmax.f32 %v2666_v30, 0.0  ;;  %4518 = vmatmul.mubr.msk.bf16.gmra.mrb[80].mxu0 %vm1320_vm2, %v6141_v34 }
 0x8c5   : > { %v2672_v36 = vsub.f32 0.0, %v2667_v39  ;;  %3126 = vmatprep.mubr.bf16.mxu0 %v6871_v19 }
 0x8c6   : > { %v2673_v12 = vsub.f32 0.0, %v2668_v2 }
 0x8c7   : > { %v2674_v48 = vmul.f32 %v2672_v36, %v2670_v32 }
 0x8c8   : > { %v2675_v52 = vmul.f32 %v2673_v12, %v2671_v17 }
 0x8c9   : > { %v2676_v7 = vmul.f32 1.442695, %v2674_v48 }
 0x8ca   : > { %v2678_v51 = vmul.f32 1.442695, %v2675_v52 }
 0x8cb   : > { %4675 = vpow2.f32 %v2676_v7 }
 0x8cc   : > { %4677 = vpow2.f32 %v2678_v51 }
 0x8d5   : > { %v4676_v55 = vpop.eup %4675 }
 0x8d6   : > { %v4678_v18 = vpop.eup %4677  ;;  %v2680_v46 = vsub.f32 1.0, %v4676_v55 }
 0x8d7   : > { %v2681_v20 = vsub.f32 1.0, %v4678_v18 }
 0x8d8   : > { %v6356_v4 = vmul.f32 %v2680_v46, %v6245_v27  ;;  %v2684_v45 = vsub.f32 1.0, %v2680_v46 }
 0x8d9   : > { %v6359_v34 = vmul.f32 %v2681_v20, %v6248_v6  ;;  %v2685_v47 = vsub.f32 1.0, %v2681_v20 }
 0x8da   : > { %v2686_v9 = vadd.f32 1e-10, %v2684_v45 }
 0x8db   : > { %v2687_v21 = vadd.f32 1e-10, %v2685_v47 }
 0x8dc   : > { %v6362_v63 = vmul.f32 %v2686_v9, %v6245_v27 }
 0x8dd   : > { %v6365_v59 = vmul.f32 %v2687_v21, %v6248_v6 }
 0x97f   : > { %v2760_v58 = vpop.f32.mrb[68].mxu0 }
 0x980   : > { %v2761_v30 = vadd.f32 %v2760_v58, %v5947_v28  ;;  %v2762_v39 = vpop.f32.mrb[69].mxu0 }
 0x981   : > { %v2763_v32 = vadd.f32 %v2762_v39, %v5947_v28  ;;  %v2764_v2 = vpop.f32.mrb[70].mxu0 }
 0x982   : > { %v2765_v17 = vadd.f32 %v2764_v2, %v6042_v57  ;;  %v2766_v36 = vpop.f32.mrb[71].mxu0  ;;  %v2779_v48 = vmax.f32 %v2761_v30, 0.0 }
 0x983   : > { %v2767_v12 = vadd.f32 %v2766_v36, %v6042_v57  ;;  %v2780_v7 = vmax.f32 %v2763_v32, 0.0 }
 0x984   : > { %v2781_v52 = vmax.f32 %v2765_v17, 0.0 }
 0x985   : > { %v2782_v27 = vmax.f32 %v2767_v12, 0.0 }
 0x986   : > { %v2787_v51 = vpack.c.bf16 %v2781_v52, %v2779_v48 }
 0x987   : > { %v2788_v55 = vpack.c.bf16 %v2782_v27, %v2780_v7  ;;  %v2770_v6 = vpop.f32.mrb[72].mxu0 }
 0x988   : > { %v2771_v18 = vadd.f32 %v2770_v6, %v5957_v42  ;;  %v2772_v46 = vpop.f32.mrb[73].mxu0 }
 0x989   : > { %v2773_v20 = vadd.f32 %v2772_v46, %v5957_v42  ;;  %v2774_v45 = vpop.f32.mrb[74].mxu0  ;;  %2791 = vmatprep.subr.bf16.mxu1 %v2788_v55 }
 0x98a   : > { %v2775_v47 = vadd.f32 %v2774_v45, %v6048_v16  ;;  %v2776_v9 = vpop.f32.mrb[75].mxu0  ;;  %2792 = vmatpush1.bf16.msra.mxu1 %v2787_v51  ;;  %v2783_v58 = vmax.f32 %v2771_v18, 0.0  ;;  %v6382_v45 = vld [vmem:[%s6798_s16] sm:$0x3] }
 0x98b   : > { %v2777_v21 = vadd.f32 %v2776_v9, %v6048_v16  ;;  %v2784_v39 = vmax.f32 %v2773_v20, 0.0 }
 0x98c   : > { %v2785_v30 = vmax.f32 %v2775_v47, 0.0 }
 0x98d   : > { %v2786_v32 = vmax.f32 %v2777_v21, 0.0 }
 0x98e   : > { %v2789_v2 = vpack.c.bf16 %v2785_v30, %v2783_v58 }
 0x98f   : > { %v2790_v17 = vpack.c.bf16 %v2786_v32, %v2784_v39  ;;  %v2921_v36 = vpop.f32.mrb[76].mxu0 }
 0x990   : > { %v2922_v12 = vadd.f32 %v2921_v36, %v6953_v53  ;;  %v2923_v48 = vpop.f32.mrb[77].mxu0 }
 0x991   : > { %v2924_v52 = vadd.f32 %v2923_v48, %v6953_v53  ;;  %2793 = vmatprep.subr.bf16.mxu1 %v2790_v17  ;;  %v2925_v7 = vpop.f32.mrb[78].mxu0 }
 0x992   : > { %v2926_v27 = vadd.f32 %v2925_v7, %v6954_v40  ;;  %2794 = vmatpush1.bf16.msra.mxu1 %v2789_v2  ;;  %v2927_v51 = vpop.f32.mrb[79].mxu0  ;;  %v2940_v6 = vmax.f32 %v2922_v12, 0.0 }
 0x993   : > { %v2928_v55 = vadd.f32 %v2927_v51, %v6954_v40  ;;  %v2941_v46 = vmax.f32 %v2924_v52, 0.0 }
 0x994   : > { %v2942_v18 = vmax.f32 %v2926_v27, 0.0 }
 0x995   : > { %v2943_v20 = vmax.f32 %v2928_v55, 0.0  ;;  %4512 = vmatmul.mubr.msk.bf16.vlgmr.msra.gmra.mrb[80].mxu1 %vm1320_vm2, %v6382_v45 }
 0x996   : > { %v2948_v47 = vpack.c.bf16 %v2942_v18, %v2940_v6  ;;  %2984 = vmatprep.mubr.bf16.mxu1 %v6871_v19 }
 0x997   : > { %v2949_v9 = vpack.c.bf16 %v2943_v20, %v2941_v46  ;;  %v2931_v21 = vpop.f32.mrb[80].mxu0 }
 0x998   : > { %v2932_v58 = vadd.f32 %v2931_v21, %v6955_v54  ;;  %v2933_v30 = vpop.f32.mrb[81].mxu0 }
 0x999   : > { %v2934_v39 = vadd.f32 %v2933_v30, %v6955_v54  ;;  %v2935_v32 = vpop.f32.mrb[82].mxu0  ;;  %2952 = vmatprep.subr.bf16.mxu1 %v2949_v9 }
 0x99a   : > { %v2936_v2 = vadd.f32 %v2935_v32, %v6956_v8  ;;  %v2937_v17 = vpop.f32.mrb[83].mxu0  ;;  %2953 = vmatpush1.bf16.msra.mxu1 %v2948_v47  ;;  %v2944_v12 = vmax.f32 %v2932_v58, 0.0 }
 0x99b   : > { %v2938_v36 = vadd.f32 %v2937_v17, %v6956_v8  ;;  %v2945_v52 = vmax.f32 %v2934_v39, 0.0 }
 0x99c   : > { %v2946_v48 = vmax.f32 %v2936_v2, 0.0 }
 0x99d   : > { %v2947_v7 = vmax.f32 %v2938_v36, 0.0 }
 0x99e   : > { %v2950_v27 = vpack.c.bf16 %v2946_v48, %v2944_v12 }
 0x99f   : > { %v2951_v51 = vpack.c.bf16 %v2947_v7, %v2945_v52  ;;  %v7003_v52 = vld [vmem:[#allocation16_spill] sm:$0xff] }
 0x9a1   : > { %2954 = vmatprep.subr.bf16.mxu1 %v2951_v51 }
 0x9a2   : > { %2955 = vmatpush1.bf16.msra.mxu1 %v2950_v27 }
 0x9a5   : > { %4519 = vmatmul.mubr.msk.bf16.vlgmr.msra.gmra.mrb[84].mxu1 %vm1320_vm2, %v6272_v62 }
 0x9a6   : > { %2994 = vmatprep.mubr.bf16.mxu1 %v6871_v19 }
 0x9ad   : > { %4520 = vmatmul.mubr.msk.bf16.gmra.mrb[88].mxu1 %vm1320_vm2, %v6280_v24 }
 0x9ae   : > { %3004 = vmatprep.mubr.bf16.mxu1 %v6871_v19 }
 0x9b5   : > { %4521 = vmatmul.mubr.msk.bf16.gmra.mrb[92].mxu1 %vm1320_vm2, %v6288_v5 }
 0x9b6   : > { %3191 = vmatprep.mubr.bf16.mxu1 %v6871_v19 }
 0xa68   : > { %v2825_v55 = vpop.f32.mrb[80].mxu1 }
 0xa69   : > { %v2826_v6 = vadd.f32 %v2825_v55, %v6074_v44  ;;  %v2827_v18 = vpop.f32.mrb[81].mxu1  ;;  %v7004_v55 = vld [vmem:[#allocation20_spill] sm:$0xff] }
 0xa6a   : > { %v2828_v46 = vadd.f32 %v2827_v18, %v6074_v44  ;;  %v2829_v20 = vpop.f32.mrb[82].mxu1 }
 0xa6b   : > { %v4513_v47 = vmul.f32 -1.442695, %v2826_v6  ;;  %v2830_v9 = vpop.f32.mrb[83].mxu1 }
 0xa6c   : > { %v4514_v21 = vmul.f32 -1.442695, %v2828_v46  ;;  %v7005_v46 = vld [vmem:[#allocation19_spill] sm:$0xff] }
 0xa6d   : > { %4679 = vpow2.f32 %v4513_v47  ;;  %v7006_v47 = vld [vmem:[#allocation15_spill] sm:$0xff] }
 0xa6e   : > { %4681 = vpow2.f32 %v4514_v21 }
 0xa77   : > { %v4680_v58 = vpop.eup %4679 }
 0xa78   : > { %v4682_v30 = vpop.eup %4681  ;;  %v2838_v39 = vadd.f32 1.0, %v4680_v58  ;;  %v2986_v32 = vpop.f32.mrb[84].mxu1 }
 0xa79   : > { %v2839_v2 = vadd.f32 1.0, %v4682_v30  ;;  %v2987_v17 = vadd.f32 %v2986_v32, %v5440_v22  ;;  %v2988_v36 = vpop.f32.mrb[85].mxu1 }
 0xa7a   : > { %4683 = vrcp.f32 %v2838_v39  ;;  %v2989_v12 = vadd.f32 %v2988_v36, %v5440_v22  ;;  %v2990_v48 = vpop.f32.mrb[86].mxu1 }
 0xa7b   : > { %4685 = vrcp.f32 %v2839_v2  ;;  %v3074_v7 = vadd.f32 %v7003_v52, %v2987_v17  ;;  %v2991_v27 = vadd.f32 %v2990_v48, %v5478_v35  ;;  %v2992_v51 = vpop.f32.mrb[87].mxu1 }
 0xa7c   : > { %v3075_v6 = vadd.f32 %v7004_v55, %v2989_v12  ;;  %v2993_v18 = vadd.f32 %v2992_v51, %v5478_v35  ;;  %v2847_v12 = vrot.slane %v6356_v4, %v6099_v33  ;;  %v7007_v51 = vld [vmem:[#allocation22_spill] sm:$0xff] }
 0xa7d   : > { %v3076_v20 = vadd.f32 %v7005_v46, %v2991_v27  ;;  %v3082_v21 = vmax.f32 %v3074_v7, 0.0  ;;  %v7008_v46 = vld [vmem:[#allocation66_spill] sm:$0xff] }
 0xa7e   : > { %v3077_v9 = vadd.f32 %v7006_v47, %v2993_v18  ;;  %v3083_v30 = vmax.f32 %v3075_v6, 0.0  ;;  %v2851_v6 = vrot.slane %v6359_v34, %v6099_v33 }
 0xa7f   : > { %v3084_v58 = vmax.f32 %v3076_v20, 0.0 }
 0xa80   : > { %v3085_v39 = vmax.f32 %v3077_v9, 0.0  ;;  %v2996_v32 = vpop.f32.mrb[88].mxu1 }
 0xa81   : > { %v3090_v36 = vpack.c.bf16 %v3084_v58, %v3082_v21  ;;  %v2997_v2 = vadd.f32 %v2996_v32, %v5938_v38  ;;  %v2998_v17 = vpop.f32.mrb[89].mxu1  ;;  %v7009_v58 = vld [vmem:[#allocation12_spill] sm:$0xff] }
 0xa82   : > { %v2999_v48 = vadd.f32 %v2998_v17, %v5938_v38  ;;  %v3000_v52 = vpop.f32.mrb[90].mxu1  ;;  %v3091_v37 = vpack.c.bf16 %v3085_v39, %v3083_v30  ;;  %v7010_v39 = vld [vmem:[#allocation67_spill] sm:$0xff] }
 0xa83   : > { %v3078_v27 = vadd.f32 %v7007_v51, %v2997_v2  ;;  %v3001_v55 = vadd.f32 %v3000_v52, %v5954_v26  ;;  %v3002_v7 = vpop.f32.mrb[91].mxu1 }
 0xa84   : > { %v4684_v18 = vpop.eup %4683  ;;  %v3079_v20 = vadd.f32 %v7008_v46, %v2999_v48  ;;  %v3003_v47 = vadd.f32 %v3002_v7, %v5954_v26  ;;  %3094 = vmatprep.subr.bf16.mxu0 %v3091_v37 }
 0xa85   : > { %v4686_v9 = vpop.eup %4685  ;;  %v2852_v21 = vmul.f32 %v4684_v18, %v2847_v12  ;;  %v3080_v30 = vadd.f32 %v7009_v58, %v3001_v55  ;;  %3095 = vmatpush1.bf16.msra.mxu0 %v3090_v36  ;;  %v3086_v17 = vmax.f32 %v3078_v27, 0.0 }
 0xa86   : > { %v2853_v4 = vmul.f32 %v4686_v9, %v2851_v6  ;;  %v3081_v32 = vadd.f32 %v7010_v39, %v3003_v47  ;;  %v3087_v48 = vmax.f32 %v3079_v20, 0.0  ;;  %v7011_v20 = vld [vmem:[#allocation68_spill] sm:$0xff]  ;;  %v7013_v39 = vld [vmem:[#allocation70_spill] sm:$0xff] }
 0xa87   : > { %v6423_v2 = vadd.f32 %v2852_v21, %v6316_v43  ;;  %v3088_v52 = vmax.f32 %v3080_v30, 0.0  ;;  %v7012_v30 = vld [vmem:[#allocation69_spill] sm:$0xff] }
 0xa88   : > { %v6426_v34 = vadd.f32 %v2853_v4, %v6319_v0  ;;  %v3089_v51 = vmax.f32 %v3081_v32, 0.0  ;;  %v3006_v7 = vpop.f32.mrb[92].mxu1 }
 0xa89   : > { %v3092_v37 = vpack.c.bf16 %v3088_v52, %v3086_v17  ;;  %v3007_v12 = vadd.f32 %v3006_v7, %v5966_v56  ;;  %v3008_v18 = vpop.f32.mrb[93].mxu1  ;;  %v7014_v52 = vld [vmem:[#allocation72_spill] sm:$0xff] }
 0xa8a   : > { %v3009_v36 = vadd.f32 %v3008_v18, %v5966_v56  ;;  %v3093_v55 = vpack.c.bf16 %v3089_v51, %v3087_v48  ;;  %v3010_v6 = vpop.f32.mrb[94].mxu1 }
 0xa8b   : > { %v3013_v46 = vsub.f32 0.0, %v3007_v12  ;;  %v3011_v47 = vpop.f32.mrb[95].mxu1  ;;  %v3037_v6 = vstv %s4516_s23 }
 0xa8c   : > { %v3014_v43 = vsub.f32 0.0, %v3009_v36  ;;  %3096 = vmatprep.subr.bf16.mxu0 %v3093_v55 }
 0xa8d   : > { %v3015_v27 = vmul.f32 %v3013_v46, %v5970_v50  ;;  %3097 = vmatpush1.bf16.msra.mxu0 %v3092_v37  ;;  %v6445_v37 = vld [vmem:[%s6789_s7] sm:$0xff]  }
 0xa8e   : > { %v3016_v0 = vmul.f32 %v3014_v43, %v5970_v50  ;;  %3255 = vmatprep.subr.bf16.mxu0 %v7011_v20 }
 0xa8f   : > { %v3017_v9 = vand.u32 2147483647, %v3015_v27  ;;  %vm3027_vm15 = vcmp.le.f32.partialorder %v3015_v27, 0.0 }
 0xa90   : > { %v3018_v21 = vand.u32 2147483647, %v3016_v0  ;;  %4522 = vmatmul.mubr.msk.bf16.vlgmr.msra.gmra.mrb[84].mxu0 %vm1320_vm2, %v6329_v3  ;;  %vm3028_vm0 = vcmp.le.f32.partialorder %v3016_v0, 0.0 }
 0xa91   : > { %v3019_v58 = vsub.f32 0.0, %v3017_v9  ;;  %3256 = vmatpush1.bf16.msra.mxu0 %v7012_v30  ;;  %3136 = vmatprep.mubr.bf16.mxu0 %v6871_v19  ;;  %v3038_v9 = vmul.f32 %v3037_v6, %v6031_v10  ;;  %v6457_v30 = vld [vmem:[%s6789_s7 + $0x8] sm:$0xff]  }
 0xa92   : > { %v3020_v4 = vsub.f32 0.0, %v3018_v21  ;;  %3257 = vmatprep.subr.bf16.mxu0 %v7013_v39 }
 0xa93   : > { %v3021_v32 = vmul.f32 1.442695, %v3019_v58  ;;  %v3039_v58 = vmul.f32 %v3037_v6, %v6036_v60 }
 0xa94   : > { %v3023_v17 = vmul.f32 1.442695, %v3020_v4 }
 0xa95   : > { %4687 = vpow2.f32 %v3021_v32  ;;  %3258 = vmatpush1.bf16.msra.mxu0 %v7014_v52 }
 0xa96   : > { %4689 = vpow2.f32 %v3023_v17 }
 0xa98   : > { %4523 = vmatmul.mubr.msk.bf16.gmra.mrb[88].mxu0 %vm1320_vm2, %v6340_v49 }
 0xa99   : > { %3287 = vmatprep.mubr.bf16.mxu0 %v6871_v19 }
 0xa9f   : > { %v4688_v48 = vpop.eup %4687 }
 0xaa0   : > { %v4690_v51 = vpop.eup %4689  ;;  %v3025_v7 = vmul.f32 0.5, %v4688_v48  ;;  %4529 = vmatmul.mubr.msk.bf16.vlgmr.msra.gmra.mrb[92].mxu0 %vm1320_vm2, %v6445_v37 }
 0xaa1   : > { %v3026_v12 = vmul.f32 0.5, %v4690_v51  ;;  %3297 = vmatprep.mubr.bf16.mxu0 %v6871_v19 }
 0xaa2   : > { %v3029_v18 = vsub.f32 1.0, %v3025_v7 }
 0xaa3   : > { %v3030_v36 = vsub.f32 1.0, %v3026_v12 }
 0xaa4   : > { %v3031_v55 = vsel %vm3027_vm15, %v3025_v7, %v3029_v18 }
 0xaa5   : > { %v3033_v46 = vmul.f32 %v3031_v55, %v5970_v50  ;;  %v3032_v47 = vsel %vm3028_vm0, %v3026_v12, %v3030_v36 }
 0xaa6   : > { %v3034_v43 = vmul.f32 %v3032_v47, %v5970_v50 }
 0xaa7   : > { %v3035_v20 = vmax.f32 %v3033_v46, 0.0 }
 0xaa8   : > { %v3036_v21 = vmax.f32 %v3034_v43, 0.0  ;;  %4530 = vmatmul.mubr.msk.bf16.gmra.mrb[96].mxu0 %vm1320_vm2, %v6457_v30 }
 0xaa9   : > { %v3040_v27 = vsub.f32 0.0, %v3035_v20  ;;  %3494 = vmatprep.mubr.bf16.mxu0 %v6871_v19 }
 0xaaa   : > { %v3041_v0 = vsub.f32 0.0, %v3036_v21 }
 0xaab   : > { %v3042_v4 = vmul.f32 %v3040_v27, %v3038_v9 }
 0xaac   : > { %v3043_v39 = vmul.f32 %v3041_v0, %v3039_v58 }
 0xaad   : > { %v3044_v32 = vmul.f32 1.442695, %v3042_v4 }
 0xaae   : > { %v3046_v17 = vmul.f32 1.442695, %v3043_v39 }
 0xaaf   : > { %4691 = vpow2.f32 %v3044_v32 }
 0xab0   : > { %4693 = vpow2.f32 %v3046_v17 }
 0xab9   : > { %v4692_v52 = vpop.eup %4691 }
 0xaba   : > { %v4694_v48 = vpop.eup %4693  ;;  %v3048_v51 = vsub.f32 1.0, %v4692_v52 }
 0xabb   : > { %v3049_v7 = vsub.f32 1.0, %v4694_v48 }
 0xabc   : > { %v6463_v12 = vmul.f32 %v3048_v51, %v6362_v63  ;;  %v3052_v18 = vsub.f32 1.0, %v3048_v51 }
 0xabd   : > { %v6466_v36 = vmul.f32 %v3049_v7, %v6365_v59  ;;  %v3053_v55 = vsub.f32 1.0, %v3049_v7 }
 0xabe   : > { %v3054_v6 = vadd.f32 1e-10, %v3052_v18 }
 0xabf   : > { %v3055_v46 = vadd.f32 1e-10, %v3053_v55 }
 0xac0   : > { %v6469_v47 = vmul.f32 %v3054_v6, %v6362_v63 }
 0xac1   : > { %v6472_v43 = vmul.f32 %v3055_v46, %v6365_v59 }
 0xb63   : > { %v3128_v20 = vpop.f32.mrb[84].mxu0 }
 0xb64   : > { %v3129_v9 = vadd.f32 %v3128_v20, %v5947_v28  ;;  %v3130_v21 = vpop.f32.mrb[85].mxu0 }
 0xb65   : > { %v3131_v58 = vadd.f32 %v3130_v21, %v5947_v28  ;;  %v3132_v27 = vpop.f32.mrb[86].mxu0 }
 0xb66   : > { %v3133_v0 = vadd.f32 %v3132_v27, %v6042_v57  ;;  %v3134_v4 = vpop.f32.mrb[87].mxu0  ;;  %v3147_v32 = vmax.f32 %v3129_v9, 0.0 }
 0xb67   : > { %v3135_v39 = vadd.f32 %v3134_v4, %v6042_v57  ;;  %v3148_v52 = vmax.f32 %v3131_v58, 0.0 }
 0xb68   : > { %v3149_v17 = vmax.f32 %v3133_v0, 0.0 }
 0xb69   : > { %v3150_v63 = vmax.f32 %v3135_v39, 0.0 }
 0xb6a   : > { %v3155_v48 = vpack.c.bf16 %v3149_v17, %v3147_v32 }
 0xb6b   : > { %v3156_v51 = vpack.c.bf16 %v3150_v63, %v3148_v52  ;;  %v3138_v59 = vpop.f32.mrb[88].mxu0 }
 0xb6c   : > { %v3139_v7 = vadd.f32 %v3138_v59, %v5957_v42  ;;  %v3140_v18 = vpop.f32.mrb[89].mxu0 }
 0xb6d   : > { %v3141_v55 = vadd.f32 %v3140_v18, %v5957_v42  ;;  %v3142_v6 = vpop.f32.mrb[90].mxu0  ;;  %3159 = vmatprep.subr.bf16.mxu1 %v3156_v51 }
 0xb6e   : > { %v3143_v46 = vadd.f32 %v3142_v6, %v6048_v16  ;;  %v3144_v20 = vpop.f32.mrb[91].mxu0  ;;  %3160 = vmatpush1.bf16.msra.mxu1 %v3155_v48  ;;  %v3151_v9 = vmax.f32 %v3139_v7, 0.0 }
 0xb6f   : > { %v3145_v21 = vadd.f32 %v3144_v20, %v6048_v16  ;;  %v3152_v58 = vmax.f32 %v3141_v55, 0.0 }
 0xb70   : > { %v3153_v27 = vmax.f32 %v3143_v46, 0.0 }
 0xb71   : > { %v3154_v0 = vmax.f32 %v3145_v21, 0.0 }
 0xb72   : > { %v3157_v4 = vpack.c.bf16 %v3153_v27, %v3151_v9 }
 0xb73   : > { %v3158_v39 = vpack.c.bf16 %v3154_v0, %v3152_v58  ;;  %v3289_v32 = vpop.f32.mrb[92].mxu0 }
 0xb74   : > { %v3290_v17 = vadd.f32 %v3289_v32, %v6953_v53  ;;  %v3291_v52 = vpop.f32.mrb[93].mxu0 }
 0xb75   : > { %v3292_v63 = vadd.f32 %v3291_v52, %v6953_v53  ;;  %3161 = vmatprep.subr.bf16.mxu1 %v3158_v39  ;;  %v3293_v51 = vpop.f32.mrb[94].mxu0 }
 0xb76   : > { %v3294_v59 = vadd.f32 %v3293_v51, %v6954_v40  ;;  %3162 = vmatpush1.bf16.msra.mxu1 %v3157_v4  ;;  %v3295_v48 = vpop.f32.mrb[95].mxu0  ;;  %v3308_v7 = vmax.f32 %v3290_v17, 0.0 }
 0xb77   : > { %v3296_v18 = vadd.f32 %v3295_v48, %v6954_v40  ;;  %v3309_v55 = vmax.f32 %v3292_v63, 0.0 }
 0xb78   : > { %v3310_v6 = vmax.f32 %v3294_v59, 0.0 }
 0xb79   : > { %v3311_v46 = vmax.f32 %v3296_v18, 0.0  ;;  %4524 = vmatmul.mubr.msk.bf16.vlgmr.msra.gmra.mrb[96].mxu1 %vm1320_vm2, %v6382_v45 }
 0xb7a   : > { %v3316_v20 = vpack.c.bf16 %v3310_v6, %v3308_v7  ;;  %3352 = vmatprep.mubr.bf16.mxu1 %v6871_v19 }
 0xb7b   : > { %v3317_v21 = vpack.c.bf16 %v3311_v46, %v3309_v55  ;;  %v3299_v9 = vpop.f32.mrb[96].mxu0 }
 0xb7c   : > { %v3300_v27 = vadd.f32 %v3299_v9, %v6955_v54  ;;  %v3301_v58 = vpop.f32.mrb[97].mxu0 }
 0xb7d   : > { %v3302_v0 = vadd.f32 %v3301_v58, %v6955_v54  ;;  %v3303_v4 = vpop.f32.mrb[98].mxu0  ;;  %3320 = vmatprep.subr.bf16.mxu1 %v3317_v21 }
 0xb7e   : > { %v3304_v39 = vadd.f32 %v3303_v4, %v6956_v8  ;;  %v3305_v32 = vpop.f32.mrb[99].mxu0  ;;  %3321 = vmatpush1.bf16.msra.mxu1 %v3316_v20  ;;  %v3312_v52 = vmax.f32 %v3300_v27, 0.0 }
 0xb7f   : > { %v3306_v17 = vadd.f32 %v3305_v32, %v6956_v8  ;;  %v3313_v51 = vmax.f32 %v3302_v0, 0.0 }
 0xb80   : > { %v3314_v63 = vmax.f32 %v3304_v39, 0.0 }
 0xb81   : > { %v3315_v59 = vmax.f32 %v3306_v17, 0.0 }
 0xb82   : > { %v3318_v48 = vpack.c.bf16 %v3314_v63, %v3312_v52  ;;  %v7015_v52 = vld [vmem:[#allocation71_spill] sm:$0xff] }
 0xb83   : > { %v3319_v18 = vpack.c.bf16 %v3315_v59, %v3313_v51 }
 0xb85   : > { %3322 = vmatprep.subr.bf16.mxu1 %v3319_v18 }
 0xb86   : > { %3323 = vmatpush1.bf16.msra.mxu1 %v3318_v48  ;;  %v7016_v48 = vld [vmem:[#allocation73_spill] sm:$0xff] }
 0xb89   : > { %4531 = vmatmul.mubr.msk.bf16.vlgmr.msra.gmra.mrb[100].mxu1 %vm1320_vm2, %v6272_v62 }
 0xb8a   : > { %3362 = vmatprep.mubr.bf16.mxu1 %v6871_v19 }
 0xb91   : > { %4532 = vmatmul.mubr.msk.bf16.gmra.mrb[104].mxu1 %vm1320_vm2, %v6280_v24 }
 0xb92   : > { %3372 = vmatprep.mubr.bf16.mxu1 %v6871_v19 }
 0xb99   : > { %4533 = vmatmul.mubr.msk.bf16.gmra.mrb[108].mxu1 %vm1320_vm2, %v6288_v5 }
 0xb9a   : > { %3559 = vmatprep.mubr.bf16.mxu1 %v6871_v19 }
 0xc4c   : > { %v3193_v7 = vpop.f32.mrb[96].mxu1 }
 0xc4d   : > { %v3194_v6 = vadd.f32 %v3193_v7, %v6074_v44  ;;  %v3195_v55 = vpop.f32.mrb[97].mxu1 }
 0xc4e   : > { %v3196_v46 = vadd.f32 %v3195_v55, %v6074_v44  ;;  %v3197_v20 = vpop.f32.mrb[98].mxu1 }
 0xc4f   : > { %v4525_v62 = vmul.f32 -1.442695, %v3194_v6  ;;  %v3198_v21 = vpop.f32.mrb[99].mxu1  ;;  %v7017_v6 = vld [vmem:[#allocation74_spill] sm:$0xff] }
 0xc50   : > { %v4526_v9 = vmul.f32 -1.442695, %v3196_v46  ;;  %v7018_v46 = vld [vmem:[#allocation75_spill] sm:$0xff] }
 0xc51   : > { %4695 = vpow2.f32 %v4525_v62 }
 0xc52   : > { %4697 = vpow2.f32 %v4526_v9 }
 0xc5b   : > { %v4696_v24 = vpop.eup %4695 }
 0xc5c   : > { %v4698_v27 = vpop.eup %4697  ;;  %v3206_v58 = vadd.f32 1.0, %v4696_v24  ;;  %v3354_v0 = vpop.f32.mrb[100].mxu1 }
 0xc5d   : > { %v3207_v4 = vadd.f32 1.0, %v4698_v27  ;;  %v3355_v5 = vadd.f32 %v3354_v0, %v5440_v22  ;;  %v3356_v39 = vpop.f32.mrb[101].mxu1 }
 0xc5e   : > { %4699 = vrcp.f32 %v3206_v58  ;;  %v3357_v32 = vadd.f32 %v3356_v39, %v5440_v22  ;;  %v3358_v17 = vpop.f32.mrb[102].mxu1 }
 0xc5f   : > { %4701 = vrcp.f32 %v3207_v4  ;;  %v3442_v63 = vadd.f32 %v7015_v52, %v3355_v5  ;;  %v3359_v51 = vadd.f32 %v3358_v17, %v5478_v35  ;;  %v3360_v59 = vpop.f32.mrb[103].mxu1  ;;  %v7019_v52 = vld [vmem:[#allocation76_spill] sm:$0xff] }
 0xc60   : > { %v3443_v18 = vadd.f32 %v7016_v48, %v3357_v32  ;;  %v3361_v7 = vadd.f32 %v3360_v59, %v5478_v35  ;;  %v3215_v32 = vrot.slane %v6463_v12, %v6099_v33 }
 0xc61   : > { %v3444_v55 = vadd.f32 %v7017_v6, %v3359_v51  ;;  %v3450_v62 = vmax.f32 %v3442_v63, 0.0 }
 0xc62   : > { %v3445_v20 = vadd.f32 %v7018_v46, %v3361_v7  ;;  %v3451_v9 = vmax.f32 %v3443_v18, 0.0  ;;  %v3219_v18 = vrot.slane %v6466_v36, %v6099_v33  ;;  %v7020_v7 = vld [vmem:[#allocation77_spill] sm:$0xff] }
 0xc63   : > { %v3452_v21 = vmax.f32 %v3444_v55, 0.0 }
 0xc64   : > { %v3453_v24 = vmax.f32 %v3445_v20, 0.0  ;;  %v3364_v27 = vpop.f32.mrb[104].mxu1 }
 0xc65   : > { %v3458_v58 = vpack.c.bf16 %v3452_v21, %v3450_v62  ;;  %v3365_v0 = vadd.f32 %v3364_v27, %v5938_v38  ;;  %v3366_v4 = vpop.f32.mrb[105].mxu1  ;;  %v7021_v62 = vld [vmem:[#allocation13_spill] sm:$0xff] }
 0xc66   : > { %v3367_v5 = vadd.f32 %v3366_v4, %v5938_v38  ;;  %v3368_v39 = vpop.f32.mrb[106].mxu1  ;;  %v3459_v17 = vpack.c.bf16 %v3453_v24, %v3451_v9  ;;  %v7022_v9 = vld [vmem:[#allocation78_spill] sm:$0xff] }
 0xc67   : > { %v3446_v51 = vadd.f32 %v7019_v52, %v3365_v0  ;;  %v3369_v59 = vadd.f32 %v3368_v39, %v5954_v26  ;;  %v3370_v63 = vpop.f32.mrb[107].mxu1 }
 0xc68   : > { %v4700_v48 = vpop.eup %4699  ;;  %v3447_v6 = vadd.f32 %v7020_v7, %v3367_v5  ;;  %v3371_v55 = vadd.f32 %v3370_v63, %v5954_v26  ;;  %3462 = vmatprep.subr.bf16.mxu0 %v3459_v17 }
 0xc69   : > { %v4702_v46 = vpop.eup %4701  ;;  %v3220_v20 = vmul.f32 %v4700_v48, %v3215_v32  ;;  %v3448_v21 = vadd.f32 %v7021_v62, %v3369_v59  ;;  %3463 = vmatpush1.bf16.msra.mxu0 %v3458_v58  ;;  %v3454_v0 = vmax.f32 %v3446_v51, 0.0 }
 0xc6a   : > { %v3221_v12 = vmul.f32 %v4702_v46, %v3219_v18  ;;  %v3449_v24 = vadd.f32 %v7022_v9, %v3371_v55  ;;  %v3455_v5 = vmax.f32 %v3447_v6, 0.0 }
 0xc6b   : > { %v6525_v27 = vadd.f32 %v3220_v20, %v6423_v2  ;;  %v3456_v4 = vmax.f32 %v3448_v21, 0.0 }
 0xc6c   : > { %v6528_v36 = vadd.f32 %v3221_v12, %v6426_v34  ;;  %v3457_v39 = vmax.f32 %v3449_v24, 0.0  ;;  %v3374_v52 = vpop.f32.mrb[108].mxu1  ;;  %v3405_v24 = vstv %s4528_s28 }
 0xc6d   : > { %v3460_v17 = vpack.c.bf16 %v3456_v4, %v3454_v0  ;;  %v3375_v32 = vadd.f32 %v3374_v52, %v5966_v56  ;;  %v3376_v63 = vpop.f32.mrb[109].mxu1 }
 0xc6e   : > { %v3377_v58 = vadd.f32 %v3376_v63, %v5966_v56  ;;  %v3461_v59 = vpack.c.bf16 %v3457_v39, %v3455_v5  ;;  %v3378_v48 = vpop.f32.mrb[110].mxu1  ;;  %v3406_v39 = vmul.f32 %v3405_v24, %v6031_v10 }
 0xc6f   : > { %v3381_v18 = vsub.f32 0.0, %v3375_v32  ;;  %v3379_v7 = vpop.f32.mrb[111].mxu1 }
 0xc70   : > { %v3382_v2 = vsub.f32 0.0, %v3377_v58  ;;  %3464 = vmatprep.subr.bf16.mxu0 %v3461_v59 }
 0xc71   : > { %v3383_v51 = vmul.f32 %v3381_v18, %v5970_v50  ;;  %3465 = vmatpush1.bf16.msra.mxu0 %v3460_v17  ;;  %v3407_v17 = vmul.f32 %v3405_v24, %v6036_v60 }
 0xc72   : > { %v3384_v34 = vmul.f32 %v3382_v2, %v5970_v50  ;;  %3623 = vmatprep.subr.bf16.mxu0 %v5776_v15 }
 0xc73   : > { %v3385_v6 = vand.u32 2147483647, %v3383_v51  ;;  %vm3395_vm1 = vcmp.le.f32.partialorder %v3383_v51, 0.0 }
 0xc74   : > { %v3386_v55 = vand.u32 2147483647, %v3384_v34  ;;  %4534 = vmatmul.mubr.msk.bf16.vlgmr.msra.gmra.mrb[100].mxu0 %vm1320_vm2, %v6329_v3  ;;  %vm3396_vm3 = vcmp.le.f32.partialorder %v3384_v34, 0.0 }
 0xc75   : > { %v3387_v46 = vsub.f32 0.0, %v3385_v6  ;;  %3624 = vmatpush1.bf16.msra.mxu0 %v5780_v25  ;;  %3504 = vmatprep.mubr.bf16.mxu0 %v6871_v19 }
 0xc76   : > { %v3388_v20 = vsub.f32 0.0, %v3386_v55  ;;  %3625 = vmatprep.subr.bf16.mxu0 %v5784_v13 }
 0xc77   : > { %v3389_v62 = vmul.f32 1.442695, %v3387_v46 }
 0xc78   : > { %v3391_v21 = vmul.f32 1.442695, %v3388_v20 }
 0xc79   : > { %4703 = vpow2.f32 %v3389_v62  ;;  %3626 = vmatpush1.bf16.msra.mxu0 %v5793_v61 }
 0xc7a   : > { %4705 = vpow2.f32 %v3391_v21 }
 0xc7c   : > { %4535 = vmatmul.mubr.msk.bf16.gmra.mrb[104].mxu0 %vm1320_vm2, %v6340_v49 }
 0xc7d   : > { %3655 = vmatprep.mubr.bf16.mxu0 %v6871_v19 }
 0xc83   : > { %v4704_v15 = vpop.eup %4703 }
 0xc84   : > { %v4706_v3 = vpop.eup %4705  ;;  %v3393_v25 = vmul.f32 0.5, %v4704_v15  ;;  %4541 = vmatmul.mubr.msk.bf16.vlgmr.msra.gmra.mrb[108].mxu0 %vm1320_vm2, %v6445_v37 }
 0xc85   : > { %v3394_v12 = vmul.f32 0.5, %v4706_v3  ;;  %3665 = vmatprep.mubr.bf16.mxu0 %v6871_v19 }
 0xc86   : > { %v3397_v13 = vsub.f32 1.0, %v3393_v25 }
 0xc87   : > { %v3398_v9 = vsub.f32 1.0, %v3394_v12 }
 0xc88   : > { %v3399_v61 = vsel %vm3395_vm1, %v3393_v25, %v3397_v13 }
 0xc89   : > { %v3401_v49 = vmul.f32 %v3399_v61, %v5970_v50  ;;  %v3400_v0 = vsel %vm3396_vm3, %v3394_v12, %v3398_v9 }
 0xc8a   : > { %v3402_v4 = vmul.f32 %v3400_v0, %v5970_v50 }
 0xc8b   : > { %v3403_v5 = vmax.f32 %v3401_v49, 0.0 }
 0xc8c   : > { %v3404_v52 = vmax.f32 %v3402_v4, 0.0  ;;  %4542 = vmatmul.mubr.msk.bf16.gmra.mrb[112].mxu0 %vm1320_vm2, %v6457_v30 }
 0xc8d   : > { %v3408_v32 = vsub.f32 0.0, %v3403_v5  ;;  %3862 = vmatprep.mubr.bf16.mxu0 %v6871_v19 }
 0xc8e   : > { %v3409_v63 = vsub.f32 0.0, %v3404_v52 }
 0xc8f   : > { %v3410_v58 = vmul.f32 %v3408_v32, %v3406_v39 }
 0xc90   : > { %v3411_v59 = vmul.f32 %v3409_v63, %v3407_v17 }
 0xc91   : > { %v3412_v48 = vmul.f32 1.442695, %v3410_v58 }
 0xc92   : > { %v3414_v18 = vmul.f32 1.442695, %v3411_v59 }
 0xc93   : > { %4707 = vpow2.f32 %v3412_v48 }
 0xc94   : > { %4709 = vpow2.f32 %v3414_v18 }
 0xc9d   : > { %v4708_v7 = vpop.eup %4707 }
 0xc9e   : > { %v4710_v2 = vpop.eup %4709  ;;  %v3416_v51 = vsub.f32 1.0, %v4708_v7 }
 0xc9f   : > { %v3417_v34 = vsub.f32 1.0, %v4710_v2 }
 0xca0   : > { %v6555_v6 = vmul.f32 %v3416_v51, %v6469_v47  ;;  %v3420_v55 = vsub.f32 1.0, %v3416_v51 }
 0xca1   : > { %v6558_v46 = vmul.f32 %v3417_v34, %v6472_v43  ;;  %v3421_v20 = vsub.f32 1.0, %v3417_v34 }
 0xca2   : > { %v3422_v62 = vadd.f32 1e-10, %v3420_v55 }
 0xca3   : > { %v3423_v21 = vadd.f32 1e-10, %v3421_v20 }
 0xca4   : > { %v6561_v15 = vmul.f32 %v3422_v62, %v6469_v47 }
 0xca5   : > { %v6564_v3 = vmul.f32 %v3423_v21, %v6472_v43 }
 0xd47   : > { %v3496_v25 = vpop.f32.mrb[100].mxu0 }
 0xd48   : > { %v3497_v12 = vadd.f32 %v3496_v25, %v5947_v28  ;;  %v3498_v13 = vpop.f32.mrb[101].mxu0 }
 0xd49   : > { %v3499_v9 = vadd.f32 %v3498_v13, %v5947_v28  ;;  %v3500_v61 = vpop.f32.mrb[102].mxu0 }
 0xd4a   : > { %v3501_v24 = vadd.f32 %v3500_v61, %v6042_v57  ;;  %v3502_v49 = vpop.f32.mrb[103].mxu0  ;;  %v3515_v4 = vmax.f32 %v3497_v12, 0.0 }
 0xd4b   : > { %v3503_v0 = vadd.f32 %v3502_v49, %v6042_v57  ;;  %v3516_v39 = vmax.f32 %v3499_v9, 0.0 }
 0xd4c   : > { %v3517_v5 = vmax.f32 %v3501_v24, 0.0 }
 0xd4d   : > { %v3518_v47 = vmax.f32 %v3503_v0, 0.0 }
 0xd4e   : > { %v3523_v52 = vpack.c.bf16 %v3517_v5, %v3515_v4 }
 0xd4f   : > { %v3524_v17 = vpack.c.bf16 %v3518_v47, %v3516_v39  ;;  %v3506_v43 = vpop.f32.mrb[104].mxu0 }
 0xd50   : > { %v3507_v32 = vadd.f32 %v3506_v43, %v5957_v42  ;;  %v3508_v63 = vpop.f32.mrb[105].mxu0 }
 0xd51   : > { %v3509_v58 = vadd.f32 %v3508_v63, %v5957_v42  ;;  %v3510_v59 = vpop.f32.mrb[106].mxu0  ;;  %3527 = vmatprep.subr.bf16.mxu1 %v3524_v17 }
 0xd52   : > { %v3511_v48 = vadd.f32 %v3510_v59, %v6048_v16  ;;  %v3512_v18 = vpop.f32.mrb[107].mxu0  ;;  %3528 = vmatpush1.bf16.msra.mxu1 %v3523_v52  ;;  %v3519_v2 = vmax.f32 %v3507_v32, 0.0 }
 0xd53   : > { %v3513_v7 = vadd.f32 %v3512_v18, %v6048_v16  ;;  %v3520_v34 = vmax.f32 %v3509_v58, 0.0 }
 0xd54   : > { %v3521_v51 = vmax.f32 %v3511_v48, 0.0 }
 0xd55   : > { %v3522_v55 = vmax.f32 %v3513_v7, 0.0 }
 0xd56   : > { %v3525_v20 = vpack.c.bf16 %v3521_v51, %v3519_v2 }
 0xd57   : > { %v3526_v62 = vpack.c.bf16 %v3522_v55, %v3520_v34  ;;  %v3657_v21 = vpop.f32.mrb[108].mxu0 }
 0xd58   : > { %v3658_v25 = vadd.f32 %v3657_v21, %v6953_v53  ;;  %v3659_v12 = vpop.f32.mrb[109].mxu0  ;;  %v6604_v21 = vld [vmem:[%s6791_s9 + $0x10] ss:$0 sps:$4 sm:$0x11]  }
 0xd59   : > { %v3660_v13 = vadd.f32 %v3659_v12, %v6953_v53  ;;  %3529 = vmatprep.subr.bf16.mxu1 %v3526_v62  ;;  %v3661_v9 = vpop.f32.mrb[110].mxu0  ;;  %v6596_v62 = vld [vmem:[%s6791_s9 + $0x8] sm:$0xff]  }
 0xd5a   : > { %v3662_v61 = vadd.f32 %v3661_v9, %v6954_v40  ;;  %3530 = vmatpush1.bf16.msra.mxu1 %v3525_v20  ;;  %v3663_v24 = vpop.f32.mrb[111].mxu0  ;;  %v3676_v0 = vmax.f32 %v3658_v25, 0.0  ;;  %v6588_v20 = vld [vmem:[%s6791_s9] sm:$0xff]  }
 0xd5b   : > { %v3664_v49 = vadd.f32 %v3663_v24, %v6954_v40  ;;  %v3677_v5 = vmax.f32 %v3660_v13, 0.0 }
 0xd5c   : > { %v3678_v4 = vmax.f32 %v3662_v61, 0.0 }
 0xd5d   : > { %v3679_v39 = vmax.f32 %v3664_v49, 0.0  ;;  %4536 = vmatmul.mubr.msk.bf16.vlgmr.msra.gmra.mrb[112].mxu1 %vm1320_vm2, %v6382_v45 }
 0xd5e   : > { %v3684_v47 = vpack.c.bf16 %v3678_v4, %v3676_v0  ;;  %3720 = vmatprep.mubr.bf16.mxu1 %v6871_v19 }
 0xd5f   : > { %v3685_v52 = vpack.c.bf16 %v3679_v39, %v3677_v5  ;;  %v3667_v17 = vpop.f32.mrb[112].mxu0 }
 0xd60   : > { %v3668_v43 = vadd.f32 %v3667_v17, %v6955_v54  ;;  %v3669_v32 = vpop.f32.mrb[113].mxu0 }
 0xd61   : > { %v3670_v63 = vadd.f32 %v3669_v32, %v6955_v54  ;;  %v3671_v58 = vpop.f32.mrb[114].mxu0  ;;  %3688 = vmatprep.subr.bf16.mxu1 %v3685_v52 }
 0xd62   : > { %v3672_v59 = vadd.f32 %v3671_v58, %v6956_v8  ;;  %v3673_v48 = vpop.f32.mrb[115].mxu0  ;;  %3689 = vmatpush1.bf16.msra.mxu1 %v3684_v47  ;;  %v3680_v7 = vmax.f32 %v3668_v43, 0.0 }
 0xd63   : > { %v3674_v18 = vadd.f32 %v3673_v48, %v6956_v8  ;;  %v3681_v2 = vmax.f32 %v3670_v63, 0.0 }
 0xd64   : > { %v3682_v45 = vmax.f32 %v3672_v59, 0.0 }
 0xd65   : > { %v3683_v51 = vmax.f32 %v3674_v18, 0.0 }
 0xd66   : > { %v3686_v34 = vpack.c.bf16 %v3682_v45, %v3680_v7 }
 0xd67   : > { %v3687_v55 = vpack.c.bf16 %v3683_v51, %v3681_v2 }
 0xd69   : > { %3690 = vmatprep.subr.bf16.mxu1 %v3687_v55 }
 0xd6a   : > { %3691 = vmatpush1.bf16.msra.mxu1 %v3686_v34 }
 0xd6d   : > { %4543 = vmatmul.mubr.msk.bf16.vlgmr.msra.gmra.mrb[116].mxu1 %vm1320_vm2, %v6588_v20 }
 0xd6e   : > { %3730 = vmatprep.mubr.bf16.mxu1 %v6871_v19 }
 0xd75   : > { %4544 = vmatmul.mubr.msk.bf16.gmra.mrb[120].mxu1 %vm1320_vm2, %v6596_v62 }
 0xd76   : > { %3740 = vmatprep.mubr.bf16.mxu1 %v6871_v19 }
 0xd7d   : > { %4545 = vmatmul.mubr.msk.bf16.gmra.mrb[124].mxu1 %vm1320_vm2, %v6604_v21 }
 0xd7e   : > { %3927 = vmatprep.mubr.bf16.mxu1 %v6871_v19 }
 0xe30   : > { %v3561_v25 = vpop.f32.mrb[112].mxu1 }
 0xe31   : > { %v3562_v12 = vadd.f32 %v3561_v25, %v6074_v44  ;;  %v3563_v13 = vpop.f32.mrb[113].mxu1 }
 0xe32   : > { %v3564_v9 = vadd.f32 %v3563_v13, %v6074_v44  ;;  %v3565_v61 = vpop.f32.mrb[114].mxu1 }
 0xe33   : > { %v4537_v24 = vmul.f32 -1.442695, %v3562_v12  ;;  %v3566_v49 = vpop.f32.mrb[115].mxu1 }
 0xe34   : > { %v4538_v0 = vmul.f32 -1.442695, %v3564_v9 }
 0xe35   : > { %4711 = vpow2.f32 %v4537_v24 }
 0xe36   : > { %4713 = vpow2.f32 %v4538_v0 }
 0xe3f   : > { %v4712_v4 = vpop.eup %4711 }
 0xe40   : > { %v4714_v5 = vpop.eup %4713  ;;  %v3574_v39 = vadd.f32 1.0, %v4712_v4  ;;  %v3722_v47 = vpop.f32.mrb[116].mxu1 }
 0xe41   : > { %v3575_v52 = vadd.f32 1.0, %v4714_v5  ;;  %v3723_v17 = vadd.f32 %v3722_v47, %v5440_v22  ;;  %v3724_v43 = vpop.f32.mrb[117].mxu1  ;;  %v3587_v5 = vrot.slane %v6558_v46, %v6099_v33 }
 0xe42   : > { %4715 = vrcp.f32 %v3574_v39  ;;  %v3725_v32 = vadd.f32 %v3724_v43, %v5440_v22  ;;  %v3726_v63 = vpop.f32.mrb[118].mxu1 }
 0xe43   : > { %4717 = vrcp.f32 %v3575_v52  ;;  %v3810_v58 = vadd.f32 %v5787_v29, %v3723_v17  ;;  %v3727_v59 = vadd.f32 %v3726_v63, %v5478_v35  ;;  %v3728_v48 = vpop.f32.mrb[119].mxu1 }
 0xe44   : > { %v3811_v18 = vadd.f32 %v5796_v11, %v3725_v32  ;;  %v3729_v7 = vadd.f32 %v3728_v48, %v5478_v35  ;;  %v3583_v11 = vrot.slane %v6555_v6, %v6099_v33  ;;  %v7023_v32 = vld [vmem:[#allocation14_spill] sm:$0xff] }
 0xe45   : > { %v3812_v45 = vadd.f32 %v5803_v23, %v3727_v59  ;;  %v3818_v51 = vmax.f32 %v3810_v58, 0.0 }
 0xe46   : > { %v3813_v2 = vadd.f32 %v5806_v41, %v3729_v7  ;;  %v3819_v55 = vmax.f32 %v3811_v18, 0.0 }
 0xe47   : > { %v3820_v34 = vmax.f32 %v3812_v45, 0.0 }
 0xe48   : > { %v3821_v25 = vmax.f32 %v3813_v2, 0.0  ;;  %v3732_v12 = vpop.f32.mrb[120].mxu1 }
 0xe49   : > { %v3826_v13 = vpack.c.bf16 %v3820_v34, %v3818_v51  ;;  %v3733_v9 = vadd.f32 %v3732_v12, %v5938_v38  ;;  %v3734_v29 = vpop.f32.mrb[121].mxu1 }
 0xe4a   : > { %v3735_v61 = vadd.f32 %v3734_v29, %v5938_v38  ;;  %v3736_v24 = vpop.f32.mrb[122].mxu1  ;;  %v3827_v49 = vpack.c.bf16 %v3821_v25, %v3819_v55 }
 0xe4b   : > { %v3814_v23 = vadd.f32 %v5813_v31, %v3733_v9  ;;  %v3737_v41 = vadd.f32 %v3736_v24, %v5954_v26  ;;  %v3738_v0 = vpop.f32.mrb[123].mxu1 }
 0xe4c   : > { %v4716_v4 = vpop.eup %4715  ;;  %v3815_v39 = vadd.f32 %v5816_v1, %v3735_v61  ;;  %v3739_v47 = vadd.f32 %v3738_v0, %v5954_v26  ;;  %3830 = vmatprep.subr.bf16.mxu0 %v3827_v49  ;;  %v6645_v61 = vld [vmem:[%s6796_s14] sm:$0xff]   ;;  %v7025_v49 = vld [vmem:[#allocation80_spill] sm:$0xff] }
 0xe4d   : > { %v4718_v52 = vpop.eup %4717  ;;  %v3588_v17 = vmul.f32 %v4716_v4, %v3583_v11  ;;  %v3816_v43 = vadd.f32 %v5823_v14, %v3737_v41  ;;  %3831 = vmatpush1.bf16.msra.mxu0 %v3826_v13  ;;  %v3822_v58 = vmax.f32 %v3814_v23, 0.0  ;;  %v7024_v13 = vld [vmem:[#allocation79_spill] sm:$0xff]  ;;  %v7026_v23 = vld [vmem:[#allocation81_spill] sm:$0xff] }
 0xe4e   : > { %v3589_v6 = vmul.f32 %v4718_v52, %v3587_v5  ;;  %v3817_v31 = vadd.f32 %v7023_v32, %v3739_v47  ;;  %v3823_v1 = vmax.f32 %v3815_v39, 0.0  ;;  %v7027_v4 = vld [vmem:[#allocation83_spill] sm:$0xff]  ;;  %v6656_v5 = vld [vmem:[%s6796_s14 + $0x8] sm:$0xff]  }
 0xe4f   : > { %v6632_v63 = vadd.f32 %v3588_v17, %v6525_v27  ;;  %v3824_v59 = vmax.f32 %v3816_v43, 0.0 }
 0xe50   : > { %v6635_v46 = vadd.f32 %v3589_v6, %v6528_v36  ;;  %v3825_v48 = vmax.f32 %v3817_v31, 0.0  ;;  %v3742_v18 = vpop.f32.mrb[124].mxu1  ;;  %v3773_v31 = vstv %s4540_s26 }
 0xe51   : > { %v3828_v7 = vpack.c.bf16 %v3824_v59, %v3822_v58  ;;  %v3743_v45 = vadd.f32 %v3742_v18, %v5966_v56  ;;  %v3744_v2 = vpop.f32.mrb[125].mxu1  ;;  %v3774_v18 = vmul.f32 %v3773_v31, %v6031_v10 }
 0xe52   : > { %v3745_v14 = vadd.f32 %v3744_v2, %v5966_v56  ;;  %v3829_v51 = vpack.c.bf16 %v3825_v48, %v3823_v1  ;;  %v3746_v34 = vpop.f32.mrb[126].mxu1 }
 0xe53   : > { %v3749_v55 = vsub.f32 0.0, %v3743_v45  ;;  %v3747_v25 = vpop.f32.mrb[127].mxu1 }
 0xe54   : > { %v3750_v27 = vsub.f32 0.0, %v3745_v14  ;;  %3832 = vmatprep.subr.bf16.mxu0 %v3829_v51 }
 0xe55   : > { %v3751_v12 = vmul.f32 %v3749_v55, %v5970_v50  ;;  %3833 = vmatpush1.bf16.msra.mxu0 %v3828_v7 }
 0xe56   : > { %v3752_v36 = vmul.f32 %v3750_v27, %v5970_v50  ;;  %3991 = vmatprep.subr.bf16.mxu0 %v7024_v13 }
 0xe57   : > { %v3753_v9 = vand.u32 2147483647, %v3751_v12  ;;  %vm3763_vm4 = vcmp.le.f32.partialorder %v3751_v12, 0.0 }
 0xe58   : > { %v3754_v29 = vand.u32 2147483647, %v3752_v36  ;;  %4546 = vmatmul.mubr.msk.bf16.vlgmr.msra.gmra.mrb[116].mxu0 %vm1320_vm2, %v6645_v61  ;;  %vm3764_vm5 = vcmp.le.f32.partialorder %v3752_v36, 0.0 }
 0xe59   : > { %v3755_v24 = vsub.f32 0.0, %v3753_v9  ;;  %3992 = vmatpush1.bf16.msra.mxu0 %v7025_v49  ;;  %3872 = vmatprep.mubr.bf16.mxu0 %v6871_v19 }
 0xe5a   : > { %v3756_v11 = vsub.f32 0.0, %v3754_v29  ;;  %3993 = vmatprep.subr.bf16.mxu0 %v7026_v23 }
 0xe5b   : > { %v3757_v41 = vmul.f32 1.442695, %v3755_v24 }
 0xe5c   : > { %v3759_v0 = vmul.f32 1.442695, %v3756_v11 }
 0xe5d   : > { %4719 = vpow2.f32 %v3757_v41  ;;  %3994 = vmatpush1.bf16.msra.mxu0 %v7027_v4 }
 0xe5e   : > { %4721 = vpow2.f32 %v3759_v0 }
 0xe60   : > { %4547 = vmatmul.mubr.msk.bf16.gmra.mrb[120].mxu0 %vm1320_vm2, %v6656_v5 }
 0xe61   : > { %4023 = vmatprep.mubr.bf16.mxu0 %v6871_v19 }
 0xe67   : > { %v4720_v39 = vpop.eup %4719 }
 0xe68   : > { %v4722_v47 = vpop.eup %4721  ;;  %v3761_v52 = vmul.f32 0.5, %v4720_v39  ;;  %4553 = vmatmul.mubr.msk.bf16.vlgmr.msra.gmra.mrb[124].mxu0 %vm1320_vm2, %v6445_v37  ;;  %v3775_v37 = vmul.f32 %v3773_v31, %v6036_v60 }
 0xe69   : > { %v3762_v17 = vmul.f32 0.5, %v4722_v47  ;;  %4033 = vmatprep.mubr.bf16.mxu0 %v6871_v19 }
 0xe6a   : > { %v3765_v43 = vsub.f32 1.0, %v3761_v52 }
 0xe6b   : > { %v3766_v6 = vsub.f32 1.0, %v3762_v17 }
 0xe6c   : > { %v3767_v32 = vsel %vm3763_vm4, %v3761_v52, %v3765_v43 }
 0xe6d   : > { %v3769_v58 = vmul.f32 %v3767_v32, %v5970_v50  ;;  %v3768_v59 = vsel %vm3764_vm5, %v3762_v17, %v3766_v6 }
 0xe6e   : > { %v3770_v1 = vmul.f32 %v3768_v59, %v5970_v50 }
 0xe6f   : > { %v3771_v48 = vmax.f32 %v3769_v58, 0.0 }
 0xe70   : > { %v3772_v7 = vmax.f32 %v3770_v1, 0.0  ;;  %4554 = vmatmul.mubr.msk.bf16.gmra.mrb[128].mxu0 %vm1320_vm2, %v6457_v30 }
 0xe71   : > { %v3776_v45 = vsub.f32 0.0, %v3771_v48  ;;  %4224 = vmatprep.mubr.bf16.mxu0 %v6871_v19 }
 0xe72   : > { %v3777_v2 = vsub.f32 0.0, %v3772_v7 }
 0xe73   : > { %v3778_v14 = vmul.f32 %v3776_v45, %v3774_v18 }
 0xe74   : > { %v3779_v51 = vmul.f32 %v3777_v2, %v3775_v37 }
 0xe75   : > { %v3780_v34 = vmul.f32 1.442695, %v3778_v14 }
 0xe76   : > { %v3782_v55 = vmul.f32 1.442695, %v3779_v51 }
 0xe77   : > { %4723 = vpow2.f32 %v3780_v34 }
 0xe78   : > { %4725 = vpow2.f32 %v3782_v55 }
 0xe81   : > { %v4724_v25 = vpop.eup %4723 }
 0xe82   : > { %v4726_v27 = vpop.eup %4725  ;;  %v3784_v12 = vsub.f32 1.0, %v4724_v25 }
 0xe83   : > { %v3785_v36 = vsub.f32 1.0, %v4726_v27 }
 0xe84   : > { %v6672_v13 = vmul.f32 %v3784_v12, %v6561_v15  ;;  %v3788_v9 = vsub.f32 1.0, %v3784_v12 }
 0xe85   : > { %v6675_v30 = vmul.f32 %v3785_v36, %v6564_v3  ;;  %v3789_v29 = vsub.f32 1.0, %v3785_v36 }
 0xe86   : > { %v3790_v24 = vadd.f32 1e-10, %v3788_v9 }
 0xe87   : > { %v3791_v49 = vadd.f32 1e-10, %v3789_v29 }
 0xe88   : > { %v6678_v11 = vmul.f32 %v3790_v24, %v6561_v15 }
 0xe89   : > { %v6681_v23 = vmul.f32 %v3791_v49, %v6564_v3 }
 0xf2b   : > { %v3864_v41 = vpop.f32.mrb[116].mxu0 }
 0xf2c   : > { %v3865_v0 = vadd.f32 %v3864_v41, %v5947_v28  ;;  %v3866_v4 = vpop.f32.mrb[117].mxu0 }
 0xf2d   : > { %v3867_v39 = vadd.f32 %v3866_v4, %v5947_v28  ;;  %v3868_v47 = vpop.f32.mrb[118].mxu0 }
 0xf2e   : > { %v3869_v52 = vadd.f32 %v3868_v47, %v6042_v57  ;;  %v3870_v17 = vpop.f32.mrb[119].mxu0  ;;  %v3883_v6 = vmax.f32 %v3865_v0, 0.0 }
 0xf2f   : > { %v3871_v43 = vadd.f32 %v3870_v17, %v6042_v57  ;;  %v3884_v31 = vmax.f32 %v3867_v39, 0.0  ;;  %v6698_v17 = vld [vmem:[%s6798_s16] sm:$0x3] }
 0xf30   : > { %v3885_v32 = vmax.f32 %v3869_v52, 0.0 }
 0xf31   : > { %v3886_v15 = vmax.f32 %v3871_v43, 0.0 }
 0xf32   : > { %v3891_v58 = vpack.c.bf16 %v3885_v32, %v3883_v6 }
 0xf33   : > { %v3892_v59 = vpack.c.bf16 %v3886_v15, %v3884_v31  ;;  %v3874_v3 = vpop.f32.mrb[120].mxu0 }
 0xf34   : > { %v3875_v1 = vadd.f32 %v3874_v3, %v5957_v42  ;;  %v3876_v48 = vpop.f32.mrb[121].mxu0 }
 0xf35   : > { %v3877_v18 = vadd.f32 %v3876_v48, %v5957_v42  ;;  %v3878_v7 = vpop.f32.mrb[122].mxu0  ;;  %3895 = vmatprep.subr.bf16.mxu1 %v3892_v59 }
 0xf36   : > { %v3879_v37 = vadd.f32 %v3878_v7, %v6048_v16  ;;  %v3880_v45 = vpop.f32.mrb[123].mxu0  ;;  %3896 = vmatpush1.bf16.msra.mxu1 %v3891_v58  ;;  %v3887_v14 = vmax.f32 %v3875_v1, 0.0 }
 0xf37   : > { %v3881_v2 = vadd.f32 %v3880_v45, %v6048_v16  ;;  %v3888_v34 = vmax.f32 %v3877_v18, 0.0 }
 0xf38   : > { %v3889_v51 = vmax.f32 %v3879_v37, 0.0 }
 0xf39   : > { %v3890_v55 = vmax.f32 %v3881_v2, 0.0 }
 0xf3a   : > { %v3893_v25 = vpack.c.bf16 %v3889_v51, %v3887_v14 }
 0xf3b   : > { %v3894_v27 = vpack.c.bf16 %v3890_v55, %v3888_v34  ;;  %v4025_v12 = vpop.f32.mrb[124].mxu0 }
 0xf3c   : > { %v4026_v36 = vadd.f32 %v4025_v12, %v6953_v53  ;;  %v4027_v9 = vpop.f32.mrb[125].mxu0 }
 0xf3d   : > { %v4028_v29 = vadd.f32 %v4027_v9, %v6953_v53  ;;  %3897 = vmatprep.subr.bf16.mxu1 %v3894_v27  ;;  %v4029_v24 = vpop.f32.mrb[126].mxu0 }
 0xf3e   : > { %v4030_v49 = vadd.f32 %v4029_v24, %v6954_v40  ;;  %3898 = vmatpush1.bf16.msra.mxu1 %v3893_v25  ;;  %v4031_v41 = vpop.f32.mrb[127].mxu0  ;;  %v4044_v4 = vmax.f32 %v4026_v36, 0.0 }
 0xf3f   : > { %v4032_v0 = vadd.f32 %v4031_v41, %v6954_v40  ;;  %v4045_v47 = vmax.f32 %v4028_v29, 0.0 }
 0xf40   : > { %v4046_v39 = vmax.f32 %v4030_v49, 0.0  ;;  %v7028_v49 = vld [vmem:[#allocation82_spill] sm:$0xff] }
 0xf41   : > { %v4047_v52 = vmax.f32 %v4032_v0, 0.0  ;;  %4548 = vmatmul.mubr.msk.bf16.vlgmr.msra.gmra.mrb[128].mxu1 %vm1320_vm2, %v6698_v17 }
 0xf42   : > { %v4052_v53 = vpack.c.bf16 %v4046_v39, %v4044_v4  ;;  %4088 = vmatprep.mubr.bf16.mxu1 %v6871_v19  ;;  %v7029_v39 = vld [vmem:[#allocation84_spill] sm:$0xff] }
 0xf43   : > { %v4053_v43 = vpack.c.bf16 %v4047_v52, %v4045_v47  ;;  %v4035_v6 = vpop.f32.mrb[128].mxu0 }
 0xf44   : > { %v4036_v32 = vadd.f32 %v4035_v6, %v6955_v54  ;;  %v4037_v40 = vpop.f32.mrb[129].mxu0  ;;  %v7031_v6 = vld [vmem:[#allocation86_spill] sm:$0xff] }
 0xf45   : > { %v4038_v31 = vadd.f32 %v4037_v40, %v6955_v54  ;;  %v4039_v15 = vpop.f32.mrb[130].mxu0  ;;  %4056 = vmatprep.subr.bf16.mxu1 %v4053_v43 }
 0xf46   : > { %v4040_v58 = vadd.f32 %v4039_v15, %v6956_v8  ;;  %v4041_v59 = vpop.f32.mrb[131].mxu0  ;;  %4057 = vmatpush1.bf16.msra.mxu1 %v4052_v53  ;;  %v4048_v1 = vmax.f32 %v4036_v32, 0.0  ;;  %v7030_v53 = vld [vmem:[#allocation85_spill] sm:$0xff] }
 0xf47   : > { %v4042_v3 = vadd.f32 %v4041_v59, %v6956_v8  ;;  %v4049_v18 = vmax.f32 %v4038_v31, 0.0 }
 0xf48   : > { %v4050_v48 = vmax.f32 %v4040_v58, 0.0 }
 0xf49   : > { %v4051_v7 = vmax.f32 %v4042_v3, 0.0 }
 0xf4a   : > { %v4054_v37 = vpack.c.bf16 %v4050_v48, %v4048_v1 }
 0xf4b   : > { %v4055_v45 = vpack.c.bf16 %v4051_v7, %v4049_v18 }
 0xf4d   : > { %4058 = vmatprep.subr.bf16.mxu1 %v4055_v45 }
 0xf4e   : > { %4059 = vmatpush1.bf16.msra.mxu1 %v4054_v37  ;;  %v7032_v37 = vld [vmem:[#allocation87_spill] sm:$0xff] }
 0xf51   : > { %4555 = vmatmul.mubr.msk.bf16.vlgmr.msra.gmra.mrb[132].mxu1 %vm1320_vm2, %v6588_v20 }
 0xf52   : > { %4098 = vmatprep.mubr.bf16.mxu1 %v6871_v19 }
 0xf59   : > { %4556 = vmatmul.mubr.msk.bf16.gmra.mrb[136].mxu1 %vm1320_vm2, %v6596_v62 }
 0xf5a   : > { %4108 = vmatprep.mubr.bf16.mxu1 %v6871_v19 }
 0xf61   : > { %4557 = vmatmul.mubr.msk.bf16.gmra.mrb[140].mxu1 %vm1320_vm2, %v6604_v21 }
 0xf62   : > { %4289 = vmatprep.mubr.bf16.mxu1 %v6871_v19 }
0x1014   : > { %v3929_v54 = vpop.f32.mrb[128].mxu1 }
0x1015   : > { %v3930_v8 = vadd.f32 %v3929_v54, %v6074_v44  ;;  %v3931_v2 = vpop.f32.mrb[129].mxu1 }
0x1016   : > { %v3932_v14 = vadd.f32 %v3931_v2, %v6074_v44  ;;  %v3933_v51 = vpop.f32.mrb[130].mxu1 }
0x1017   : > { %v4549_v20 = vmul.f32 -1.442695, %v3930_v8  ;;  %v3934_v34 = vpop.f32.mrb[131].mxu1  ;;  %v7033_v51 = vld [vmem:[#allocation88_spill] sm:$0xff] }
0x1018   : > { %v4550_v55 = vmul.f32 -1.442695, %v3932_v14  ;;  %v3955_v14 = vrot.slane %v6675_v30, %v6099_v33 }
0x1019   : > { %4727 = vpow2.f32 %v4549_v20 }
0x101a   : > { %4729 = vpow2.f32 %v4550_v55 }
0x1023   : > { %v4728_v62 = vpop.eup %4727 }
0x1024   : > { %v4730_v25 = vpop.eup %4729  ;;  %v3942_v27 = vadd.f32 1.0, %v4728_v62  ;;  %v4090_v12 = vpop.f32.mrb[132].mxu1  ;;  %v7034_v62 = vld [vmem:[#allocation89_spill] sm:$0xff] }
0x1025   : > { %v3943_v36 = vadd.f32 1.0, %v4730_v25  ;;  %v4091_v21 = vadd.f32 %v4090_v12, %v5440_v22  ;;  %v4092_v9 = vpop.f32.mrb[133].mxu1 }
0x1026   : > { %4731 = vrcp.f32 %v3942_v27  ;;  %v4093_v29 = vadd.f32 %v4092_v9, %v5440_v22  ;;  %v4094_v24 = vpop.f32.mrb[134].mxu1  ;;  %v7035_v27 = vld [vmem:[#allocation90_spill] sm:$0xff] }
0x1027   : > { %4733 = vrcp.f32 %v3943_v36  ;;  %v4172_v41 = vadd.f32 %v7028_v49, %v4091_v21  ;;  %v4095_v0 = vadd.f32 %v4094_v24, %v5478_v35  ;;  %v4096_v4 = vpop.f32.mrb[135].mxu1 }
0x1028   : > { %v4173_v47 = vadd.f32 %v7029_v39, %v4093_v29  ;;  %v4097_v52 = vadd.f32 %v4096_v4, %v5478_v35  ;;  %v3951_v35 = vrot.slane %v6672_v13, %v6099_v33 }
0x1029   : > { %v4174_v43 = vadd.f32 %v7030_v53, %v4095_v0  ;;  %v4180_v40 = vmax.f32 %v4172_v41, 0.0 }
0x102a   : > { %v4175_v32 = vadd.f32 %v7031_v6, %v4097_v52  ;;  %v4181_v15 = vmax.f32 %v4173_v47, 0.0 }
0x102b   : > { %v4182_v31 = vmax.f32 %v4174_v43, 0.0 }
0x102c   : > { %v4183_v58 = vmax.f32 %v4175_v32, 0.0  ;;  %v4100_v22 = vpop.f32.mrb[136].mxu1 }
0x102d   : > { %v4188_v59 = vpack.c.bf16 %v4182_v31, %v4180_v40  ;;  %v4101_v3 = vadd.f32 %v4100_v22, %v5938_v38  ;;  %v4102_v1 = vpop.f32.mrb[137].mxu1 }
0x102e   : > { %v4103_v48 = vadd.f32 %v4102_v1, %v5938_v38  ;;  %v4104_v18 = vpop.f32.mrb[138].mxu1  ;;  %v4189_v7 = vpack.c.bf16 %v4183_v58, %v4181_v15 }
0x102f   : > { %v4176_v45 = vadd.f32 %v7032_v37, %v4101_v3  ;;  %v4105_v54 = vadd.f32 %v4104_v18, %v5954_v26  ;;  %v4106_v8 = vpop.f32.mrb[139].mxu1  ;;  %v4141_v18 = vstv %s4552_s29 }
0x1030   : > { %v4732_v2 = vpop.eup %4731  ;;  %v4177_v20 = vadd.f32 %v7033_v51, %v4103_v48  ;;  %v4107_v34 = vadd.f32 %v4106_v8, %v5954_v26  ;;  %4192 = vmatprep.subr.bf16.mxu0 %v4189_v7 }
0x1031   : > { %v4734_v38 = vpop.eup %4733  ;;  %v3956_v55 = vmul.f32 %v4732_v2, %v3951_v35  ;;  %v4178_v25 = vadd.f32 %v7034_v62, %v4105_v54  ;;  %4193 = vmatpush1.bf16.msra.mxu0 %v4188_v59  ;;  %v4184_v21 = vmax.f32 %v4176_v45, 0.0  ;;  %v4142_v45 = vmul.f32 %v4141_v18, %v6031_v10 }
0x1032   : > { %v3957_v13 = vmul.f32 %v4734_v38, %v3955_v14  ;;  %v4179_v12 = vadd.f32 %v7035_v27, %v4107_v34  ;;  %v4185_v29 = vmax.f32 %v4177_v20, 0.0  ;;  %v4143_v54 = vmul.f32 %v4141_v18, %v6036_v60 }
0x1033   : > { %v6739_v36 = vadd.f32 %v3956_v55, %v6632_v63  ;;  %v4186_v9 = vmax.f32 %v4178_v25, 0.0 }
0x1034   : > { %v6742_v30 = vadd.f32 %v3957_v13, %v6635_v46  ;;  %v4187_v24 = vmax.f32 %v4179_v12, 0.0  ;;  %v4110_v26 = vpop.f32.mrb[140].mxu1 }
0x1035   : > { %v4190_v49 = vpack.c.bf16 %v4186_v9, %v4184_v21  ;;  %v4111_v41 = vadd.f32 %v4110_v26, %v5966_v56  ;;  %v4112_v0 = vpop.f32.mrb[141].mxu1 }
0x1036   : > { %v4113_v4 = vadd.f32 %v4112_v0, %v5966_v56  ;;  %v4191_v39 = vpack.c.bf16 %v4187_v24, %v4185_v29  ;;  %v4114_v47 = vpop.f32.mrb[142].mxu1 }
0x1037   : > { %v4117_v52 = vsub.f32 0.0, %v4111_v41  ;;  %v4115_v53 = vpop.f32.mrb[143].mxu1 }
0x1038   : > { %v4118_v63 = vsub.f32 0.0, %v4113_v4  ;;  %4194 = vmatprep.subr.bf16.mxu0 %v4191_v39 }
0x1039   : > { %v4119_v43 = vmul.f32 %v4117_v52, %v5970_v50  ;;  %4195 = vmatpush1.bf16.msra.mxu0 %v4190_v49 }
0x103a   : > { %v4120_v46 = vmul.f32 %v4118_v63, %v5970_v50 }
0x103b   : > { %v4121_v6 = vand.u32 2147483647, %v4119_v43  ;;  %vm4131_vm6 = vcmp.le.f32.partialorder %v4119_v43, 0.0 }
0x103c   : > { %v4122_v32 = vand.u32 2147483647, %v4120_v46  ;;  %4558 = vmatmul.mubr.msk.bf16.vlgmr.msra.gmra.mrb[132].mxu0 %vm1320_vm2, %v6645_v61  ;;  %vm4132_vm7 = vcmp.le.f32.partialorder %v4120_v46, 0.0 }
0x103d   : > { %v4123_v40 = vsub.f32 0.0, %v4121_v6  ;;  %4234 = vmatprep.mubr.bf16.mxu0 %v6871_v19 }
0x103e   : > { %v4124_v56 = vsub.f32 0.0, %v4122_v32 }
0x103f   : > { %v4125_v31 = vmul.f32 1.442695, %v4123_v40 }
0x1040   : > { %v4127_v15 = vmul.f32 1.442695, %v4124_v56 }
0x1041   : > { %4735 = vpow2.f32 %v4125_v31 }
0x1042   : > { %4737 = vpow2.f32 %v4127_v15 }
0x1044   : > { %4559 = vmatmul.mubr.msk.bf16.gmra.mrb[136].mxu0 %vm1320_vm2, %v6656_v5 }
0x104b   : > { %v4736_v58 = vpop.eup %4735 }
0x104c   : > { %v4738_v22 = vpop.eup %4737  ;;  %v4129_v59 = vmul.f32 0.5, %v4736_v58 }
0x104d   : > { %v4130_v3 = vmul.f32 0.5, %v4738_v22 }
0x104e   : > { %v4133_v1 = vsub.f32 1.0, %v4129_v59 }
0x104f   : > { %v4134_v48 = vsub.f32 1.0, %v4130_v3 }
0x1050   : > { %v4135_v61 = vsel %vm4131_vm6, %v4129_v59, %v4133_v1 }
0x1051   : > { %v4137_v19 = vmul.f32 %v4135_v61, %v5970_v50  ;;  %v4136_v7 = vsel %vm4132_vm7, %v4130_v3, %v4134_v48 }
0x1052   : > { %v4138_v35 = vmul.f32 %v4136_v7, %v5970_v50 }
0x1053   : > { %v4139_v37 = vmax.f32 %v4137_v19, 0.0 }
0x1054   : > { %v4140_v5 = vmax.f32 %v4138_v35, 0.0 }
0x1055   : > { %v4144_v8 = vsub.f32 0.0, %v4139_v37 }
0x1056   : > { %v4145_v2 = vsub.f32 0.0, %v4140_v5 }
0x1057   : > { %v4146_v14 = vmul.f32 %v4144_v8, %v4142_v45 }
0x1058   : > { %v4147_v51 = vmul.f32 %v4145_v2, %v4143_v54 }
0x1059   : > { %v4148_v20 = vmul.f32 1.442695, %v4146_v14 }
0x105a   : > { %v4150_v34 = vmul.f32 1.442695, %v4147_v51 }
0x105b   : > { %4739 = vpow2.f32 %v4148_v20 }
0x105c   : > { %4741 = vpow2.f32 %v4150_v34 }
0x1065   : > { %v4740_v38 = vpop.eup %4739 }
0x1066   : > { %v4742_v55 = vpop.eup %4741  ;;  %v4152_v62 = vsub.f32 1.0, %v4740_v38 }
0x1067   : > { %v4153_v25 = vsub.f32 1.0, %v4742_v55 }
0x1068   : > { %v4154_v50 = vmul.f32 %v4152_v62, %v6678_v11 }
0x1069   : > { %v4155_v13 = vmul.f32 %v4153_v25, %v6681_v23 }
0x106b   : > { %v4317_v7 = vrot.slane %v4155_v13, %v6099_v33 }
0x110f   : > { %v4226_v10 = vpop.f32.mrb[132].mxu0 }
0x1110   : > { %v4227_v27 = vadd.f32 %v4226_v10, %v5947_v28  ;;  %v4228_v60 = vpop.f32.mrb[133].mxu0 }
0x1111   : > { %v4229_v12 = vadd.f32 %v4228_v60, %v5947_v28  ;;  %v4230_v21 = vpop.f32.mrb[134].mxu0 }
0x1112   : > { %v4231_v9 = vadd.f32 %v4230_v21, %v6042_v57  ;;  %v4232_v29 = vpop.f32.mrb[135].mxu0  ;;  %v4245_v26 = vmax.f32 %v4227_v27, 0.0 }
0x1113   : > { %v4233_v24 = vadd.f32 %v4232_v29, %v6042_v57  ;;  %v4246_v41 = vmax.f32 %v4229_v12, 0.0 }
0x1114   : > { %v4247_v49 = vmax.f32 %v4231_v9, 0.0 }
0x1115   : > { %v4248_v0 = vmax.f32 %v4233_v24, 0.0 }
0x1116   : > { %v4253_v4 = vpack.c.bf16 %v4247_v49, %v4245_v26 }
0x1117   : > { %v4254_v11 = vpack.c.bf16 %v4248_v0, %v4246_v41  ;;  %v4236_v39 = vpop.f32.mrb[136].mxu0 }
0x1118   : > { %v4237_v23 = vadd.f32 %v4236_v39, %v5957_v42  ;;  %v4238_v47 = vpop.f32.mrb[137].mxu0 }
0x1119   : > { %v4239_v52 = vadd.f32 %v4238_v47, %v5957_v42  ;;  %v4240_v53 = vpop.f32.mrb[138].mxu0  ;;  %4257 = vmatprep.subr.bf16.mxu1 %v4254_v11 }
0x111a   : > { %v4241_v28 = vadd.f32 %v4240_v53, %v6048_v16  ;;  %v4242_v63 = vpop.f32.mrb[139].mxu0  ;;  %4258 = vmatpush1.bf16.msra.mxu1 %v4253_v4  ;;  %v4249_v43 = vmax.f32 %v4237_v23, 0.0 }
0x111b   : > { %v4243_v57 = vadd.f32 %v4242_v63, %v6048_v16  ;;  %v4250_v6 = vmax.f32 %v4239_v52, 0.0 }
0x111c   : > { %v4251_v46 = vmax.f32 %v4241_v28, 0.0 }
0x111d   : > { %v4252_v32 = vmax.f32 %v4243_v57, 0.0 }
0x111e   : > { %v4255_v40 = vpack.c.bf16 %v4251_v46, %v4249_v43 }
0x111f   : > { %v4256_v56 = vpack.c.bf16 %v4252_v32, %v4250_v6 }
0x1121   : > { %4259 = vmatprep.subr.bf16.mxu1 %v4256_v56 }
0x1122   : > { %4260 = vmatpush1.bf16.msra.mxu1 %v4255_v40 }
0x1125   : > { %4560 = vmatmul.mubr.msk.bf16.vlgmr.msra.gmra.mrb[144].mxu1 %vm1320_vm2, %v6698_v17  ;;  %v4313_v17 = vrot.slane %v4154_v50, %v6099_v33 }
0x11f8   : > { %v4291_v42 = vpop.f32.mrb[144].mxu1 }
0x11f9   : > { %v4292_v31 = vadd.f32 %v4291_v42, %v6074_v44  ;;  %v4293_v15 = vpop.f32.mrb[145].mxu1 }
0x11fa   : > { %v4294_v58 = vadd.f32 %v4293_v15, %v6074_v44  ;;  %v4295_v22 = vpop.f32.mrb[146].mxu1 }
0x11fb   : > { %v4561_v59 = vmul.f32 -1.442695, %v4292_v31  ;;  %v4296_v16 = vpop.f32.mrb[147].mxu1 }
0x11fc   : > { %v4562_v3 = vmul.f32 -1.442695, %v4294_v58 }
0x11fd   : > { %4743 = vpow2.f32 %v4561_v59 }
0x11fe   : > { %4745 = vpow2.f32 %v4562_v3 }
0x1207   : > { %v4744_v1 = vpop.eup %4743 }
0x1208   : > { %v4746_v48 = vpop.eup %4745  ;;  %v4304_v61 = vadd.f32 1.0, %v4744_v1 }
0x1209   : > { %v4305_v18 = vadd.f32 1.0, %v4746_v48 }
0x120a   : > { %4747 = vrcp.f32 %v4304_v61 }
0x120b   : > { %4749 = vrcp.f32 %v4305_v18 }
0x1214   : > { %v4748_v19 = vpop.eup %4747 }
0x1215   : > { %v4750_v35 = vpop.eup %4749  ;;  %v4318_v44 = vmul.f32 %v4748_v19, %v4313_v17 }
0x1216   : > { %v4319_v37 = vmul.f32 %v4750_v35, %v4317_v7 }
0x1217   : > { %v4320_v45 = vadd.f32 %v4318_v44, %v6739_v36 }
0x1218   : > { %v4321_v5 = vadd.f32 %v4319_v37, %v6742_v30 }
0x121a   : > { %v4324_v54 = vcombine.low %v4320_v45, %v4321_v5 }
0x121c   : > { %4326 = vst [vmem:[%s627_s21] sm:$0x77] %v4324_v54 }
0x121d PF: > { %s31_s30 = sadd.s32 1, %s4811_s30  }
0x121e   : > { %p28_p3 = scmp.ge.s32.totalorder %s31_s30, 4  }
0x1220   :  { %30 = sbr.rel (!%p28_p3) target bundleno = 13 (0xd), region = 134 }
0x1227   :  { %4349 = vsyncpa [#allocation4], 1 }
0x1228   :  { %4351 = vsyncpa [#allocation4 + $0x1], 1 }
0x1229   :  { %4352 = vsyncpa [#allocation6], 1 }

</bundles_post_ra>
